<compile_context>
chip_gen: v7x
topology: tpu7x:2x2x1
jax: 0.10.0
libtpu: 0.0.40
codegen_flags: <defaults>
</compile_context>

<pallas_src>
import functools

import numpy as np

import jax
import jax.numpy as jnp
from jax.experimental import pallas as pl
from jax.experimental.pallas import tpu as pltpu


# ---------------------------------------------------------------------------
# Fused Feature kernel (channels-major: activations are (C, H*W))
# ---------------------------------------------------------------------------
def _inn_apply(x, w1_ref, w3_ref, w2_ref, b_ref, masks_ref, *, H, W):
    """One INN bottleneck: 1x1 -> ReLU6 -> 3x3(pad=1) -> ReLU6 -> 1x1 -> BN(eval).

    x         : (Cin, H*W)  f32 activation (channels on sublanes, pixels on lanes)
    w1_ref    : (Ch, Cin)   1x1 conv weight (no bias)
    w3_ref    : (9, Ch, Ch) 3x3 conv weight, tap-major (t = dy*3+dx) -> (Cout, Cin)
    w2_ref    : (Cout, Ch)  1x1 conv weight with eval-BN scale folded in
    b_ref     : (Cout, 1)   eval-BN bias
    masks_ref : (9, 1, H*W) f32 zero-padding validity mask per tap
    """
    HW = H * W

    # 1x1 conv + ReLU6:  (Ch, Cin) @ (Cin, HW) -> (Ch, HW)
    h = jnp.dot(w1_ref[...], x, preferred_element_type=jnp.float32)
    h = jnp.clip(h, 0.0, 6.0)

    # 3x3 conv (padding=1) as 9 accumulated tap matmuls.  Tap (dy, dx) reads the
    # activation shifted by s = (dy-1)*W + (dx-1) pixels along the flattened
    # row-major H*W lane axis; pltpu.roll provides the shift (XLU) and the
    # precomputed mask zeroes pixels whose source fell outside the image.
    acc = jnp.dot(w3_ref[4], h, preferred_element_type=jnp.float32)   # center tap
    for dy in range(3):
        for dx in range(3):
            t = dy * 3 + dx
            if t == 4:
                continue
            s = (dy - 1) * W + (dx - 1)
            shifted = pltpu.roll(h, shift=(-s) % HW, axis=1) * masks_ref[t]
            acc = acc + jnp.dot(w3_ref[t], shifted,
                                preferred_element_type=jnp.float32)
    h2 = jnp.clip(acc, 0.0, 6.0)

    # 1x1 conv (BN scale pre-folded into the weight) + BN bias.
    y = jnp.dot(w2_ref[...], h2, preferred_element_type=jnp.float32)
    return y + b_ref[...]


def _feature_kernel(f1_ref, f2_ref, masks_ref,
                    pw1, pw3, pw2, pb,
                    sw1, sw3, sw2, sb,
                    f1_out, f2_out, *, H, W):
    # f2 = f2 + phi(f1)
    f2_new = f2_ref[0] + _inn_apply(f1_ref[0], pw1, pw3, pw2, pb, masks_ref,
                                    H=H, W=W)
    f2_out[0] = f2_new
    # f1 = f1 + seta(f2)
    f1_out[0] = f1_ref[0] + _inn_apply(f2_new, sw1, sw3, sw2, sb, masks_ref,
                                       H=H, W=W)


def _make_tap_masks(H, W):
    """(9, 1, H*W) f32 validity masks implementing the 3x3 conv zero padding."""
    ys, xs = np.meshgrid(np.arange(H), np.arange(W), indexing="ij")
    masks = []
    for dy in range(3):
        for dx in range(3):
            oy, ox = dy - 1, dx - 1
            valid = ((ys + oy >= 0) & (ys + oy < H) &
                     (xs + ox >= 0) & (xs + ox < W))
            masks.append(valid.reshape(1, H * W))
    return jnp.asarray(np.stack(masks, axis=0), jnp.float32)


def feature_forward(f1_nchw, f2_nchw, params):
    """Feature.forward.  Inputs/outputs are NCHW: (B, 32, H, W)."""
    B, C, H, W = f1_nchw.shape
    HW = H * W

    # Channels-major, lane-dense: (B, C, H*W) is a free reshape of NCHW.
    f1 = f1_nchw.reshape(B, C, HW)
    f2 = f2_nchw.reshape(B, C, HW)

    masks = _make_tap_masks(H, W)

    phi, seta = params["phi"], params["seta"]
    Ch = phi["w1"].shape[0]
    Cout = phi["w2"].shape[0]

    # Fold eval-mode BN scale into the last 1x1 weight; keep only the bias add.
    pw2 = phi["scale"][:, None] * phi["w2"]
    sw2 = seta["scale"][:, None] * seta["w2"]
    pb = phi["bias"][:, None]
    sb = seta["bias"][:, None]

    weights = [phi["w1"], phi["w3"], pw2, pb,
               seta["w1"], seta["w3"], sw2, sb]

    def _whole(a):
        zeros = (0,) * a.ndim
        return pl.BlockSpec(a.shape, lambda b, _z=zeros: _z)

    act_spec = pl.BlockSpec((1, C, HW), lambda b: (b, 0, 0))

    flops = 4 * B * HW * (C * Ch + 9 * Ch * Ch + Ch * Cout)  # 2 INNs, 2 flops/MAC
    bytes_accessed = 4 * (4 * B * C * HW
                          + sum(int(np.prod(w.shape)) for w in weights)
                          + 9 * HW)
    cost = pl.CostEstimate(flops=flops, transcendentals=0,
                           bytes_accessed=int(bytes_accessed))

    out1, out2 = pl.pallas_call(
        functools.partial(_feature_kernel, H=H, W=W),
        out_shape=(jax.ShapeDtypeStruct((B, C, HW), jnp.float32),
                   jax.ShapeDtypeStruct((B, C, HW), jnp.float32)),
        grid_spec=pltpu.PrefetchScalarGridSpec(
            num_scalar_prefetch=0,
            grid=(B,),
            in_specs=[act_spec, act_spec, _whole(masks)]
                     + [_whole(w) for w in weights],
            out_specs=(act_spec, act_spec),
        ),
        compiler_params=pltpu.CompilerParams(
            dimension_semantics=("parallel",)),
        cost_estimate=cost,
    )(f1, f2, masks, *weights)

    return out1.reshape(B, C, H, W), out2.reshape(B, C, H, W)


# ---------------------------------------------------------------------------
# Parameter construction (deterministic, synthetic; BN folded for eval mode)
# ---------------------------------------------------------------------------
def init_inn_params(key, cin=32, cout=32, ratio=2):
    ch = cin * ratio
    k1, k2, k3, k4, k5 = jax.random.split(key, 5)
    w1 = 0.10 * jax.random.normal(k1, (ch, cin), jnp.float32)        # (Ch, Cin)
    w3 = 0.05 * jax.random.normal(k2, (9, ch, ch), jnp.float32)      # (tap, Cout, Cin)
    w2 = 0.10 * jax.random.normal(k3, (cout, ch), jnp.float32)       # (Cout, Ch)
    gamma = 1.0 + 0.1 * jax.random.normal(k4, (cout,), jnp.float32)
    beta = 0.1 * jax.random.normal(k5, (cout,), jnp.float32)
    running_mean = jnp.zeros((cout,), jnp.float32)
    running_var = jnp.ones((cout,), jnp.float32)
    eps = 1e-5
    scale = gamma / jnp.sqrt(running_var + eps)
    bias = beta - running_mean * scale
    return {"w1": w1, "w3": w3, "w2": w2, "scale": scale, "bias": bias}


# ---------------------------------------------------------------------------
# Pure-JAX reference (lax.conv, full precision) for correctness validation
# ---------------------------------------------------------------------------
def _conv_ref(x_nchw, w_oihw, padding):
    return jax.lax.conv_general_dilated(
        x_nchw, w_oihw, window_strides=(1, 1), padding=padding,
        dimension_numbers=("NCHW", "OIHW", "NCHW"),
        precision=jax.lax.Precision.HIGHEST)


def _inn_ref(x, p):
    ch, cin = p["w1"].shape
    cout = p["w2"].shape[0]
    w1 = p["w1"].reshape(ch, cin, 1, 1)
    w3 = p["w3"].reshape(3, 3, ch, ch).transpose(2, 3, 0, 1)          # OIHW
    w2 = p["w2"].reshape(cout, ch, 1, 1)
    h = jnp.clip(_conv_ref(x, w1, "VALID"), 0.0, 6.0)
    h = jnp.clip(_conv_ref(h, w3, [(1, 1), (1, 1)]), 0.0, 6.0)
    y = _conv_ref(h, w2, "VALID")
    return y * p["scale"][None, :, None, None] + p["bias"][None, :, None, None]


def feature_ref(f1, f2, params):
    f2 = f2 + _inn_ref(f1, params["phi"])
    f1 = f1 + _inn_ref(f2, params["seta"])
    return f1, f2


# ---------------------------------------------------------------------------
if __name__ == "__main__":
    key = jax.random.PRNGKey(0)
    kp, ks, k1, k2 = jax.random.split(key, 4)

    # TODO(synk): BatchNorm2d is implemented in eval/inference mode (folded
    # running stats); training-mode batch statistics are not implemented.
    params = {"phi": init_inn_params(kp), "seta": init_inn_params(ks)}

    B, C, H, W = 2, 32, 16, 16
    f1 = jax.random.normal(k1, (B, C, H, W), jnp.float32)
    f2 = jax.random.normal(k2, (B, C, H, W), jnp.float32)

    fwd = jax.jit(functools.partial(feature_forward, params=params))
    o1, o2 = fwd(f1, f2)
    o1, o2 = jax.block_until_ready((o1, o2))

    assert o1.shape == (B, C, H, W), o1.shape
    assert o2.shape == (B, C, H, W), o2.shape
    assert jnp.all(jnp.isfinite(o1)) and jnp.all(jnp.isfinite(o2))

    r1, r2 = feature_ref(f1, f2, params)
    assert jnp.allclose(o1, r1, atol=2e-3, rtol=2e-3), \
        float(jnp.max(jnp.abs(o1 - r1)))
    assert jnp.allclose(o2, r2, atol=2e-3, rtol=2e-3), \
        float(jnp.max(jnp.abs(o2 - r2)))

    print("KERNEL_OK")
</pallas_src>

<mosaic_0001>
module attributes {stable_mosaic.version = 11 : i64} {
  func.func @_feature_kernel(%arg0: i32, %arg1: memref<1x32x256xf32, #tpu.memory_space<vmem>>, %arg2: memref<1x32x256xf32, #tpu.memory_space<vmem>>, %arg3: memref<9x1x256xf32, #tpu.memory_space<vmem>>, %arg4: memref<64x32xf32, #tpu.memory_space<vmem>>, %arg5: memref<9x64x64xf32, #tpu.memory_space<vmem>>, %arg6: memref<32x64xf32, #tpu.memory_space<vmem>>, %arg7: memref<32x1xf32, #tpu.memory_space<vmem>>, %arg8: memref<64x32xf32, #tpu.memory_space<vmem>>, %arg9: memref<9x64x64xf32, #tpu.memory_space<vmem>>, %arg10: memref<32x64xf32, #tpu.memory_space<vmem>>, %arg11: memref<32x1xf32, #tpu.memory_space<vmem>>, %arg12: memref<1x32x256xf32, #tpu.memory_space<vmem>>, %arg13: memref<1x32x256xf32, #tpu.memory_space<vmem>>) attributes {dimension_semantics = [#tpu.dimension_semantics<parallel>], iteration_bounds = array<i64: 2>, scalar_prefetch = 0 : i64, scratch_operands = 0 : i64, tpu.core_type = #tpu.core_type<tc>, window_params = [{transform_indices = @transform_0, window_bounds = array<i64: 1, 32, 256>}, {transform_indices = @transform_1, window_bounds = array<i64: 1, 32, 256>}, {pipeline_mode = #tpu.pipeline_mode<synchronous>, transform_indices = @transform_2, window_bounds = array<i64: 9, 1, 256>}, {pipeline_mode = #tpu.pipeline_mode<synchronous>, transform_indices = @transform_3, window_bounds = array<i64: 64, 32>}, {pipeline_mode = #tpu.pipeline_mode<synchronous>, transform_indices = @transform_4, window_bounds = array<i64: 9, 64, 64>}, {pipeline_mode = #tpu.pipeline_mode<synchronous>, transform_indices = @transform_5, window_bounds = array<i64: 32, 64>}, {pipeline_mode = #tpu.pipeline_mode<synchronous>, transform_indices = @transform_6, window_bounds = array<i64: 32, 1>}, {pipeline_mode = #tpu.pipeline_mode<synchronous>, transform_indices = @transform_7, window_bounds = array<i64: 64, 32>}, {pipeline_mode = #tpu.pipeline_mode<synchronous>, transform_indices = @transform_8, window_bounds = array<i64: 9, 64, 64>}, {pipeline_mode = #tpu.pipeline_mode<synchronous>, transform_indices = @transform_9, window_bounds = array<i64: 32, 64>}, {pipeline_mode = #tpu.pipeline_mode<synchronous>, transform_indices = @transform_10, window_bounds = array<i64: 32, 1>}, {transform_indices = @transform_11, window_bounds = array<i64: 1, 32, 256>}, {transform_indices = @transform_12, window_bounds = array<i64: 1, 32, 256>}]} {
    %c0 = arith.constant 0 : index
    %c0_0 = arith.constant 0 : index
    %c0_1 = arith.constant 0 : index
    %0 = vector.load %arg2[%c0, %c0_0, %c0_1] : memref<1x32x256xf32, #tpu.memory_space<vmem>>, vector<1x32x256xf32>
    %1 = vector.shape_cast %0 : vector<1x32x256xf32> to vector<32x256xf32>
    %c0_2 = arith.constant 0 : index
    %c0_3 = arith.constant 0 : index
    %c0_4 = arith.constant 0 : index
    %2 = vector.load %arg1[%c0_2, %c0_3, %c0_4] : memref<1x32x256xf32, #tpu.memory_space<vmem>>, vector<1x32x256xf32>
    %3 = vector.shape_cast %2 : vector<1x32x256xf32> to vector<32x256xf32>
    %c0_5 = arith.constant 0 : index
    %c0_6 = arith.constant 0 : index
    %4 = vector.load %arg4[%c0_5, %c0_6] : memref<64x32xf32, #tpu.memory_space<vmem>>, vector<64x32xf32>
    %cst = arith.constant dense<0.000000e+00> : vector<64x256xf32>
    %5 = tpu.matmul %4, %3, %cst {dimension_numbers = #tpu.dot_dimension_numbers<[1], [0], [0], [1], [0, 0, 1, 1], [], []>} : vector<64x32xf32>, vector<32x256xf32>, vector<64x256xf32> -> vector<64x256xf32>
    %cst_7 = arith.constant 0.000000e+00 : f32
    %cst_8 = arith.constant 6.000000e+00 : f32
    %6 = vector.broadcast %cst_7 : f32 to vector<64x256xf32>
    %7 = arith.maximumf %6, %5 : vector<64x256xf32>
    %8 = vector.broadcast %cst_8 : f32 to vector<64x256xf32>
    %9 = arith.minimumf %8, %7 : vector<64x256xf32>
    %c4 = arith.constant 4 : index
    %c0_9 = arith.constant 0 : index
    %c0_10 = arith.constant 0 : index
    %10 = vector.load %arg5[%c4, %c0_9, %c0_10] : memref<9x64x64xf32, #tpu.memory_space<vmem>>, vector<1x64x64xf32>
    %11 = vector.shape_cast %10 : vector<1x64x64xf32> to vector<64x64xf32>
    %cst_11 = arith.constant dense<0.000000e+00> : vector<64x256xf32>
    %12 = tpu.matmul %11, %9, %cst_11 {dimension_numbers = #tpu.dot_dimension_numbers<[1], [0], [0], [1], [0, 0, 1, 1], [], []>} : vector<64x64xf32>, vector<64x256xf32>, vector<64x256xf32> -> vector<64x256xf32>
    %c17_i32 = arith.constant 17 : i32
    %13 = tpu.dynamic_rotate %9 by %c17_i32 dim 1 : vector<64x256xf32>, i32 -> vector<64x256xf32>
    %c0_12 = arith.constant 0 : index
    %c0_13 = arith.constant 0 : index
    %c0_14 = arith.constant 0 : index
    %14 = vector.load %arg3[%c0_12, %c0_13, %c0_14] : memref<9x1x256xf32, #tpu.memory_space<vmem>>, vector<1x1x256xf32>
    %15 = vector.shape_cast %14 : vector<1x1x256xf32> to vector<1x256xf32>
    %16 = vector.broadcast %15 : vector<1x256xf32> to vector<64x256xf32>
    %17 = arith.mulf %13, %16 : vector<64x256xf32>
    %c0_15 = arith.constant 0 : index
    %c0_16 = arith.constant 0 : index
    %c0_17 = arith.constant 0 : index
    %18 = vector.load %arg5[%c0_15, %c0_16, %c0_17] : memref<9x64x64xf32, #tpu.memory_space<vmem>>, vector<1x64x64xf32>
    %19 = vector.shape_cast %18 : vector<1x64x64xf32> to vector<64x64xf32>
    %cst_18 = arith.constant dense<0.000000e+00> : vector<64x256xf32>
    %20 = tpu.matmul %19, %17, %cst_18 {dimension_numbers = #tpu.dot_dimension_numbers<[1], [0], [0], [1], [0, 0, 1, 1], [], []>} : vector<64x64xf32>, vector<64x256xf32>, vector<64x256xf32> -> vector<64x256xf32>
    %21 = arith.addf %12, %20 : vector<64x256xf32>
    %c16_i32 = arith.constant 16 : i32
    %22 = tpu.dynamic_rotate %9 by %c16_i32 dim 1 : vector<64x256xf32>, i32 -> vector<64x256xf32>
    %c1 = arith.constant 1 : index
    %c0_19 = arith.constant 0 : index
    %c0_20 = arith.constant 0 : index
    %23 = vector.load %arg3[%c1, %c0_19, %c0_20] : memref<9x1x256xf32, #tpu.memory_space<vmem>>, vector<1x1x256xf32>
    %24 = vector.shape_cast %23 : vector<1x1x256xf32> to vector<1x256xf32>
    %25 = vector.broadcast %24 : vector<1x256xf32> to vector<64x256xf32>
    %26 = arith.mulf %22, %25 : vector<64x256xf32>
    %c1_21 = arith.constant 1 : index
    %c0_22 = arith.constant 0 : index
    %c0_23 = arith.constant 0 : index
    %27 = vector.load %arg5[%c1_21, %c0_22, %c0_23] : memref<9x64x64xf32, #tpu.memory_space<vmem>>, vector<1x64x64xf32>
    %28 = vector.shape_cast %27 : vector<1x64x64xf32> to vector<64x64xf32>
    %cst_24 = arith.constant dense<0.000000e+00> : vector<64x256xf32>
    %29 = tpu.matmul %28, %26, %cst_24 {dimension_numbers = #tpu.dot_dimension_numbers<[1], [0], [0], [1], [0, 0, 1, 1], [], []>} : vector<64x64xf32>, vector<64x256xf32>, vector<64x256xf32> -> vector<64x256xf32>
    %30 = arith.addf %21, %29 : vector<64x256xf32>
    %c15_i32 = arith.constant 15 : i32
    %31 = tpu.dynamic_rotate %9 by %c15_i32 dim 1 : vector<64x256xf32>, i32 -> vector<64x256xf32>
    %c2 = arith.constant 2 : index
    %c0_25 = arith.constant 0 : index
    %c0_26 = arith.constant 0 : index
    %32 = vector.load %arg3[%c2, %c0_25, %c0_26] : memref<9x1x256xf32, #tpu.memory_space<vmem>>, vector<1x1x256xf32>
    %33 = vector.shape_cast %32 : vector<1x1x256xf32> to vector<1x256xf32>
    %34 = vector.broadcast %33 : vector<1x256xf32> to vector<64x256xf32>
    %35 = arith.mulf %31, %34 : vector<64x256xf32>
    %c2_27 = arith.constant 2 : index
    %c0_28 = arith.constant 0 : index
    %c0_29 = arith.constant 0 : index
    %36 = vector.load %arg5[%c2_27, %c0_28, %c0_29] : memref<9x64x64xf32, #tpu.memory_space<vmem>>, vector<1x64x64xf32>
    %37 = vector.shape_cast %36 : vector<1x64x64xf32> to vector<64x64xf32>
    %cst_30 = arith.constant dense<0.000000e+00> : vector<64x256xf32>
    %38 = tpu.matmul %37, %35, %cst_30 {dimension_numbers = #tpu.dot_dimension_numbers<[1], [0], [0], [1], [0, 0, 1, 1], [], []>} : vector<64x64xf32>, vector<64x256xf32>, vector<64x256xf32> -> vector<64x256xf32>
    %39 = arith.addf %30, %38 : vector<64x256xf32>
    %c1_i32 = arith.constant 1 : i32
    %40 = tpu.dynamic_rotate %9 by %c1_i32 dim 1 : vector<64x256xf32>, i32 -> vector<64x256xf32>
    %c3 = arith.constant 3 : index
    %c0_31 = arith.constant 0 : index
    %c0_32 = arith.constant 0 : index
    %41 = vector.load %arg3[%c3, %c0_31, %c0_32] : memref<9x1x256xf32, #tpu.memory_space<vmem>>, vector<1x1x256xf32>
    %42 = vector.shape_cast %41 : vector<1x1x256xf32> to vector<1x256xf32>
    %43 = vector.broadcast %42 : vector<1x256xf32> to vector<64x256xf32>
    %44 = arith.mulf %40, %43 : vector<64x256xf32>
    %c3_33 = arith.constant 3 : index
    %c0_34 = arith.constant 0 : index
    %c0_35 = arith.constant 0 : index
    %45 = vector.load %arg5[%c3_33, %c0_34, %c0_35] : memref<9x64x64xf32, #tpu.memory_space<vmem>>, vector<1x64x64xf32>
    %46 = vector.shape_cast %45 : vector<1x64x64xf32> to vector<64x64xf32>
    %cst_36 = arith.constant dense<0.000000e+00> : vector<64x256xf32>
    %47 = tpu.matmul %46, %44, %cst_36 {dimension_numbers = #tpu.dot_dimension_numbers<[1], [0], [0], [1], [0, 0, 1, 1], [], []>} : vector<64x64xf32>, vector<64x256xf32>, vector<64x256xf32> -> vector<64x256xf32>
    %48 = arith.addf %39, %47 : vector<64x256xf32>
    %c255_i32 = arith.constant 255 : i32
    %49 = tpu.dynamic_rotate %9 by %c255_i32 dim 1 : vector<64x256xf32>, i32 -> vector<64x256xf32>
    %c5 = arith.constant 5 : index
    %c0_37 = arith.constant 0 : index
    %c0_38 = arith.constant 0 : index
    %50 = vector.load %arg3[%c5, %c0_37, %c0_38] : memref<9x1x256xf32, #tpu.memory_space<vmem>>, vector<1x1x256xf32>
    %51 = vector.shape_cast %50 : vector<1x1x256xf32> to vector<1x256xf32>
    %52 = vector.broadcast %51 : vector<1x256xf32> to vector<64x256xf32>
    %53 = arith.mulf %49, %52 : vector<64x256xf32>
    %c5_39 = arith.constant 5 : index
    %c0_40 = arith.constant 0 : index
    %c0_41 = arith.constant 0 : index
    %54 = vector.load %arg5[%c5_39, %c0_40, %c0_41] : memref<9x64x64xf32, #tpu.memory_space<vmem>>, vector<1x64x64xf32>
    %55 = vector.shape_cast %54 : vector<1x64x64xf32> to vector<64x64xf32>
    %cst_42 = arith.constant dense<0.000000e+00> : vector<64x256xf32>
    %56 = tpu.matmul %55, %53, %cst_42 {dimension_numbers = #tpu.dot_dimension_numbers<[1], [0], [0], [1], [0, 0, 1, 1], [], []>} : vector<64x64xf32>, vector<64x256xf32>, vector<64x256xf32> -> vector<64x256xf32>
    %57 = arith.addf %48, %56 : vector<64x256xf32>
    %c241_i32 = arith.constant 241 : i32
    %58 = tpu.dynamic_rotate %9 by %c241_i32 dim 1 : vector<64x256xf32>, i32 -> vector<64x256xf32>
    %c6 = arith.constant 6 : index
    %c0_43 = arith.constant 0 : index
    %c0_44 = arith.constant 0 : index
    %59 = vector.load %arg3[%c6, %c0_43, %c0_44] : memref<9x1x256xf32, #tpu.memory_space<vmem>>, vector<1x1x256xf32>
    %60 = vector.shape_cast %59 : vector<1x1x256xf32> to vector<1x256xf32>
    %61 = vector.broadcast %60 : vector<1x256xf32> to vector<64x256xf32>
    %62 = arith.mulf %58, %61 : vector<64x256xf32>
    %c6_45 = arith.constant 6 : index
    %c0_46 = arith.constant 0 : index
    %c0_47 = arith.constant 0 : index
    %63 = vector.load %arg5[%c6_45, %c0_46, %c0_47] : memref<9x64x64xf32, #tpu.memory_space<vmem>>, vector<1x64x64xf32>
    %64 = vector.shape_cast %63 : vector<1x64x64xf32> to vector<64x64xf32>
    %cst_48 = arith.constant dense<0.000000e+00> : vector<64x256xf32>
    %65 = tpu.matmul %64, %62, %cst_48 {dimension_numbers = #tpu.dot_dimension_numbers<[1], [0], [0], [1], [0, 0, 1, 1], [], []>} : vector<64x64xf32>, vector<64x256xf32>, vector<64x256xf32> -> vector<64x256xf32>
    %66 = arith.addf %57, %65 : vector<64x256xf32>
    %c240_i32 = arith.constant 240 : i32
    %67 = tpu.dynamic_rotate %9 by %c240_i32 dim 1 : vector<64x256xf32>, i32 -> vector<64x256xf32>
    %c7 = arith.constant 7 : index
    %c0_49 = arith.constant 0 : index
    %c0_50 = arith.constant 0 : index
    %68 = vector.load %arg3[%c7, %c0_49, %c0_50] : memref<9x1x256xf32, #tpu.memory_space<vmem>>, vector<1x1x256xf32>
    %69 = vector.shape_cast %68 : vector<1x1x256xf32> to vector<1x256xf32>
    %70 = vector.broadcast %69 : vector<1x256xf32> to vector<64x256xf32>
    %71 = arith.mulf %67, %70 : vector<64x256xf32>
    %c7_51 = arith.constant 7 : index
    %c0_52 = arith.constant 0 : index
    %c0_53 = arith.constant 0 : index
    %72 = vector.load %arg5[%c7_51, %c0_52, %c0_53] : memref<9x64x64xf32, #tpu.memory_space<vmem>>, vector<1x64x64xf32>
    %73 = vector.shape_cast %72 : vector<1x64x64xf32> to vector<64x64xf32>
    %cst_54 = arith.constant dense<0.000000e+00> : vector<64x256xf32>
    %74 = tpu.matmul %73, %71, %cst_54 {dimension_numbers = #tpu.dot_dimension_numbers<[1], [0], [0], [1], [0, 0, 1, 1], [], []>} : vector<64x64xf32>, vector<64x256xf32>, vector<64x256xf32> -> vector<64x256xf32>
    %75 = arith.addf %66, %74 : vector<64x256xf32>
    %c239_i32 = arith.constant 239 : i32
    %76 = tpu.dynamic_rotate %9 by %c239_i32 dim 1 : vector<64x256xf32>, i32 -> vector<64x256xf32>
    %c8 = arith.constant 8 : index
    %c0_55 = arith.constant 0 : index
    %c0_56 = arith.constant 0 : index
    %77 = vector.load %arg3[%c8, %c0_55, %c0_56] : memref<9x1x256xf32, #tpu.memory_space<vmem>>, vector<1x1x256xf32>
    %78 = vector.shape_cast %77 : vector<1x1x256xf32> to vector<1x256xf32>
    %79 = vector.broadcast %78 : vector<1x256xf32> to vector<64x256xf32>
    %80 = arith.mulf %76, %79 : vector<64x256xf32>
    %c8_57 = arith.constant 8 : index
    %c0_58 = arith.constant 0 : index
    %c0_59 = arith.constant 0 : index
    %81 = vector.load %arg5[%c8_57, %c0_58, %c0_59] : memref<9x64x64xf32, #tpu.memory_space<vmem>>, vector<1x64x64xf32>
    %82 = vector.shape_cast %81 : vector<1x64x64xf32> to vector<64x64xf32>
    %cst_60 = arith.constant dense<0.000000e+00> : vector<64x256xf32>
    %83 = tpu.matmul %82, %80, %cst_60 {dimension_numbers = #tpu.dot_dimension_numbers<[1], [0], [0], [1], [0, 0, 1, 1], [], []>} : vector<64x64xf32>, vector<64x256xf32>, vector<64x256xf32> -> vector<64x256xf32>
    %84 = arith.addf %75, %83 : vector<64x256xf32>
    %cst_61 = arith.constant 0.000000e+00 : f32
    %cst_62 = arith.constant 6.000000e+00 : f32
    %85 = vector.broadcast %cst_61 : f32 to vector<64x256xf32>
    %86 = arith.maximumf %85, %84 : vector<64x256xf32>
    %87 = vector.broadcast %cst_62 : f32 to vector<64x256xf32>
    %88 = arith.minimumf %87, %86 : vector<64x256xf32>
    %c0_63 = arith.constant 0 : index
    %c0_64 = arith.constant 0 : index
    %89 = vector.load %arg6[%c0_63, %c0_64] : memref<32x64xf32, #tpu.memory_space<vmem>>, vector<32x64xf32>
    %cst_65 = arith.constant dense<0.000000e+00> : vector<32x256xf32>
    %90 = tpu.matmul %89, %88, %cst_65 {dimension_numbers = #tpu.dot_dimension_numbers<[1], [0], [0], [1], [0, 0, 1, 1], [], []>} : vector<32x64xf32>, vector<64x256xf32>, vector<32x256xf32> -> vector<32x256xf32>
    %c0_66 = arith.constant 0 : index
    %c0_67 = arith.constant 0 : index
    %91 = vector.load %arg7[%c0_66, %c0_67] : memref<32x1xf32, #tpu.memory_space<vmem>>, vector<32x1xf32>
    %92 = vector.broadcast %91 : vector<32x1xf32> to vector<32x256xf32>
    %93 = arith.addf %90, %92 : vector<32x256xf32>
    %94 = arith.addf %1, %93 : vector<32x256xf32>
    %c0_68 = arith.constant 0 : index
    %c0_69 = arith.constant 0 : index
    %c0_70 = arith.constant 0 : index
    %95 = vector.load %arg13[%c0_68, %c0_69, %c0_70] : memref<1x32x256xf32, #tpu.memory_space<vmem>>, vector<1x32x256xf32>
    %96 = vector.shape_cast %95 : vector<1x32x256xf32> to vector<32x256xf32>
    %97 = vector.shape_cast %94 : vector<32x256xf32> to vector<1x32x256xf32>
    tpu.vector_store %arg13[%c0_68, %c0_69, %c0_70], %97 {strides = array<i32>} : memref<1x32x256xf32, #tpu.memory_space<vmem>>, vector<1x32x256xf32>,
    %c0_71 = arith.constant 0 : index
    %c0_72 = arith.constant 0 : index
    %c0_73 = arith.constant 0 : index
    %98 = vector.load %arg1[%c0_71, %c0_72, %c0_73] : memref<1x32x256xf32, #tpu.memory_space<vmem>>, vector<1x32x256xf32>
    %99 = vector.shape_cast %98 : vector<1x32x256xf32> to vector<32x256xf32>
    %c0_74 = arith.constant 0 : index
    %c0_75 = arith.constant 0 : index
    %100 = vector.load %arg8[%c0_74, %c0_75] : memref<64x32xf32, #tpu.memory_space<vmem>>, vector<64x32xf32>
    %cst_76 = arith.constant dense<0.000000e+00> : vector<64x256xf32>
    %101 = tpu.matmul %100, %94, %cst_76 {dimension_numbers = #tpu.dot_dimension_numbers<[1], [0], [0], [1], [0, 0, 1, 1], [], []>} : vector<64x32xf32>, vector<32x256xf32>, vector<64x256xf32> -> vector<64x256xf32>
    %cst_77 = arith.constant 0.000000e+00 : f32
    %cst_78 = arith.constant 6.000000e+00 : f32
    %102 = vector.broadcast %cst_77 : f32 to vector<64x256xf32>
    %103 = arith.maximumf %102, %101 : vector<64x256xf32>
    %104 = vector.broadcast %cst_78 : f32 to vector<64x256xf32>
    %105 = arith.minimumf %104, %103 : vector<64x256xf32>
    %c4_79 = arith.constant 4 : index
    %c0_80 = arith.constant 0 : index
    %c0_81 = arith.constant 0 : index
    %106 = vector.load %arg9[%c4_79, %c0_80, %c0_81] : memref<9x64x64xf32, #tpu.memory_space<vmem>>, vector<1x64x64xf32>
    %107 = vector.shape_cast %106 : vector<1x64x64xf32> to vector<64x64xf32>
    %cst_82 = arith.constant dense<0.000000e+00> : vector<64x256xf32>
    %108 = tpu.matmul %107, %105, %cst_82 {dimension_numbers = #tpu.dot_dimension_numbers<[1], [0], [0], [1], [0, 0, 1, 1], [], []>} : vector<64x64xf32>, vector<64x256xf32>, vector<64x256xf32> -> vector<64x256xf32>
    %c17_i32_83 = arith.constant 17 : i32
    %109 = tpu.dynamic_rotate %105 by %c17_i32_83 dim 1 : vector<64x256xf32>, i32 -> vector<64x256xf32>
    %c0_84 = arith.constant 0 : index
    %c0_85 = arith.constant 0 : index
    %c0_86 = arith.constant 0 : index
    %110 = vector.load %arg3[%c0_84, %c0_85, %c0_86] : memref<9x1x256xf32, #tpu.memory_space<vmem>>, vector<1x1x256xf32>
    %111 = vector.shape_cast %110 : vector<1x1x256xf32> to vector<1x256xf32>
    %112 = vector.broadcast %111 : vector<1x256xf32> to vector<64x256xf32>
    %113 = arith.mulf %109, %112 : vector<64x256xf32>
    %c0_87 = arith.constant 0 : index
    %c0_88 = arith.constant 0 : index
    %c0_89 = arith.constant 0 : index
    %114 = vector.load %arg9[%c0_87, %c0_88, %c0_89] : memref<9x64x64xf32, #tpu.memory_space<vmem>>, vector<1x64x64xf32>
    %115 = vector.shape_cast %114 : vector<1x64x64xf32> to vector<64x64xf32>
    %cst_90 = arith.constant dense<0.000000e+00> : vector<64x256xf32>
    %116 = tpu.matmul %115, %113, %cst_90 {dimension_numbers = #tpu.dot_dimension_numbers<[1], [0], [0], [1], [0, 0, 1, 1], [], []>} : vector<64x64xf32>, vector<64x256xf32>, vector<64x256xf32> -> vector<64x256xf32>
    %117 = arith.addf %108, %116 : vector<64x256xf32>
    %c16_i32_91 = arith.constant 16 : i32
    %118 = tpu.dynamic_rotate %105 by %c16_i32_91 dim 1 : vector<64x256xf32>, i32 -> vector<64x256xf32>
    %c1_92 = arith.constant 1 : index
    %c0_93 = arith.constant 0 : index
    %c0_94 = arith.constant 0 : index
    %119 = vector.load %arg3[%c1_92, %c0_93, %c0_94] : memref<9x1x256xf32, #tpu.memory_space<vmem>>, vector<1x1x256xf32>
    %120 = vector.shape_cast %119 : vector<1x1x256xf32> to vector<1x256xf32>
    %121 = vector.broadcast %120 : vector<1x256xf32> to vector<64x256xf32>
    %122 = arith.mulf %118, %121 : vector<64x256xf32>
    %c1_95 = arith.constant 1 : index
    %c0_96 = arith.constant 0 : index
    %c0_97 = arith.constant 0 : index
    %123 = vector.load %arg9[%c1_95, %c0_96, %c0_97] : memref<9x64x64xf32, #tpu.memory_space<vmem>>, vector<1x64x64xf32>
    %124 = vector.shape_cast %123 : vector<1x64x64xf32> to vector<64x64xf32>
    %cst_98 = arith.constant dense<0.000000e+00> : vector<64x256xf32>
    %125 = tpu.matmul %124, %122, %cst_98 {dimension_numbers = #tpu.dot_dimension_numbers<[1], [0], [0], [1], [0, 0, 1, 1], [], []>} : vector<64x64xf32>, vector<64x256xf32>, vector<64x256xf32> -> vector<64x256xf32>
    %126 = arith.addf %117, %125 : vector<64x256xf32>
    %c15_i32_99 = arith.constant 15 : i32
    %127 = tpu.dynamic_rotate %105 by %c15_i32_99 dim 1 : vector<64x256xf32>, i32 -> vector<64x256xf32>
    %c2_100 = arith.constant 2 : index
    %c0_101 = arith.constant 0 : index
    %c0_102 = arith.constant 0 : index
    %128 = vector.load %arg3[%c2_100, %c0_101, %c0_102] : memref<9x1x256xf32, #tpu.memory_space<vmem>>, vector<1x1x256xf32>
    %129 = vector.shape_cast %128 : vector<1x1x256xf32> to vector<1x256xf32>
    %130 = vector.broadcast %129 : vector<1x256xf32> to vector<64x256xf32>
    %131 = arith.mulf %127, %130 : vector<64x256xf32>
    %c2_103 = arith.constant 2 : index
    %c0_104 = arith.constant 0 : index
    %c0_105 = arith.constant 0 : index
    %132 = vector.load %arg9[%c2_103, %c0_104, %c0_105] : memref<9x64x64xf32, #tpu.memory_space<vmem>>, vector<1x64x64xf32>
    %133 = vector.shape_cast %132 : vector<1x64x64xf32> to vector<64x64xf32>
    %cst_106 = arith.constant dense<0.000000e+00> : vector<64x256xf32>
    %134 = tpu.matmul %133, %131, %cst_106 {dimension_numbers = #tpu.dot_dimension_numbers<[1], [0], [0], [1], [0, 0, 1, 1], [], []>} : vector<64x64xf32>, vector<64x256xf32>, vector<64x256xf32> -> vector<64x256xf32>
    %135 = arith.addf %126, %134 : vector<64x256xf32>
    %c1_i32_107 = arith.constant 1 : i32
    %136 = tpu.dynamic_rotate %105 by %c1_i32_107 dim 1 : vector<64x256xf32>, i32 -> vector<64x256xf32>
    %c3_108 = arith.constant 3 : index
    %c0_109 = arith.constant 0 : index
    %c0_110 = arith.constant 0 : index
    %137 = vector.load %arg3[%c3_108, %c0_109, %c0_110] : memref<9x1x256xf32, #tpu.memory_space<vmem>>, vector<1x1x256xf32>
    %138 = vector.shape_cast %137 : vector<1x1x256xf32> to vector<1x256xf32>
    %139 = vector.broadcast %138 : vector<1x256xf32> to vector<64x256xf32>
    %140 = arith.mulf %136, %139 : vector<64x256xf32>
    %c3_111 = arith.constant 3 : index
    %c0_112 = arith.constant 0 : index
    %c0_113 = arith.constant 0 : index
    %141 = vector.load %arg9[%c3_111, %c0_112, %c0_113] : memref<9x64x64xf32, #tpu.memory_space<vmem>>, vector<1x64x64xf32>
    %142 = vector.shape_cast %141 : vector<1x64x64xf32> to vector<64x64xf32>
    %cst_114 = arith.constant dense<0.000000e+00> : vector<64x256xf32>
    %143 = tpu.matmul %142, %140, %cst_114 {dimension_numbers = #tpu.dot_dimension_numbers<[1], [0], [0], [1], [0, 0, 1, 1], [], []>} : vector<64x64xf32>, vector<64x256xf32>, vector<64x256xf32> -> vector<64x256xf32>
    %144 = arith.addf %135, %143 : vector<64x256xf32>
    %c255_i32_115 = arith.constant 255 : i32
    %145 = tpu.dynamic_rotate %105 by %c255_i32_115 dim 1 : vector<64x256xf32>, i32 -> vector<64x256xf32>
    %c5_116 = arith.constant 5 : index
    %c0_117 = arith.constant 0 : index
    %c0_118 = arith.constant 0 : index
    %146 = vector.load %arg3[%c5_116, %c0_117, %c0_118] : memref<9x1x256xf32, #tpu.memory_space<vmem>>, vector<1x1x256xf32>
    %147 = vector.shape_cast %146 : vector<1x1x256xf32> to vector<1x256xf32>
    %148 = vector.broadcast %147 : vector<1x256xf32> to vector<64x256xf32>
    %149 = arith.mulf %145, %148 : vector<64x256xf32>
    %c5_119 = arith.constant 5 : index
    %c0_120 = arith.constant 0 : index
    %c0_121 = arith.constant 0 : index
    %150 = vector.load %arg9[%c5_119, %c0_120, %c0_121] : memref<9x64x64xf32, #tpu.memory_space<vmem>>, vector<1x64x64xf32>
    %151 = vector.shape_cast %150 : vector<1x64x64xf32> to vector<64x64xf32>
    %cst_122 = arith.constant dense<0.000000e+00> : vector<64x256xf32>
    %152 = tpu.matmul %151, %149, %cst_122 {dimension_numbers = #tpu.dot_dimension_numbers<[1], [0], [0], [1], [0, 0, 1, 1], [], []>} : vector<64x64xf32>, vector<64x256xf32>, vector<64x256xf32> -> vector<64x256xf32>
    %153 = arith.addf %144, %152 : vector<64x256xf32>
    %c241_i32_123 = arith.constant 241 : i32
    %154 = tpu.dynamic_rotate %105 by %c241_i32_123 dim 1 : vector<64x256xf32>, i32 -> vector<64x256xf32>
    %c6_124 = arith.constant 6 : index
    %c0_125 = arith.constant 0 : index
    %c0_126 = arith.constant 0 : index
    %155 = vector.load %arg3[%c6_124, %c0_125, %c0_126] : memref<9x1x256xf32, #tpu.memory_space<vmem>>, vector<1x1x256xf32>
    %156 = vector.shape_cast %155 : vector<1x1x256xf32> to vector<1x256xf32>
    %157 = vector.broadcast %156 : vector<1x256xf32> to vector<64x256xf32>
    %158 = arith.mulf %154, %157 : vector<64x256xf32>
    %c6_127 = arith.constant 6 : index
    %c0_128 = arith.constant 0 : index
    %c0_129 = arith.constant 0 : index
    %159 = vector.load %arg9[%c6_127, %c0_128, %c0_129] : memref<9x64x64xf32, #tpu.memory_space<vmem>>, vector<1x64x64xf32>
    %160 = vector.shape_cast %159 : vector<1x64x64xf32> to vector<64x64xf32>
    %cst_130 = arith.constant dense<0.000000e+00> : vector<64x256xf32>
    %161 = tpu.matmul %160, %158, %cst_130 {dimension_numbers = #tpu.dot_dimension_numbers<[1], [0], [0], [1], [0, 0, 1, 1], [], []>} : vector<64x64xf32>, vector<64x256xf32>, vector<64x256xf32> -> vector<64x256xf32>
    %162 = arith.addf %153, %161 : vector<64x256xf32>
    %c240_i32_131 = arith.constant 240 : i32
    %163 = tpu.dynamic_rotate %105 by %c240_i32_131 dim 1 : vector<64x256xf32>, i32 -> vector<64x256xf32>
    %c7_132 = arith.constant 7 : index
    %c0_133 = arith.constant 0 : index
    %c0_134 = arith.constant 0 : index
    %164 = vector.load %arg3[%c7_132, %c0_133, %c0_134] : memref<9x1x256xf32, #tpu.memory_space<vmem>>, vector<1x1x256xf32>
    %165 = vector.shape_cast %164 : vector<1x1x256xf32> to vector<1x256xf32>
    %166 = vector.broadcast %165 : vector<1x256xf32> to vector<64x256xf32>
    %167 = arith.mulf %163, %166 : vector<64x256xf32>
    %c7_135 = arith.constant 7 : index
    %c0_136 = arith.constant 0 : index
    %c0_137 = arith.constant 0 : index
    %168 = vector.load %arg9[%c7_135, %c0_136, %c0_137] : memref<9x64x64xf32, #tpu.memory_space<vmem>>, vector<1x64x64xf32>
    %169 = vector.shape_cast %168 : vector<1x64x64xf32> to vector<64x64xf32>
    %cst_138 = arith.constant dense<0.000000e+00> : vector<64x256xf32>
    %170 = tpu.matmul %169, %167, %cst_138 {dimension_numbers = #tpu.dot_dimension_numbers<[1], [0], [0], [1], [0, 0, 1, 1], [], []>} : vector<64x64xf32>, vector<64x256xf32>, vector<64x256xf32> -> vector<64x256xf32>
    %171 = arith.addf %162, %170 : vector<64x256xf32>
    %c239_i32_139 = arith.constant 239 : i32
    %172 = tpu.dynamic_rotate %105 by %c239_i32_139 dim 1 : vector<64x256xf32>, i32 -> vector<64x256xf32>
    %c8_140 = arith.constant 8 : index
    %c0_141 = arith.constant 0 : index
    %c0_142 = arith.constant 0 : index
    %173 = vector.load %arg3[%c8_140, %c0_141, %c0_142] : memref<9x1x256xf32, #tpu.memory_space<vmem>>, vector<1x1x256xf32>
    %174 = vector.shape_cast %173 : vector<1x1x256xf32> to vector<1x256xf32>
    %175 = vector.broadcast %174 : vector<1x256xf32> to vector<64x256xf32>
    %176 = arith.mulf %172, %175 : vector<64x256xf32>
    %c8_143 = arith.constant 8 : index
    %c0_144 = arith.constant 0 : index
    %c0_145 = arith.constant 0 : index
    %177 = vector.load %arg9[%c8_143, %c0_144, %c0_145] : memref<9x64x64xf32, #tpu.memory_space<vmem>>, vector<1x64x64xf32>
    %178 = vector.shape_cast %177 : vector<1x64x64xf32> to vector<64x64xf32>
    %cst_146 = arith.constant dense<0.000000e+00> : vector<64x256xf32>
    %179 = tpu.matmul %178, %176, %cst_146 {dimension_numbers = #tpu.dot_dimension_numbers<[1], [0], [0], [1], [0, 0, 1, 1], [], []>} : vector<64x64xf32>, vector<64x256xf32>, vector<64x256xf32> -> vector<64x256xf32>
    %180 = arith.addf %171, %179 : vector<64x256xf32>
    %cst_147 = arith.constant 0.000000e+00 : f32
    %cst_148 = arith.constant 6.000000e+00 : f32
    %181 = vector.broadcast %cst_147 : f32 to vector<64x256xf32>
    %182 = arith.maximumf %181, %180 : vector<64x256xf32>
    %183 = vector.broadcast %cst_148 : f32 to vector<64x256xf32>
    %184 = arith.minimumf %183, %182 : vector<64x256xf32>
    %c0_149 = arith.constant 0 : index
    %c0_150 = arith.constant 0 : index
    %185 = vector.load %arg10[%c0_149, %c0_150] : memref<32x64xf32, #tpu.memory_space<vmem>>, vector<32x64xf32>
    %cst_151 = arith.constant dense<0.000000e+00> : vector<32x256xf32>
    %186 = tpu.matmul %185, %184, %cst_151 {dimension_numbers = #tpu.dot_dimension_numbers<[1], [0], [0], [1], [0, 0, 1, 1], [], []>} : vector<32x64xf32>, vector<64x256xf32>, vector<32x256xf32> -> vector<32x256xf32>
    %c0_152 = arith.constant 0 : index
    %c0_153 = arith.constant 0 : index
    %187 = vector.load %arg11[%c0_152, %c0_153] : memref<32x1xf32, #tpu.memory_space<vmem>>, vector<32x1xf32>
    %188 = vector.broadcast %187 : vector<32x1xf32> to vector<32x256xf32>
    %189 = arith.addf %186, %188 : vector<32x256xf32>
    %190 = arith.addf %99, %189 : vector<32x256xf32>
    %c0_154 = arith.constant 0 : index
    %c0_155 = arith.constant 0 : index
    %c0_156 = arith.constant 0 : index
    %191 = vector.load %arg12[%c0_154, %c0_155, %c0_156] : memref<1x32x256xf32, #tpu.memory_space<vmem>>, vector<1x32x256xf32>
    %192 = vector.shape_cast %191 : vector<1x32x256xf32> to vector<32x256xf32>
    %193 = vector.shape_cast %190 : vector<32x256xf32> to vector<1x32x256xf32>
    tpu.vector_store %arg12[%c0_154, %c0_155, %c0_156], %193 {strides = array<i32>} : memref<1x32x256xf32, #tpu.memory_space<vmem>>, vector<1x32x256xf32>,
    return
  }
  func.func @transform_0(%arg0: i32) -> (i32, i32, i32) {
    %c0_i32 = arith.constant 0 : i32
    %c0_i32_0 = arith.constant 0 : i32
    %c0_i32_1 = arith.constant 0 : i32
    return %arg0, %c0_i32, %c0_i32_0 : i32, i32, i32
  }
  func.func @transform_1(%arg0: i32) -> (i32, i32, i32) {
    %c0_i32 = arith.constant 0 : i32
    %c0_i32_0 = arith.constant 0 : i32
    %c0_i32_1 = arith.constant 0 : i32
    return %arg0, %c0_i32, %c0_i32_0 : i32, i32, i32
  }
  func.func @transform_2(%arg0: i32) -> (i32, i32, i32) {
    %c0_i32 = arith.constant 0 : i32
    %c0_i32_0 = arith.constant 0 : i32
    %c0_i32_1 = arith.constant 0 : i32
    %c0_i32_2 = arith.constant 0 : i32
    return %c0_i32, %c0_i32_0, %c0_i32_1 : i32, i32, i32
  }
  func.func @transform_3(%arg0: i32) -> (i32, i32) {
    %c0_i32 = arith.constant 0 : i32
    %c0_i32_0 = arith.constant 0 : i32
    %c0_i32_1 = arith.constant 0 : i32
    return %c0_i32, %c0_i32_0 : i32, i32
  }
  func.func @transform_4(%arg0: i32) -> (i32, i32, i32) {
    %c0_i32 = arith.constant 0 : i32
    %c0_i32_0 = arith.constant 0 : i32
    %c0_i32_1 = arith.constant 0 : i32
    %c0_i32_2 = arith.constant 0 : i32
    return %c0_i32, %c0_i32_0, %c0_i32_1 : i32, i32, i32
  }
  func.func @transform_5(%arg0: i32) -> (i32, i32) {
    %c0_i32 = arith.constant 0 : i32
    %c0_i32_0 = arith.constant 0 : i32
    %c0_i32_1 = arith.constant 0 : i32
    return %c0_i32, %c0_i32_0 : i32, i32
  }
  func.func @transform_6(%arg0: i32) -> (i32, i32) {
    %c0_i32 = arith.constant 0 : i32
    %c0_i32_0 = arith.constant 0 : i32
    %c0_i32_1 = arith.constant 0 : i32
    return %c0_i32, %c0_i32_0 : i32, i32
  }
  func.func @transform_7(%arg0: i32) -> (i32, i32) {
    %c0_i32 = arith.constant 0 : i32
    %c0_i32_0 = arith.constant 0 : i32
    %c0_i32_1 = arith.constant 0 : i32
    return %c0_i32, %c0_i32_0 : i32, i32
  }
  func.func @transform_8(%arg0: i32) -> (i32, i32, i32) {
    %c0_i32 = arith.constant 0 : i32
    %c0_i32_0 = arith.constant 0 : i32
    %c0_i32_1 = arith.constant 0 : i32
    %c0_i32_2 = arith.constant 0 : i32
    return %c0_i32, %c0_i32_0, %c0_i32_1 : i32, i32, i32
  }
  func.func @transform_9(%arg0: i32) -> (i32, i32) {
    %c0_i32 = arith.constant 0 : i32
    %c0_i32_0 = arith.constant 0 : i32
    %c0_i32_1 = arith.constant 0 : i32
    return %c0_i32, %c0_i32_0 : i32, i32
  }
  func.func @transform_10(%arg0: i32) -> (i32, i32) {
    %c0_i32 = arith.constant 0 : i32
    %c0_i32_0 = arith.constant 0 : i32
    %c0_i32_1 = arith.constant 0 : i32
    return %c0_i32, %c0_i32_0 : i32, i32
  }
  func.func @transform_11(%arg0: i32) -> (i32, i32, i32) {
    %c0_i32 = arith.constant 0 : i32
    %c0_i32_0 = arith.constant 0 : i32
    %c0_i32_1 = arith.constant 0 : i32
    return %arg0, %c0_i32, %c0_i32_0 : i32, i32, i32
  }
  func.func @transform_12(%arg0: i32) -> (i32, i32, i32) {
    %c0_i32 = arith.constant 0 : i32
    %c0_i32_0 = arith.constant 0 : i32
    %c0_i32_1 = arith.constant 0 : i32
    return %arg0, %c0_i32, %c0_i32_0 : i32, i32, i32
  }
}

</mosaic_0001>

<bundles_post_ra>
// kernel: feature_forward.1
= control target key start
LH: loop header
LB: loop body
LE: loop exit
PB: predicated region body
PF: predicated region fallthrough
CT: control target
= control target key end

     0   :  { %s9739_s0 = inlined_call_operand.vmem [shape: f32[2,32,256], index: 0, kind: input, shape index: {}]   ;;  %s9740_s1 = inlined_call_operand.vmem [shape: f32[2,32,256], index: 1, kind: input, shape index: {}]   ;;  %s9741_s2 = inlined_call_operand.hbm [shape: f32[9,1,256], index: 2, kind: input, shape index: {}]   ;;  %s9742_s3 = inlined_call_operand.vmem [shape: f32[64,32], index: 3, kind: input, shape index: {}]   ;;  %s9743_s4 = inlined_call_operand.vmem [shape: f32[9,64,64], index: 4, kind: input, shape index: {}]   ;;  %s9744_s5 = inlined_call_operand.hbm [shape: f32[32,64], index: 5, kind: input, shape index: {}]   ;;  %s9745_s6 = inlined_call_operand.hbm [shape: f32[32,1], index: 6, kind: input, shape index: {}]   ;;  %s9746_s7 = inlined_call_operand.vmem [shape: f32[64,32], index: 7, kind: input, shape index: {}]   ;;  %s9747_s8 = inlined_call_operand.vmem [shape: f32[9,64,64], index: 8, kind: input, shape index: {}]   ;;  %s9748_s9 = inlined_call_operand.vmem [shape: f32[32,64], index: 9, kind: input, shape index: {}]   ;;  %s9749_s10 = inlined_call_operand.hbm [shape: f32[32,1], index: 10, kind: input, shape index: {}]   ;;  %s9750_s11 = inlined_call_operand.vmem [shape: f32[2,32,256], index: 11, kind: output, shape index: {0}]   ;;  %s9751_s12 = inlined_call_operand.vmem [shape: f32[2,32,256], index: 12, kind: output, shape index: {1}]  }
   0x1   :  { %9759 = sst [smem:[#allocation13_spill]] %s9744_s5 }
   0x2   :  { %18 = vsyncpa [#allocation3], 0 }
   0x3   :  { %19 = vsyncpa [#allocation5], 0 }
   0x4   :  { %20 = vsyncpa [#allocation8], 0  ;;  %s6667_s21 = smov 0  }
   0x5 LB: > { %9760 = sst [smem:[#allocation12_spill]] %s6582_s21  ;;  %s6584_s22 = smov [#allocation4]   ;;  %s6582_s21 = sphi %s6667_s21, %s26_s21  }
   0x6   : > { %s355_s23 = sshll.u32 %s6584_s22, 4  ;;  %s6673_s24 = sadd.s32 4294967295, %s6582_s21   ;;  %s6678_s23 = int_to_ptr.vmem [resolvable:$true] %s355_s23 }
   0x7   : > { %p5466_p0 = scmp.ge.s32.totalorder %s6582_s21, 1  ;;  %p324_p1 = scmp.lt.s32.totalorder %s6582_s21, 3 }
   0x8   : > { %p9757_p2 = scmp.eq.s32.totalorder %s6673_s24, 0  ;;  %s6585_s26 = smov [#allocation2]  }
   0x9   : > { %p6680_p3 = pnand %p5466_p0, %p324_p1  ;;  %s336_s27 = sshll.u32 %s6585_s26, 4  ;;  %s6686_s27 = int_to_ptr.vmem [resolvable:$true] %s336_s27 }
   0xa   : > { %s6586_s29 = smov [#allocation6]   ;;  %s9763_s5 = sld [smem:[#allocation13_spill]] }
   0xb   : > { %s9761_s25 = scalar_select %p6680_p3, 1, 0 }
   0xc   : > { %p6403_p4 = pneg %p6680_p3  ;;  %s6694_s30 = sshll.u32 %s6586_s29, 4  ;;  %s369_s30 = int_to_ptr.vmem [resolvable:$true] %s6694_s30 }
   0xe   : > { %p6690_p5 = pnand %p9757_p2, %p6403_p4 }
  0x10   : > { %s6452_s15 = scalar_lea.hbm %s9763_s5, 512  ;;  %p6704_p7 = pneg %p6690_p5 }
  0x11   : > { %p6453_p6 = scmp.ne.s32.totalorder %s9763_s5, %s6452_s15  ;;  %p6459_p10 = scmp.lt.u32.totalorder %s6452_s15, %s9763_s5 }
  0x13   : > { %p6455_p8 = pnand %p6704_p7, %p6453_p6 }
  0x15   : > { %p6456_p9 = pneg %p6455_p8 }
  0x17   : > { %p6461_p11 = pnand %p6459_p10, %p6456_p9 }
  0x19   : > { %6464 = shalt.err (!%p6461_p11)
}
  0x1a   : > { %s6465_s22 = scalar_lea.vmem %s6678_s23, 512  ;;  %p6473_p1 = scmp.lt.s32.totalorder %s6678_s23, %s6678_s23 }
  0x1b   : > { %p6466_p12 = scmp.ne.s32.totalorder %s6678_s23, %s6465_s22  ;;  %p6474_p4 = scmp.lt.s32.totalorder %s6465_s22, %s6465_s22 }
  0x1d   : > { %p6468_p13 = pnand %p6466_p12, %p6704_p7  ;;  %p6475_p6 = por %p6474_p4, %p6473_p1 }
  0x1f   : > { %p6469_p0 = pneg %p6468_p13 }
  0x21   : > { %p6476_p8 = pnand %p6475_p6, %p6469_p0 }
  0x23   : > { %6479 = shalt.err (!%p6476_p8)
}
  0x24   : > { %s9753_s26 = smov 128   ;;  %s9755_s29 = smov 8  }
  0x25   : > { %6409 = dma.hbm_to_vmem [thread:$0]  (!%p6690_p5), %s9763_s5, 512, %s6678_s23, [#allocation5], %s9753_s26, %s9753_s26, %s9755_s29  }
  0x26   : > { %s6480_s17 = scalar_lea.hbm %s9741_s2, 288 }
  0x27   : > { %p6481_p9 = scmp.ne.s32.totalorder %s9741_s2, %s6480_s17  ;;  %p6487_p12 = scmp.lt.u32.totalorder %s6480_s17, %s9741_s2 }
  0x29   : > { %p6483_p10 = pnand %p6481_p9, %p6704_p7 }
  0x2b   : > { %p6484_p11 = pneg %p6483_p10 }
  0x2d   : > { %p6489_p13 = pnand %p6487_p12, %p6484_p11 }
  0x2f   : > { %6492 = shalt.err (!%p6489_p13)
}
  0x30   : > { %s6493_s23 = scalar_lea.vmem %s6686_s27, 288  ;;  %p6501_p6 = scmp.lt.s32.totalorder %s6686_s27, %s6686_s27 }
  0x31   : > { %p6494_p0 = scmp.ne.s32.totalorder %s6686_s27, %s6493_s23  ;;  %p6502_p8 = scmp.lt.s32.totalorder %s6493_s23, %s6493_s23 }
  0x33   : > { %p6496_p1 = pnand %p6494_p0, %p6704_p7  ;;  %p6503_p9 = por %p6502_p8, %p6501_p6 }
  0x35   : > { %p6497_p4 = pneg %p6496_p1 }
  0x37   : > { %p6504_p10 = pnand %p6503_p9, %p6497_p4 }
  0x39   : > { %6507 = shalt.err (!%p6504_p10)
}
  0x3a   : > { %s6589_s13 = smov 32   ;;  %s6590_s21 = smov 2  }
  0x3b   : > { %6406 = dma.hbm_to_vmem [thread:$0]  (!%p6690_p5), %s9741_s2, 288, %s6686_s27, [#allocation3], %s6589_s13, %s6589_s13, %s6590_s21  }
  0x3c   : > { %s6591_s16 = smov [#allocation7]   ;;  %s6508_s22 = scalar_lea.hbm %s9745_s6, 512 }
  0x3d   : > { %s390_s17 = sshll.u32 %s6591_s16, 4  ;;  %p6509_p11 = scmp.ne.s32.totalorder %s9745_s6, %s6508_s22  ;;  %s391_s17 = int_to_ptr.vmem [resolvable:$true] %s390_s17 }
  0x3e   : > { %p6515_p0 = scmp.lt.u32.totalorder %s6508_s22, %s9745_s6 }
  0x3f   : > { %p6511_p12 = pnand %p6509_p11, %p6704_p7 }
  0x41   : > { %p6512_p13 = pneg %p6511_p12 }
  0x43   : > { %p6517_p1 = pnand %p6515_p0, %p6512_p13 }
  0x45   : > { %6520 = shalt.err (!%p6517_p1)
}
  0x46   : > { %s6521_s27 = scalar_lea.vmem %s369_s30, 512  ;;  %p6529_p9 = scmp.lt.s32.totalorder %s369_s30, %s369_s30 }
  0x47   : > { %p6522_p4 = scmp.ne.s32.totalorder %s369_s30, %s6521_s27  ;;  %p6530_p10 = scmp.lt.s32.totalorder %s6521_s27, %s6521_s27 }
  0x49   : > { %p6524_p6 = pnand %p6522_p4, %p6704_p7  ;;  %p6531_p2 = por %p6530_p10, %p6529_p9 }
  0x4b   : > { %p6525_p8 = pneg %p6524_p6 }
  0x4d   : > { %p6532_p3 = pnand %p6531_p2, %p6525_p8 }
  0x4f   : > { %6535 = shalt.err (!%p6532_p3)
}
  0x50   : > { %s9765_s26 = smov 8   ;;  %s9766_s13 = smov 128  }
  0x51   : > { %6412 = dma.hbm_to_vmem [thread:$0]  (!%p6690_p5), %s9745_s6, 512, %s369_s30, [#allocation5], %s9766_s13, %s9766_s13, %s9765_s26  }
  0x52   : > { %s6536_s15 = scalar_lea.hbm %s9749_s10, 512 }
  0x53   : > { %p6537_p2 = scmp.ne.s32.totalorder %s9749_s10, %s6536_s15  ;;  %p6543_p12 = scmp.lt.u32.totalorder %s6536_s15, %s9749_s10 }
  0x55   : > { %p6539_p3 = pnand %p6537_p2, %p6704_p7 }
  0x57   : > { %p6540_p11 = pneg %p6539_p3 }
  0x59   : > { %p6545_p13 = pnand %p6543_p12, %p6540_p11 }
  0x5b   : > { %6548 = shalt.err (!%p6545_p13)
}
  0x5c   : > { %s6549_s23 = scalar_lea.vmem %s391_s17, 512  ;;  %p6557_p6 = scmp.lt.s32.totalorder %s391_s17, %s391_s17 }
  0x5d   : > { %p6550_p0 = scmp.ne.s32.totalorder %s391_s17, %s6549_s23  ;;  %p6558_p8 = scmp.lt.s32.totalorder %s6549_s23, %s6549_s23 }
  0x5f   : > { %p6552_p1 = pnand %p6550_p0, %p6704_p7  ;;  %p6559_p9 = por %p6558_p8, %p6557_p6 }
  0x61   : > { %p6553_p4 = pneg %p6552_p1 }
  0x63   : > { %p6560_p10 = pnand %p6559_p9, %p6553_p4 }
  0x65   : > { %6563 = shalt.err (!%p6560_p10)
}
  0x66   : > { %6415 = dma.hbm_to_vmem [thread:$0]  (!%p6690_p5), %s9749_s10, 512, %s391_s17, [#allocation8], %s9766_s13, %s9766_s13, %s9765_s26  }
  0x67   : > { %p9767_p2 = scmp.ne.s32.totalorder %s9761_s25, 0 }
  0x68   : > { %p9768_p7 = scmp.eq.s32.totalorder (!%p9767_p2), %s6673_s24, 0 }
  0x69   : > { %422 = sbr.rel (%p9767_p2) target bundleno = 2343 (0x927), region = 64 }
  0x70   : > { %6569 = dma.done.wait (%p9768_p7), [#allocation3], 288   ;;  %p9769_p3 = pmov %p9768_p7 }
  0x72   : > { %6571 = vsyncadd (%p9769_p3), [#allocation3], 4294967008  ;;  %p9770_p11 = pmov %p9769_p3 }
  0x73   : > { %p9771_p12 = pmov %p9769_p3 }
  0x74   : > { %6573 = dma.done.wait (%p9770_p11), [#allocation5], 1024  }
  0x75   : > { %6575 = vsyncadd (%p9771_p12), [#allocation5], 4294966272  ;;  %p9772_p13 = pmov %p9769_p3 }
  0x76   : > { %p9773_p5 = pmov %p9769_p3 }
  0x77   : > { %6577 = dma.done.wait (%p9772_p13), [#allocation8], 512  }
  0x78   : > { %6579 = vsyncadd (%p9773_p5), [#allocation8], 4294966784  ;;  %p486_p0 = scmp.lt.s32.totalorder %s6673_s24, 1  ;;  %v6592_v0 = vmov 0.0   ;;  %v522_v13 = vld [vmem:[%s9742_s3] sm:$0xff]  ;;  %vm530_vm0 = vcmask 261120  }
  0x79   : > { %619 = vmatprep.mubr.f32.mxu0 %v6592_v0  ;;  %885 = vmatprep.mubr.f32.mxu1 %v6592_v0  ;;  %v523_v14 = vld [vmem:[%s9742_s3 + $0x8] sm:$0xff]  ;;  %v524_v15 = vld [vmem:[%s9742_s3 + $0x10] sm:$0xff]  ;;  %v525_v16 = vld [vmem:[%s9742_s3 + $0x18] sm:$0xff]  ;;  %s6593_s18 = smov 17   ;;  %s6595_s26 = smov 15   ;;  %vm796_vm2 = vcmask 523264  }
  0x7a   : > { %s9776_s24 = smov (!%p486_p0, %s6673_s24), 1  ;;  %v526_v17 = vld [vmem:[%s9742_s3 + $0x20] sm:$0xff]  ;;  %v527_v18 = vld [vmem:[%s9742_s3 + $0x28] sm:$0xff]  ;;  %v528_v19 = vld [vmem:[%s9742_s3 + $0x30] sm:$0xff]  ;;  %s6596_s13 = smov 1  }
  0x7b   : > { %s6812_s25 = sshll.u32 %s9776_s24, 6  ;;  %v529_v20 = vld [vmem:[%s9742_s3 + $0x38] sm:$0xff]  ;;  %s6594_s24 = smov 16  }
  0x7c   : > { %s6818_s17 = scalar_lea.vmem %s9739_s0, %s6812_s25  ;;  %s6597_s5 = smov 127  }
  0x7d   : > { %v515_v1 = vld [vmem:[%s6818_s17 + $0x8] sm:$0xff]  ;;  %v517_v2 = vld [vmem:[%s6818_s17 + $0x18] sm:$0xff]  ;;  %v514_v3 = vld [vmem:[%s6818_s17] sm:$0xff]  ;;  %s6598_s16 = smov 113   ;;  %s6599_s27 = smov 112  }
  0x7e   : > { %v5787_v4 = vpack.c.bf16 %v517_v2, %v515_v1  ;;  %v516_v5 = vld [vmem:[%s6818_s17 + $0x10] sm:$0xff]  ;;  %v519_v6 = vld [vmem:[%s6818_s17 + $0x28] sm:$0xff]  ;;  %v521_v7 = vld [vmem:[%s6818_s17 + $0x38] sm:$0xff]  ;;  %s6600_s20 = smov 111   ;;  %s8230_s30 = scalar_lea.vmem %s9740_s1, %s6812_s25 }
  0x7f   : > { %v5789_v8 = vpack.c.bf16 %v516_v5, %v514_v3  ;;  %v5791_v9 = vpack.c.bf16 %v521_v7, %v519_v6  ;;  %v518_v10 = vld [vmem:[%s6818_s17 + $0x20] sm:$0xff]  ;;  %v520_v11 = vld [vmem:[%s6818_s17 + $0x30] sm:$0xff]  ;;  %v741_v6 = vlaneseq  ;;  %s8238_s21 = scalar_lea.vmem %s9751_s12, %s6812_s25 }
  0x80   : > { %5788 = vmatprep.subr.bf16.mxu0 %v5787_v4  ;;  %v5793_v12 = vpack.c.bf16 %v520_v11, %v518_v10 }
  0x81   : > { %5790 = vmatpush1.bf16.msra.mxu0 %v5789_v8  ;;  %v763_v7 = vshrl.u32 %v741_v6, 7  ;;  %v7010_v8 = vand.u32 127, %v741_v6 }
  0x82   : > { %5792 = vmatprep.subr.bf16.mxu0 %v5791_v9 }
  0x83   : > { %v7016_v9 = vsub.s32 1, %v763_v7  ;;  %v7018_v10 = vsub.s32 0, %v763_v7  ;;  %vm743_vm1 = vcmp.lt.s32.totalorder %v7010_v8, 17  ;;  %vm1103_vm3 = vcmp.lt.s32.totalorder %v7010_v8, 16 }
  0x84   : > { %vm1343_vm4 = vcmp.lt.s32.totalorder %v7010_v8, 15  ;;  %vm1583_vm5 = vcmp.lt.s32.totalorder %v7010_v8, 1  ;;  %vm1823_vm6 = vcmp.lt.s32.totalorder %v7010_v8, 127  ;;  %vm2063_vm7 = vcmp.lt.s32.totalorder %v7010_v8, 113 }
  0x85   : > { %5794 = vmatpush1.bf16.msra.mxu0 %v5793_v12  ;;  %v760_v12 = vld [vmem:[#allocation2] sm:$0x3]  ;;  %vm2303_vm8 = vcmp.lt.s32.totalorder %v7010_v8, 112  ;;  %vm2543_vm9 = vcmp.lt.s32.totalorder %v7010_v8, 111 }
  0x86   : > { %v5745_v8 = vld [vmem:[%s9747_s8 + $0x1c0] sm:$0xff] }
  0x88   : > { %5485 = vmatmul.mubr.msk.f32.vlgmr.msra.gmra.mrb[0].mxu0 %vm530_vm0, %v522_v13 }
  0x89   : > { %625 = vmatprep.mubr.f32.mxu0 %v6592_v0 }
  0x8c   : > { %5486 = vmatmul.mubr.msk.f32.gmra.mrb[2].mxu0 %vm530_vm0, %v523_v14  ;;  %v7026_v14 = vrot.slane %v760_v12, %v7016_v9 }
  0x8d   : > { %631 = vmatprep.mubr.f32.mxu0 %v6592_v0 }
  0x90   : > { %5487 = vmatmul.mubr.msk.f32.gmra.mrb[4].mxu0 %vm530_vm0, %v524_v15  ;;  %v7029_v15 = vrot.slane %v760_v12, %v7018_v10 }
  0x91   : > { %637 = vmatprep.mubr.f32.mxu0 %v6592_v0 }
  0x94   : > { %5488 = vmatmul.mubr.msk.f32.gmra.mrb[6].mxu0 %vm530_vm0, %v525_v16 }
  0x95   : > { %643 = vmatprep.mubr.f32.mxu0 %v6592_v0 }
  0x98   : > { %5489 = vmatmul.mubr.msk.f32.gmra.mrb[8].mxu0 %vm530_vm0, %v526_v17 }
  0x99   : > { %649 = vmatprep.mubr.f32.mxu0 %v6592_v0 }
  0x9c   : > { %5490 = vmatmul.mubr.msk.f32.gmra.mrb[10].mxu0 %vm530_vm0, %v527_v18 }
  0x9d   : > { %655 = vmatprep.mubr.f32.mxu0 %v6592_v0 }
  0xa0   : > { %5491 = vmatmul.mubr.msk.f32.gmra.mrb[12].mxu0 %vm530_vm0, %v528_v19 }
  0xa1   : > { %661 = vmatprep.mubr.f32.mxu0 %v6592_v0 }
  0xa4   : > { %5492 = vmatmul.mubr.msk.f32.gmra.mrb[14].mxu0 %vm530_vm0, %v529_v20 }
  0xa5   : > { %2887 = vmatprep.mubr.f32.mxu0 %v6592_v0 }
 0x15b   : > { %v621_v21 = vpop.f32.mrb[0].mxu0 }
 0x15c   : > { %v668_v22 = vmax.f32 %v621_v21, 0.0  ;;  %v623_v23 = vpop.f32.mrb[1].mxu0 }
 0x15d   : > { %v669_v24 = vmax.f32 %v623_v23, 0.0 }
 0x15e   : > { %v6868_v25 = vmin.f32 %v668_v22, 6.0 }
 0x15f   : > { %v6870_v26 = vmin.f32 %v669_v24, 6.0  ;;  %v627_v27 = vpop.f32.mrb[2].mxu0 }
 0x160   : > { %v670_v28 = vmax.f32 %v627_v27, 0.0  ;;  %709 = vrot.lane.b32.xlu0 %v6868_v25, %s6593_s18  ;;  %v629_v29 = vpop.f32.mrb[3].mxu0 }
 0x161   : > { %v671_v30 = vmax.f32 %v629_v29, 0.0  ;;  %725 = vrot.lane.b32.xlu1 %v6870_v26, %s6593_s18 }
 0x162   : > { %v6876_v31 = vmin.f32 %v670_v28, 6.0 }
 0x163   : > { %v6878_v32 = vmin.f32 %v671_v30, 6.0  ;;  %v633_v33 = vpop.f32.mrb[4].mxu0 }
 0x164   : > { %v672_v34 = vmax.f32 %v633_v33, 0.0  ;;  %711 = vrot.lane.b32.xlu0 %v6876_v31, %s6593_s18  ;;  %v635_v35 = vpop.f32.mrb[5].mxu0 }
 0x165   : > { %727 = vrot.lane.b32.xlu1 %v6878_v32, %s6593_s18  ;;  %v673_v37 = vmax.f32 %v635_v35, 0.0 }
 0x166   : > { %v6884_v36 = vmin.f32 %v672_v34, 6.0 }
 0x167   : > { %v639_v38 = vpop.f32.mrb[6].mxu0  ;;  %v6888_v41 = vmin.f32 %v673_v37, 6.0 }
 0x168   : > { %v674_v39 = vmax.f32 %v639_v38, 0.0  ;;  %713 = vrot.lane.b32.xlu0 %v6884_v36, %s6593_s18  ;;  %v641_v40 = vpop.f32.mrb[7].mxu0 }
 0x169   : > { %v675_v43 = vmax.f32 %v641_v40, 0.0 }
 0x16a   : > { %v6890_v42 = vmin.f32 %v674_v39, 6.0 }
 0x16b   : > { %v645_v44 = vpop.f32.mrb[8].mxu0  ;;  %v6896_v47 = vmin.f32 %v675_v43, 6.0 }
 0x16c   : > { %v676_v45 = vmax.f32 %v645_v44, 0.0  ;;  %729 = vrot.lane.b32.xlu0 %v6888_v41, %s6593_s18  ;;  %715 = vrot.lane.b32.xlu1 %v6890_v42, %s6593_s18  ;;  %v647_v46 = vpop.f32.mrb[9].mxu0 }
 0x16d   : > { %v677_v49 = vmax.f32 %v647_v46, 0.0 }
 0x16e   : > { %v6898_v48 = vmin.f32 %v676_v45, 6.0 }
 0x16f   : > { %v651_v50 = vpop.f32.mrb[10].mxu0  ;;  %v6904_v53 = vmin.f32 %v677_v49, 6.0 }
 0x170   : > { %v678_v51 = vmax.f32 %v651_v50, 0.0  ;;  %731 = vrot.lane.b32.xlu1 %v6896_v47, %s6593_s18  ;;  %717 = vrot.lane.b32.xlu0 %v6898_v48, %s6593_s18  ;;  %v653_v52 = vpop.f32.mrb[11].mxu0 }
 0x171   : > { %v679_v55 = vmax.f32 %v653_v52, 0.0 }
 0x172   : > { %v6906_v54 = vmin.f32 %v678_v51, 6.0 }
 0x173   : > { %v657_v56 = vpop.f32.mrb[12].mxu0  ;;  %v6912_v59 = vmin.f32 %v679_v55, 6.0 }
 0x174   : > { %v680_v57 = vmax.f32 %v657_v56, 0.0  ;;  %733 = vrot.lane.b32.xlu0 %v6904_v53, %s6593_s18  ;;  %719 = vrot.lane.b32.xlu1 %v6906_v54, %s6593_s18  ;;  %v659_v58 = vpop.f32.mrb[13].mxu0 }
 0x175   : > { %v681_v61 = vmax.f32 %v659_v58, 0.0 }
 0x176   : > { %v6914_v60 = vmin.f32 %v680_v57, 6.0 }
 0x177   : > { %v663_v62 = vpop.f32.mrb[14].mxu0  ;;  %v6920_v2 = vmin.f32 %v681_v61, 6.0 }
 0x178   : > { %v682_v63 = vmax.f32 %v663_v62, 0.0  ;;  %735 = vrot.lane.b32.xlu1 %v6912_v59, %s6593_s18  ;;  %721 = vrot.lane.b32.xlu0 %v6914_v60, %s6593_s18  ;;  %v665_v1 = vpop.f32.mrb[15].mxu0 }
 0x179   : > { %v683_v4 = vmax.f32 %v665_v1, 0.0 }
 0x17a   : > { %v6922_v3 = vmin.f32 %v682_v63, 6.0 }
 0x17b   : > { %v6928_v5 = vmin.f32 %v683_v4, 6.0 }
 0x17c   : > { %737 = vrot.lane.b32.xlu0 %v6920_v2, %s6593_s18  ;;  %723 = vrot.lane.b32.xlu1 %v6922_v3, %s6593_s18 }
 0x180   : > { %1071 = vrot.lane.b32.xlu0 %v6868_v25, %s6594_s24  ;;  %739 = vrot.lane.b32.xlu1 %v6928_v5, %s6593_s18 }
 0x184   : > { %1087 = vrot.lane.b32.xlu0 %v6870_v26, %s6594_s24  ;;  %1073 = vrot.lane.b32.xlu1 %v6876_v31, %s6594_s24 }
 0x188   : > { %1075 = vrot.lane.b32.xlu0 %v6884_v36, %s6594_s24  ;;  %1089 = vrot.lane.b32.xlu1 %v6878_v32, %s6594_s24 }
 0x18c   : > { %1091 = vrot.lane.b32.xlu0 %v6888_v41, %s6594_s24  ;;  %1077 = vrot.lane.b32.xlu1 %v6890_v42, %s6594_s24 }
 0x190   : > { %1079 = vrot.lane.b32.xlu0 %v6898_v48, %s6594_s24  ;;  %1093 = vrot.lane.b32.xlu1 %v6896_v47, %s6594_s24 }
 0x194   : > { %1095 = vrot.lane.b32.xlu0 %v6904_v53, %s6594_s24  ;;  %1081 = vrot.lane.b32.xlu1 %v6906_v54, %s6594_s24 }
 0x198   : > { %1083 = vrot.lane.b32.xlu0 %v6914_v60, %s6594_s24  ;;  %1097 = vrot.lane.b32.xlu1 %v6912_v59, %s6594_s24 }
 0x19c   : > { %1099 = vrot.lane.b32.xlu0 %v6920_v2, %s6594_s24  ;;  %1085 = vrot.lane.b32.xlu1 %v6922_v3, %s6594_s24 }
 0x1a0   : > { %1311 = vrot.lane.b32.xlu0 %v6868_v25, %s6595_s26  ;;  %1101 = vrot.lane.b32.xlu1 %v6928_v5, %s6594_s24 }
 0x1a4   : > { %1327 = vrot.lane.b32.xlu0 %v6870_v26, %s6595_s26  ;;  %1313 = vrot.lane.b32.xlu1 %v6876_v31, %s6595_s26 }
 0x1a8   : > { %1315 = vrot.lane.b32.xlu0 %v6884_v36, %s6595_s26  ;;  %1329 = vrot.lane.b32.xlu1 %v6878_v32, %s6595_s26 }
 0x1ac   : > { %1331 = vrot.lane.b32.xlu0 %v6888_v41, %s6595_s26  ;;  %1317 = vrot.lane.b32.xlu1 %v6890_v42, %s6595_s26 }
 0x1b0   : > { %1319 = vrot.lane.b32.xlu0 %v6898_v48, %s6595_s26  ;;  %1333 = vrot.lane.b32.xlu1 %v6896_v47, %s6595_s26 }
 0x1b4   : > { %1335 = vrot.lane.b32.xlu0 %v6904_v53, %s6595_s26  ;;  %1321 = vrot.lane.b32.xlu1 %v6906_v54, %s6595_s26 }
 0x1b8   : > { %1323 = vrot.lane.b32.xlu0 %v6914_v60, %s6595_s26  ;;  %1337 = vrot.lane.b32.xlu1 %v6912_v59, %s6595_s26 }
 0x1bc   : > { %1339 = vrot.lane.b32.xlu0 %v6920_v2, %s6595_s26  ;;  %1325 = vrot.lane.b32.xlu1 %v6922_v3, %s6595_s26 }
 0x1c0   : > { %1551 = vrot.lane.b32.xlu0 %v6868_v25, %s6596_s13  ;;  %1341 = vrot.lane.b32.xlu1 %v6928_v5, %s6595_s26 }
 0x1c4   : > { %1567 = vrot.lane.b32.xlu0 %v6870_v26, %s6596_s13  ;;  %1553 = vrot.lane.b32.xlu1 %v6876_v31, %s6596_s13 }
 0x1c8   : > { %1555 = vrot.lane.b32.xlu0 %v6884_v36, %s6596_s13  ;;  %1569 = vrot.lane.b32.xlu1 %v6878_v32, %s6596_s13 }
 0x1cc   : > { %1571 = vrot.lane.b32.xlu0 %v6888_v41, %s6596_s13  ;;  %1557 = vrot.lane.b32.xlu1 %v6890_v42, %s6596_s13 }
 0x1d0   : > { %1559 = vrot.lane.b32.xlu0 %v6898_v48, %s6596_s13  ;;  %1573 = vrot.lane.b32.xlu1 %v6896_v47, %s6596_s13 }
 0x1d2   : > { %v710_v11 = vpop.permute.xlu0 %709 }
 0x1d3   : > { %v726_v13 = vpop.permute.xlu1 %725 }
 0x1d4   : > { %1575 = vrot.lane.b32.xlu0 %v6904_v53, %s6596_s13  ;;  %1561 = vrot.lane.b32.xlu1 %v6906_v54, %s6596_s13  ;;  %v752_v16 = vsel %vm743_vm1, %v726_v13, %v710_v11  ;;  %v744_v18 = vsel %vm743_vm1, %v710_v11, %v726_v13 }
 0x1d5   : > { %v773_v22 = vmul.f32 %v7026_v14, %v744_v18  ;;  %v772_v24 = vmul.f32 %v7029_v15, %v752_v16 }
 0x1d6   : > { %v712_v17 = vpop.permute.xlu0 %711 }
 0x1d7   : > { %v728_v19 = vpop.permute.xlu1 %727 }
 0x1d8   : > { %v753_v20 = vsel %vm743_vm1, %v728_v19, %v712_v17  ;;  %1563 = vrot.lane.b32.xlu0 %v6914_v60, %s6596_s13  ;;  %1577 = vrot.lane.b32.xlu1 %v6912_v59, %s6596_s13  ;;  %v745_v21 = vsel %vm743_vm1, %v712_v17, %v728_v19 }
 0x1d9   : > { %v775_v23 = vmul.f32 %v7026_v14, %v745_v21  ;;  %v774_v27 = vmul.f32 %v7029_v15, %v753_v20 }
 0x1da   : > { %v714_v28 = vpop.permute.xlu0 %713 }
 0x1db   : > { %v5795_v29 = vpack.c.bf16 %v775_v23, %v773_v22  ;;  %v5797_v30 = vpack.c.bf16 %v774_v27, %v772_v24 }
 0x1dc   : > { %1579 = vrot.lane.b32.xlu0 %v6920_v2, %s6596_s13  ;;  %1565 = vrot.lane.b32.xlu1 %v6922_v3, %s6596_s13 }
 0x1dd   : > { %5796 = vmatprep.subr.bf16.mxu1 %v5795_v29 }
 0x1de   : > { %5798 = vmatpush1.bf16.msra.mxu1 %v5797_v30  ;;  %v730_v33 = vpop.permute.xlu0 %729  ;;  %v716_v34 = vpop.permute.xlu1 %715 }
 0x1df   : > { %v754_v35 = vsel %vm743_vm1, %v730_v33, %v714_v28  ;;  %v746_v37 = vsel %vm743_vm1, %v714_v28, %v730_v33 }
 0x1e0   : > { %1791 = vrot.lane.b32.xlu0 %v6868_v25, %s6597_s5  ;;  %1581 = vrot.lane.b32.xlu1 %v6928_v5, %s6596_s13  ;;  %v776_v40 = vmul.f32 %v7029_v15, %v754_v35  ;;  %v777_v45 = vmul.f32 %v7026_v14, %v746_v37 }
 0x1e2   : > { %v732_v38 = vpop.permute.xlu1 %731  ;;  %v718_v39 = vpop.permute.xlu0 %717 }
 0x1e3   : > { %v747_v43 = vsel %vm743_vm1, %v716_v34, %v732_v38  ;;  %v755_v44 = vsel %vm743_vm1, %v732_v38, %v716_v34  ;;  %v5813_v38 = vpack.c.bf16 %v6876_v31, %v6868_v25 }
 0x1e4   : > { %v778_v46 = vmul.f32 %v7029_v15, %v755_v44  ;;  %v779_v49 = vmul.f32 %v7026_v14, %v747_v43  ;;  %1807 = vrot.lane.b32.xlu0 %v6870_v26, %s6597_s5  ;;  %1793 = vrot.lane.b32.xlu1 %v6876_v31, %s6597_s5 }
 0x1e6   : > { %v734_v50 = vpop.permute.xlu0 %733  ;;  %v720_v51 = vpop.permute.xlu1 %719  ;;  %v5799_v52 = vpack.c.bf16 %v779_v49, %v777_v45  ;;  %v5801_v55 = vpack.c.bf16 %v778_v46, %v776_v40  ;;  %v789_v40 = vld [vmem:[%s9743_s4 + $0x8] sm:$0xff]  ;;  %v1121_v45 = vld [vmem:[#allocation2 + $0x2] sm:$0x3]  ;;  %v5817_v46 = vpack.c.bf16 %v6890_v42, %v6884_v36  ;;  %v5819_v49 = vpack.c.bf16 %v6912_v59, %v6904_v53 }
 0x1e7   : > { %v748_v56 = vsel %vm743_vm1, %v718_v39, %v734_v50  ;;  %v756_v57 = vsel %vm743_vm1, %v734_v50, %v718_v39  ;;  %v5815_v39 = vpack.c.bf16 %v6896_v47, %v6888_v41 }
 0x1e8   : > { %5800 = vmatprep.subr.bf16.mxu1 %v5799_v52  ;;  %1795 = vrot.lane.b32.xlu0 %v6884_v36, %s6597_s5  ;;  %v780_v1 = vmul.f32 %v7029_v15, %v756_v57  ;;  %v781_v4 = vmul.f32 %v7026_v14, %v748_v56  ;;  %v7165_v52 = vrot.slane %v1121_v45, %v7016_v9 }
 0x1e9   : > { %1809 = vrot.lane.b32.xlu1 %v6878_v32, %s6597_s5  ;;  %5802 = vmatpush1.bf16.msra.mxu1 %v5801_v55 }
 0x1ea   : > { %v736_v58 = vpop.permute.xlu1 %735  ;;  %v722_v61 = vpop.permute.xlu0 %721 }
 0x1eb   : > { %v749_v62 = vsel %vm743_vm1, %v720_v51, %v736_v58  ;;  %v757_v63 = vsel %vm743_vm1, %v736_v58, %v720_v51  ;;  %v790_v51 = vld [vmem:[%s9743_s4 + $0x10] sm:$0xff]  ;;  %v5821_v58 = vpack.c.bf16 %v6906_v54, %v6898_v48 }
 0x1ec   : > { %v782_v6 = vmul.f32 %v7029_v15, %v757_v63  ;;  %v783_v7 = vmul.f32 %v7026_v14, %v749_v62  ;;  %1811 = vrot.lane.b32.xlu0 %v6888_v41, %s6597_s5  ;;  %v5823_v62 = vpack.c.bf16 %v6928_v5, %v6920_v2  ;;  %v791_v63 = vld [vmem:[%s9743_s4 + $0x18] sm:$0xff] }
 0x1ed   : > { %1797 = vrot.lane.b32.xlu1 %v6890_v42, %s6597_s5 }
 0x1ee   : > { %v738_v11 = vpop.permute.xlu0 %737  ;;  %v724_v12 = vpop.permute.xlu1 %723  ;;  %v5803_v13 = vpack.c.bf16 %v783_v7, %v781_v4  ;;  %v5805_v16 = vpack.c.bf16 %v782_v6, %v780_v1  ;;  %v5825_v7 = vpack.c.bf16 %v6922_v3, %v6914_v60 }
 0x1ef   : > { %v750_v17 = vsel %vm743_vm1, %v722_v61, %v738_v11  ;;  %v758_v18 = vsel %vm743_vm1, %v738_v11, %v722_v61 }
 0x1f0   : > { %5804 = vmatprep.subr.bf16.mxu1 %v5803_v13  ;;  %1799 = vrot.lane.b32.xlu0 %v6898_v48, %s6597_s5  ;;  %v784_v23 = vmul.f32 %v7029_v15, %v758_v18  ;;  %v785_v24 = vmul.f32 %v7026_v14, %v750_v17  ;;  %v793_v17 = vld [vmem:[%s9743_s4 + $0x28] sm:$0xff] }
 0x1f1   : > { %1813 = vrot.lane.b32.xlu1 %v6896_v47, %s6597_s5  ;;  %5806 = vmatpush1.bf16.msra.mxu1 %v5805_v16 }
 0x1f2   : > { %v7099_v19 = vpop.permute.xlu0 %1071  ;;  %v740_v20 = vpop.permute.xlu1 %739 }
 0x1f3   : > { %v751_v21 = vsel %vm743_vm1, %v724_v12, %v740_v20  ;;  %v759_v22 = vsel %vm743_vm1, %v740_v20, %v724_v12  ;;  %v792_v12 = vld [vmem:[%s9743_s4 + $0x20] sm:$0xff] }
 0x1f4   : > { %v786_v27 = vmul.f32 %v7029_v15, %v759_v22  ;;  %v787_v28 = vmul.f32 %v7026_v14, %v751_v21  ;;  %1815 = vrot.lane.b32.xlu0 %v6904_v53, %s6597_s5  ;;  %v5811_v15 = vpack.c.bf16 %v6878_v32, %v6870_v26  ;;  %v788_v14 = vld [vmem:[%s9743_s4] sm:$0xff]  ;;  %v794_v21 = vld [vmem:[%s9743_s4 + $0x30] sm:$0xff] }
 0x1f5   : > { %1801 = vrot.lane.b32.xlu1 %v6906_v54, %s6597_s5 }
 0x1f6   : > { %v7113_v29 = vpop.permute.xlu0 %1087  ;;  %v7115_v30 = vpop.permute.xlu1 %1073  ;;  %v5807_v33 = vpack.c.bf16 %v787_v28, %v785_v24  ;;  %v5809_v34 = vpack.c.bf16 %v786_v27, %v784_v23  ;;  %v7234_v27 = vrot.slane %v1121_v45, %v7018_v10 }
 0x1f7   : > { %v1104_v57 = vsel %vm1103_vm3, %v7099_v19, %v7113_v29 }
 0x1f8   : > { %1803 = vrot.lane.b32.xlu0 %v6914_v60, %s6597_s5  ;;  %5808 = vmatprep.subr.bf16.mxu1 %v5807_v33  ;;  %v1134_v1 = vmul.f32 %v7165_v52, %v1104_v57  ;;  %v1112_v33 = vsel %vm1103_vm3, %v7113_v29, %v7099_v19 }
 0x1f9   : > { %1817 = vrot.lane.b32.xlu1 %v6912_v59, %s6597_s5  ;;  %5810 = vmatpush1.bf16.msra.mxu1 %v5809_v34  ;;  %v1133_v19 = vmul.f32 %v7234_v27, %v1112_v33 }
 0x1fa   : > { %v7126_v35 = vpop.permute.xlu0 %1075  ;;  %5812 = vmatprep.subr.bf16.mxu1 %v5811_v15  ;;  %v7128_v37 = vpop.permute.xlu1 %1089 }
 0x1fb   : > { %v1105_v50 = vsel %vm1103_vm3, %v7115_v30, %v7128_v37  ;;  %v1113_v24 = vsel %vm1103_vm3, %v7128_v37, %v7115_v30  ;;  %v795_v30 = vld [vmem:[%s9743_s4 + $0x38] sm:$0xff] }
 0x1fc   : > { %1819 = vrot.lane.b32.xlu0 %v6920_v2, %s6597_s5  ;;  %5501 = vmatmul.mubr.msk.f32.vlgmr.msra.gmra.mrb[0].mxu1 %vm796_vm2, %v788_v14  ;;  %v1136_v61 = vmul.f32 %v7165_v52, %v1105_v50  ;;  %v1135_v14 = vmul.f32 %v7234_v27, %v1113_v24 }
 0x1fd   : > { %1805 = vrot.lane.b32.xlu1 %v6922_v3, %s6597_s5  ;;  %5814 = vmatpush1.bf16.msra.mxu1 %v5813_v38 }
 0x1fe   : > { %v7142_v43 = vpop.permute.xlu0 %1091  ;;  %5816 = vmatprep.subr.bf16.mxu1 %v5815_v39  ;;  %v7144_v44 = vpop.permute.xlu1 %1077  ;;  %891 = vmatprep.mubr.f32.mxu1 %v6592_v0  ;;  %v5827_v11 = vpack.c.bf16 %v1136_v61, %v1134_v1  ;;  %v5829_v50 = vpack.c.bf16 %v1135_v14, %v1133_v19 }
 0x1ff   : > { %v1106_v37 = vsel %vm1103_vm3, %v7126_v35, %v7142_v43 }
 0x200   : > { %2031 = vrot.lane.b32.xlu0 %v6868_v25, %s6598_s16  ;;  %5502 = vmatmul.mubr.msk.f32.gmra.mrb[2].mxu1 %vm796_vm2, %v789_v40  ;;  %v5493_v40 = vld [vmem:[%s9743_s4 + $0x100] sm:$0xff]  ;;  %v1138_v45 = vmul.f32 %v7165_v52, %v1106_v37 }
 0x201   : > { %1821 = vrot.lane.b32.xlu1 %v6928_v5, %s6597_s5  ;;  %5818 = vmatpush1.bf16.msra.mxu1 %v5817_v46 }
 0x202   : > { %v7167_v55 = vpop.permute.xlu0 %1079  ;;  %5820 = vmatprep.subr.bf16.mxu1 %v5819_v49  ;;  %v1094_v56 = vpop.permute.xlu1 %1093  ;;  %897 = vmatprep.mubr.f32.mxu1 %v6592_v0 }
 0x203   : > { %v1107_v28 = vsel %vm1103_vm3, %v7144_v44, %v1094_v56  ;;  %v1115_v38 = vsel %vm1103_vm3, %v1094_v56, %v7144_v44  ;;  %v1114_v44 = vsel %vm1103_vm3, %v7142_v43, %v7126_v35 }
 0x204   : > { %2047 = vrot.lane.b32.xlu0 %v6870_v26, %s6598_s16  ;;  %5503 = vmatmul.mubr.msk.f32.gmra.mrb[4].mxu1 %vm796_vm2, %v790_v51  ;;  %v1140_v39 = vmul.f32 %v7165_v52, %v1107_v28  ;;  %v1139_v51 = vmul.f32 %v7234_v27, %v1115_v38  ;;  %v1137_v43 = vmul.f32 %v7234_v27, %v1114_v44 }
 0x205   : > { %2033 = vrot.lane.b32.xlu1 %v6876_v31, %s6598_s16  ;;  %5822 = vmatpush1.bf16.msra.mxu1 %v5821_v58 }
 0x206   : > { %v7188_v4 = vpop.permute.xlu0 %1095  ;;  %v1082_v6 = vpop.permute.xlu1 %1081  ;;  %5824 = vmatprep.subr.bf16.mxu1 %v5823_v62  ;;  %903 = vmatprep.mubr.f32.mxu1 %v6592_v0  ;;  %v5831_v35 = vpack.c.bf16 %v1140_v39, %v1138_v45  ;;  %v5494_v62 = vld [vmem:[%s9743_s4 + $0x108] sm:$0xff] }
 0x207   : > { %v1108_v56 = vsel %vm1103_vm3, %v7167_v55, %v7188_v4 }
 0x208   : > { %2035 = vrot.lane.b32.xlu0 %v6884_v36, %s6598_s16  ;;  %5504 = vmatmul.mubr.msk.f32.gmra.mrb[6].mxu1 %vm796_vm2, %v791_v63  ;;  %v1116_v63 = vsel %vm1103_vm3, %v7188_v4, %v7167_v55  ;;  %v1142_v1 = vmul.f32 %v7165_v52, %v1108_v56 }
 0x209   : > { %2049 = vrot.lane.b32.xlu1 %v6878_v32, %s6598_s16  ;;  %5826 = vmatpush1.bf16.msra.mxu1 %v5825_v7  ;;  %v1141_v24 = vmul.f32 %v7234_v27, %v1116_v63 }
 0x20a   : > { %v7201_v13 = vpop.permute.xlu0 %1083  ;;  %v1098_v16 = vpop.permute.xlu1 %1097  ;;  %5828 = vmatprep.subr.bf16.mxu1 %v5827_v11  ;;  %909 = vmatprep.mubr.f32.mxu1 %v6592_v0  ;;  %v5833_v11 = vpack.c.bf16 %v1139_v51, %v1137_v43  ;;  %v5497_v51 = vld [vmem:[%s9743_s4 + $0x120] sm:$0xff] }
 0x20b   : > { %v1109_v29 = vsel %vm1103_vm3, %v1082_v6, %v1098_v16  ;;  %v1117_v57 = vsel %vm1103_vm3, %v1098_v16, %v1082_v6 }
 0x20c   : > { %2051 = vrot.lane.b32.xlu0 %v6888_v41, %s6598_s16  ;;  %5505 = vmatmul.mubr.msk.f32.gmra.mrb[8].mxu1 %vm796_vm2, %v792_v12  ;;  %v1144_v58 = vmul.f32 %v7165_v52, %v1109_v29  ;;  %v1143_v12 = vmul.f32 %v7234_v27, %v1117_v57  ;;  %v5496_v29 = vld [vmem:[%s9743_s4 + $0x118] sm:$0xff] }
 0x20d   : > { %2037 = vrot.lane.b32.xlu1 %v6890_v42, %s6598_s16  ;;  %915 = vmatprep.mubr.f32.mxu1 %v6592_v0 }
 0x20e   : > { %v7213_v18 = vpop.permute.xlu0 %1099  ;;  %v1086_v20 = vpop.permute.xlu1 %1085  ;;  %v5837_v38 = vpack.c.bf16 %v1143_v12, %v1141_v24 }
 0x20f   : > { %v1110_v16 = vsel %vm1103_vm3, %v7201_v13, %v7213_v18 }
 0x210   : > { %2039 = vrot.lane.b32.xlu0 %v6898_v48, %s6598_s16  ;;  %5506 = vmatmul.mubr.msk.f32.gmra.mrb[10].mxu1 %vm796_vm2, %v793_v17  ;;  %v7317_v17 = vld [vmem:[#allocation2 + $0x4] sm:$0x3] }
 0x211   : > { %2053 = vrot.lane.b32.xlu1 %v6896_v47, %s6598_s16  ;;  %921 = vmatprep.mubr.f32.mxu1 %v6592_v0  ;;  %v7343_v33 = vrot.slane %v7317_v17, %v7016_v9 }
 0x212   : > { %v7224_v22 = vpop.permute.xlu0 %1311  ;;  %v1102_v23 = vpop.permute.xlu1 %1101 }
 0x213   : > { %v1111_v61 = vsel %vm1103_vm3, %v1086_v20, %v1102_v23  ;;  %v1119_v55 = vsel %vm1103_vm3, %v1102_v23, %v1086_v20  ;;  %v5495_v20 = vld [vmem:[%s9743_s4 + $0x110] sm:$0xff]  ;;  %v1118_v23 = vsel %vm1103_vm3, %v7213_v18, %v7201_v13 }
 0x214   : > { %2055 = vrot.lane.b32.xlu0 %v6904_v53, %s6598_s16  ;;  %5507 = vmatmul.mubr.msk.f32.gmra.mrb[12].mxu1 %vm796_vm2, %v794_v21  ;;  %v1148_v4 = vmul.f32 %v7165_v52, %v1111_v61  ;;  %v5835_v21 = vpack.c.bf16 %v1144_v58, %v1142_v1  ;;  %v1147_v39 = vmul.f32 %v7234_v27, %v1119_v55  ;;  %v5498_v58 = vld [vmem:[%s9743_s4 + $0x128] sm:$0xff]  ;;  %v5499_v61 = vld [vmem:[%s9743_s4 + $0x130] sm:$0xff] }
 0x215   : > { %2041 = vrot.lane.b32.xlu1 %v6906_v54, %s6598_s16  ;;  %927 = vmatprep.mubr.f32.mxu1 %v6592_v0  ;;  %v1145_v19 = vmul.f32 %v7234_v27, %v1118_v23 }
 0x216   : > { %v7249_v34 = vpop.permute.xlu0 %1327  ;;  %v7251_v15 = vpop.permute.xlu1 %1313 }
 0x217   : > { %v1344_v13 = vsel %vm1343_vm4, %v7224_v22, %v7249_v34 }
 0x218   : > { %2043 = vrot.lane.b32.xlu0 %v6914_v60, %s6598_s16  ;;  %5508 = vmatmul.mubr.msk.f32.gmra.mrb[14].mxu1 %vm796_vm2, %v795_v30  ;;  %v1146_v30 = vmul.f32 %v7165_v52, %v1110_v16 }
 0x219   : > { %2057 = vrot.lane.b32.xlu1 %v6912_v59, %s6598_s16  ;;  %1022 = vmatprep.mubr.f32.mxu1 %v6592_v0 }
 0x21a   : > { %v7279_v46 = vpop.permute.xlu0 %1315  ;;  %v7281_v49 = vpop.permute.xlu1 %1329  ;;  %v5839_v18 = vpack.c.bf16 %v1148_v4, %v1146_v30 }
 0x21b   : > { %v1345_v28 = vsel %vm1343_vm4, %v7251_v15, %v7281_v49  ;;  %v1353_v1 = vsel %vm1343_vm4, %v7281_v49, %v7251_v15  ;;  %v5500_v15 = vld [vmem:[%s9743_s4 + $0x138] sm:$0xff]  ;;  %v1352_v49 = vsel %vm1343_vm4, %v7249_v34, %v7224_v22 }
 0x21c   : > { %2059 = vrot.lane.b32.xlu0 %v6920_v2, %s6598_s16  ;;  %5509 = vmatmul.mubr.msk.f32.vlgmr.msra.gmra.mrb[0].mxu1 %vm796_vm2, %v5493_v40  ;;  %v1376_v52 = vmul.f32 %v7343_v33, %v1345_v28  ;;  %v1374_v40 = vmul.f32 %v7343_v33, %v1344_v13 }
 0x21d   : > { %2045 = vrot.lane.b32.xlu1 %v6922_v3, %s6598_s16  ;;  %5830 = vmatpush1.bf16.msra.mxu1 %v5829_v50  ;;  %v5841_v50 = vpack.c.bf16 %v1147_v39, %v1145_v19  ;;  %v5518_v19 = vld [vmem:[%s9743_s4 + $0x48] sm:$0xff] }
 0x21e   : > { %5832 = vmatprep.subr.bf16.mxu1 %v5831_v35  ;;  %v7307_v6 = vpop.permute.xlu0 %1331  ;;  %v7309_v7 = vpop.permute.xlu1 %1317  ;;  %1028 = vmatprep.mubr.f32.mxu1 %v6592_v0  ;;  %v5843_v27 = vpack.c.bf16 %v1376_v52, %v1374_v40 }
 0x21f   : > { %v1346_v4 = vsel %vm1343_vm4, %v7279_v46, %v7307_v6  ;;  %v1354_v28 = vsel %vm1343_vm4, %v7307_v6, %v7279_v46 }
 0x220   : > { %2271 = vrot.lane.b32.xlu0 %v6868_v25, %s6599_s27  ;;  %5510 = vmatmul.mubr.msk.f32.gmra.mrb[2].mxu1 %vm796_vm2, %v5494_v62 }
 0x221   : > { %2061 = vrot.lane.b32.xlu1 %v6928_v5, %s6598_s16  ;;  %5834 = vmatpush1.bf16.msra.mxu1 %v5833_v11  ;;  %v7409_v11 = vrot.slane %v7317_v17, %v7018_v10 }
 0x222   : > { %5836 = vmatprep.subr.bf16.mxu1 %v5835_v21  ;;  %v7345_v14 = vpop.permute.xlu0 %1319  ;;  %v1334_v37 = vpop.permute.xlu1 %1333  ;;  %1034 = vmatprep.mubr.f32.mxu1 %v6592_v0 }
 0x223   : > { %v1347_v12 = vsel %vm1343_vm4, %v7309_v7, %v1334_v37  ;;  %v1375_v55 = vmul.f32 %v7409_v11, %v1353_v1  ;;  %v1355_v21 = vsel %vm1343_vm4, %v1334_v37, %v7309_v7  ;;  %v1373_v22 = vmul.f32 %v7409_v11, %v1352_v49  ;;  %v5517_v7 = vld [vmem:[%s9743_s4 + $0x40] sm:$0xff] }
 0x224   : > { %2287 = vrot.lane.b32.xlu0 %v6870_v26, %s6599_s27  ;;  %5511 = vmatmul.mubr.msk.f32.gmra.mrb[4].mxu1 %vm796_vm2, %v5495_v20  ;;  %v1380_v24 = vmul.f32 %v7343_v33, %v1347_v12  ;;  %v1378_v20 = vmul.f32 %v7343_v33, %v1346_v4  ;;  %v1377_v6 = vmul.f32 %v7409_v11, %v1354_v28 }
 0x225   : > { %2273 = vrot.lane.b32.xlu1 %v6876_v31, %s6599_s27  ;;  %5838 = vmatpush1.bf16.msra.mxu1 %v5837_v38  ;;  %v5845_v37 = vpack.c.bf16 %v1375_v55, %v1373_v22  ;;  %v1379_v38 = vmul.f32 %v7409_v11, %v1355_v21  ;;  %v5520_v22 = vld [vmem:[%s9743_s4 + $0x58] sm:$0xff] }
 0x226   : > { %5840 = vmatprep.subr.bf16.mxu1 %v5839_v18  ;;  %v7364_v44 = vpop.permute.xlu0 %1335  ;;  %v1322_v45 = vpop.permute.xlu1 %1321  ;;  %1040 = vmatprep.mubr.f32.mxu1 %v6592_v0  ;;  %v5847_v46 = vpack.c.bf16 %v1380_v24, %v1378_v20 }
 0x227   : > { %v1348_v39 = vsel %vm1343_vm4, %v7345_v14, %v7364_v44 }
 0x228   : > { %2275 = vrot.lane.b32.xlu0 %v6884_v36, %s6599_s27  ;;  %5512 = vmatmul.mubr.msk.f32.gmra.mrb[6].mxu1 %vm796_vm2, %v5496_v29  ;;  %v1356_v29 = vsel %vm1343_vm4, %v7364_v44, %v7345_v14  ;;  %v1382_v40 = vmul.f32 %v7343_v33, %v1348_v39 }
 0x229   : > { %2289 = vrot.lane.b32.xlu1 %v6878_v32, %s6599_s27  ;;  %5842 = vmatpush1.bf16.msra.mxu1 %v5841_v50  ;;  %v1381_v1 = vmul.f32 %v7409_v11, %v1356_v29 }
 0x22a   : > { %5844 = vmatprep.subr.bf16.mxu1 %v5843_v27  ;;  %v7375_v56 = vpop.permute.xlu0 %1323  ;;  %v1338_v57 = vpop.permute.xlu1 %1337  ;;  %1046 = vmatprep.mubr.f32.mxu1 %v6592_v0  ;;  %v5849_v27 = vpack.c.bf16 %v1379_v38, %v1377_v6 }
 0x22b   : > { %v1349_v34 = vsel %vm1343_vm4, %v1322_v45, %v1338_v57  ;;  %v1357_v13 = vsel %vm1343_vm4, %v1338_v57, %v1322_v45 }
 0x22c   : > { %2291 = vrot.lane.b32.xlu0 %v6888_v41, %s6599_s27  ;;  %5513 = vmatmul.mubr.msk.f32.gmra.mrb[8].mxu1 %vm796_vm2, %v5497_v51  ;;  %v1384_v52 = vmul.f32 %v7343_v33, %v1349_v34  ;;  %v1383_v51 = vmul.f32 %v7409_v11, %v1357_v13 }
 0x22d   : > { %2277 = vrot.lane.b32.xlu1 %v6890_v42, %s6599_s27  ;;  %1052 = vmatprep.mubr.f32.mxu1 %v6592_v0 }
 0x22e   : > { %v7387_v35 = vpop.permute.xlu0 %1339  ;;  %v1326_v43 = vpop.permute.xlu1 %1325  ;;  %v5853_v4 = vpack.c.bf16 %v1383_v51, %v1381_v1 }
 0x22f   : > { %v1350_v57 = vsel %vm1343_vm4, %v7375_v56, %v7387_v35 }
 0x230   : > { %2279 = vrot.lane.b32.xlu0 %v6898_v48, %s6599_s27  ;;  %5514 = vmatmul.mubr.msk.f32.gmra.mrb[10].mxu1 %vm796_vm2, %v5498_v58  ;;  %v7492_v58 = vld [vmem:[#allocation2 + $0x6] sm:$0x3] }
 0x231   : > { %2293 = vrot.lane.b32.xlu1 %v6896_v47, %s6599_s27  ;;  %1058 = vmatprep.mubr.f32.mxu1 %v6592_v0 }
 0x232   : > { %v7398_v62 = vpop.permute.xlu0 %1551  ;;  %v1342_v63 = vpop.permute.xlu1 %1341 }
 0x233   : > { %v1351_v18 = vsel %vm1343_vm4, %v1326_v43, %v1342_v63  ;;  %v1359_v14 = vsel %vm1343_vm4, %v1342_v63, %v1326_v43  ;;  %v5519_v43 = vld [vmem:[%s9743_s4 + $0x50] sm:$0xff]  ;;  %v1386_v63 = vmul.f32 %v7343_v33, %v1350_v57 }
 0x234   : > { %2295 = vrot.lane.b32.xlu0 %v6904_v53, %s6599_s27  ;;  %5515 = vmatmul.mubr.msk.f32.gmra.mrb[12].mxu1 %vm796_vm2, %v5499_v61  ;;  %v1388_v44 = vmul.f32 %v7343_v33, %v1351_v18  ;;  %v5851_v61 = vpack.c.bf16 %v1384_v52, %v1382_v40  ;;  %v1387_v21 = vmul.f32 %v7409_v11, %v1359_v14 }
 0x235   : > { %2281 = vrot.lane.b32.xlu1 %v6906_v54, %s6599_s27  ;;  %1064 = vmatprep.mubr.f32.mxu1 %v6592_v0 }
 0x236   : > { %v7424_v16 = vpop.permute.xlu0 %1567  ;;  %v7426_v17 = vpop.permute.xlu1 %1553 }
 0x238   : > { %2283 = vrot.lane.b32.xlu0 %v6914_v60, %s6599_s27  ;;  %5516 = vmatmul.mubr.msk.f32.gmra.mrb[14].mxu1 %vm796_vm2, %v5500_v15  ;;  %v7518_v15 = vrot.slane %v7492_v58, %v7016_v9 }
 0x239   : > { %2297 = vrot.lane.b32.xlu1 %v6912_v59, %s6599_s27  ;;  %1246 = vmatprep.mubr.f32.mxu1 %v6592_v0 }
 0x23a   : > { %v7454_v23 = vpop.permute.xlu0 %1555  ;;  %v7456_v30 = vpop.permute.xlu1 %1569 }
 0x23b   : > { %v1585_v12 = vsel %vm1583_vm5, %v7426_v17, %v7456_v30  ;;  %v1593_v13 = vsel %vm1583_vm5, %v7456_v30, %v7426_v17  ;;  %v5524_v17 = vld [vmem:[%s9743_s4 + $0x78] sm:$0xff] }
 0x23c   : > { %2299 = vrot.lane.b32.xlu0 %v6920_v2, %s6599_s27  ;;  %5525 = vmatmul.mubr.msk.f32.vlgmr.msra.gmra.mrb[0].mxu1 %vm796_vm2, %v5517_v7  ;;  %v1616_v33 = vmul.f32 %v7518_v15, %v1585_v12 }
 0x23d   : > { %2285 = vrot.lane.b32.xlu1 %v6922_v3, %s6599_s27  ;;  %5846 = vmatpush1.bf16.msra.mxu1 %v5845_v37 }
 0x23e   : > { %5848 = vmatprep.subr.bf16.mxu1 %v5847_v46  ;;  %v7482_v45 = vpop.permute.xlu0 %1571  ;;  %v7484_v50 = vpop.permute.xlu1 %1557  ;;  %1252 = vmatprep.mubr.f32.mxu1 %v6592_v0 }
 0x240   : > { %2511 = vrot.lane.b32.xlu0 %v6868_v25, %s6600_s20  ;;  %5526 = vmatmul.mubr.msk.f32.gmra.mrb[2].mxu1 %vm796_vm2, %v5518_v19  ;;  %v1358_v25 = vsel %vm1343_vm4, %v7387_v35, %v7375_v56  ;;  %v1584_v56 = vsel %vm1583_vm5, %v7398_v62, %v7424_v16  ;;  %v5855_v35 = vpack.c.bf16 %v1388_v44, %v1386_v63  ;;  %v5533_v19 = vld [vmem:[%s9743_s4 + $0x80] sm:$0xff]  ;;  %v5534_v44 = vld [vmem:[%s9743_s4 + $0x88] sm:$0xff] }
 0x241   : > { %2301 = vrot.lane.b32.xlu1 %v6928_v5, %s6599_s27  ;;  %5850 = vmatpush1.bf16.msra.mxu1 %v5849_v27  ;;  %v1385_v24 = vmul.f32 %v7409_v11, %v1358_v25  ;;  %v1614_v34 = vmul.f32 %v7518_v15, %v1584_v56  ;;  %v5521_v11 = vld [vmem:[%s9743_s4 + $0x60] sm:$0xff]  ;;  %v1841_v25 = vld [vmem:[#allocation2 + $0xa] sm:$0x3] }
 0x242   : > { %5852 = vmatprep.subr.bf16.mxu1 %v5851_v61  ;;  %v7520_v49 = vpop.permute.xlu0 %1559  ;;  %v1574_v55 = vpop.permute.xlu1 %1573  ;;  %1258 = vmatprep.mubr.f32.mxu1 %v6592_v0 }
 0x243   : > { %v1595_v6 = vsel %vm1583_vm5, %v1574_v55, %v7484_v50 }
 0x244   : > { %2527 = vrot.lane.b32.xlu0 %v6870_v26, %s6600_s20  ;;  %5527 = vmatmul.mubr.msk.f32.gmra.mrb[4].mxu1 %vm796_vm2, %v5519_v43  ;;  %v5857_v26 = vpack.c.bf16 %v1387_v21, %v1385_v24 }
 0x245   : > { %2513 = vrot.lane.b32.xlu1 %v6876_v31, %s6600_s20  ;;  %5854 = vmatpush1.bf16.msra.mxu1 %v5853_v4  ;;  %v5859_v31 = vpack.c.bf16 %v1616_v33, %v1614_v34  ;;  %v5535_v33 = vld [vmem:[%s9743_s4 + $0x90] sm:$0xff] }
 0x246   : > { %5856 = vmatprep.subr.bf16.mxu1 %v5855_v35  ;;  %v7539_v7 = vpop.permute.xlu0 %1575  ;;  %v1562_v28 = vpop.permute.xlu1 %1561  ;;  %1264 = vmatprep.mubr.f32.mxu1 %v6592_v0 }
 0x248   : > { %2515 = vrot.lane.b32.xlu0 %v6884_v36, %s6600_s20  ;;  %5528 = vmatmul.mubr.msk.f32.gmra.mrb[6].mxu1 %vm796_vm2, %v5520_v22  ;;  %v7688_v22 = vrot.slane %v1841_v25, %v7016_v9 }
 0x249   : > { %2529 = vrot.lane.b32.xlu1 %v6878_v32, %s6600_s20  ;;  %5858 = vmatpush1.bf16.msra.mxu1 %v5857_v26  ;;  %v5522_v32 = vld [vmem:[%s9743_s4 + $0x68] sm:$0xff] }
 0x24a   : > { %5860 = vmatprep.subr.bf16.mxu1 %v5859_v31  ;;  %v7550_v20 = vpop.permute.xlu0 %1563  ;;  %v1578_v37 = vpop.permute.xlu1 %1577  ;;  %1270 = vmatprep.mubr.f32.mxu1 %v6592_v0 }
 0x24b   : > { %v1597_v57 = vsel %vm1583_vm5, %v1578_v37, %v1562_v28 }
 0x24c   : > { %2531 = vrot.lane.b32.xlu0 %v6888_v41, %s6600_s20  ;;  %5529 = vmatmul.mubr.msk.f32.gmra.mrb[8].mxu1 %vm796_vm2, %v5521_v11  ;;  %v5523_v41 = vld [vmem:[%s9743_s4 + $0x70] sm:$0xff] }
 0x24d   : > { %2517 = vrot.lane.b32.xlu1 %v6890_v42, %s6600_s20  ;;  %1276 = vmatprep.mubr.f32.mxu1 %v6592_v0 }
 0x24e   : > { %v7562_v36 = vpop.permute.xlu0 %1579  ;;  %v1566_v38 = vpop.permute.xlu1 %1565 }
 0x24f   : > { %v1590_v43 = vsel %vm1583_vm5, %v7550_v20, %v7562_v36  ;;  %v1598_v35 = vsel %vm1583_vm5, %v7562_v36, %v7550_v20  ;;  %v5536_v20 = vld [vmem:[%s9743_s4 + $0x98] sm:$0xff] }
 0x250   : > { %2519 = vrot.lane.b32.xlu0 %v6898_v48, %s6600_s20  ;;  %5530 = vmatmul.mubr.msk.f32.gmra.mrb[10].mxu1 %vm796_vm2, %v5522_v32  ;;  %v1587_v48 = vsel %vm1583_vm5, %v7484_v50, %v1574_v55  ;;  %v1626_v24 = vmul.f32 %v7518_v15, %v1590_v43 }
 0x251   : > { %2533 = vrot.lane.b32.xlu1 %v6896_v47, %s6600_s20  ;;  %1282 = vmatprep.mubr.f32.mxu1 %v6592_v0  ;;  %v7584_v47 = vrot.slane %v7492_v58, %v7018_v10  ;;  %v1620_v18 = vmul.f32 %v7518_v15, %v1587_v48  ;;  %v5538_v48 = vld [vmem:[%s9743_s4 + $0xa8] sm:$0xff] }
 0x252   : > { %v7573_v42 = vpop.permute.xlu0 %1791  ;;  %v1582_v39 = vpop.permute.xlu1 %1581 }
 0x253   : > { %v1615_v46 = vmul.f32 %v7584_v47, %v1593_v13  ;;  %v1619_v27 = vmul.f32 %v7584_v47, %v1595_v6  ;;  %v1591_v14 = vsel %vm1583_vm5, %v1566_v38, %v1582_v39  ;;  %v1625_v11 = vmul.f32 %v7584_v47, %v1598_v35 }
 0x254   : > { %2535 = vrot.lane.b32.xlu0 %v6904_v53, %s6600_s20  ;;  %5531 = vmatmul.mubr.msk.f32.gmra.mrb[12].mxu1 %vm796_vm2, %v5523_v41  ;;  %v1592_v53 = vsel %vm1583_vm5, %v7424_v16, %v7398_v62  ;;  %v1589_v16 = vsel %vm1583_vm5, %v1562_v28, %v1578_v37  ;;  %v1628_v55 = vmul.f32 %v7518_v15, %v1591_v14 }
 0x255   : > { %2521 = vrot.lane.b32.xlu1 %v6906_v54, %s6600_s20  ;;  %1288 = vmatprep.mubr.f32.mxu1 %v6592_v0  ;;  %v1586_v54 = vsel %vm1583_vm5, %v7454_v23, %v7482_v45  ;;  %v1613_v62 = vmul.f32 %v7584_v47, %v1592_v53  ;;  %v1624_v58 = vmul.f32 %v7518_v15, %v1589_v16 }
 0x256   : > { %v7599_v30 = vpop.permute.xlu0 %1807  ;;  %v7601_v52 = vpop.permute.xlu1 %1793  ;;  %v1618_v29 = vmul.f32 %v7518_v15, %v1586_v54 }
 0x257   : > { %v5861_v50 = vpack.c.bf16 %v1615_v46, %v1613_v62  ;;  %v1832_v28 = vsel %vm1823_vm6, %v7599_v30, %v7573_v42  ;;  %v5539_v46 = vld [vmem:[%s9743_s4 + $0xb0] sm:$0xff]  ;;  %v7731_v62 = vrot.slane %v1841_v25, %v7018_v10  ;;  %v5550_v25 = vld [vmem:[%s9743_s4 + $0xc8] sm:$0xff] }
 0x258   : > { %2523 = vrot.lane.b32.xlu0 %v6914_v60, %s6600_s20  ;;  %5532 = vmatmul.mubr.msk.f32.gmra.mrb[14].mxu1 %vm796_vm2, %v5524_v17  ;;  %v1594_v60 = vsel %vm1583_vm5, %v7482_v45, %v7454_v23  ;;  %v5863_v23 = vpack.c.bf16 %v1620_v18, %v1618_v29  ;;  %v1854_v37 = vmul.f32 %v7688_v22, %v1832_v28 }
 0x259   : > { %2537 = vrot.lane.b32.xlu1 %v6912_v59, %s6600_s20  ;;  %1486 = vmatprep.mubr.f32.mxu1 %v6592_v0  ;;  %v1588_v59 = vsel %vm1583_vm5, %v7520_v49, %v7539_v7  ;;  %v1617_v45 = vmul.f32 %v7584_v47, %v1594_v60 }
 0x25a   : > { %v7629_v40 = vpop.permute.xlu0 %1795  ;;  %v1622_v61 = vmul.f32 %v7518_v15, %v1588_v59  ;;  %v5871_v15 = vpack.c.bf16 %v1628_v55, %v1626_v24 }
 0x25b   : > { %v7636_v51 = vpop.permute.xlu1 %1809  ;;  %v5865_v12 = vpack.c.bf16 %v1619_v27, %v1617_v45 }
 0x25c   : > { %2539 = vrot.lane.b32.xlu0 %v6920_v2, %s6600_s20  ;;  %5541 = vmatmul.mubr.msk.f32.vlgmr.msra.gmra.mrb[0].mxu1 %vm796_vm2, %v5533_v19  ;;  %v1596_v2 = vsel %vm1583_vm5, %v7539_v7, %v7520_v49  ;;  %v1599_v49 = vsel %vm1583_vm5, %v1582_v39, %v1566_v38  ;;  %v5867_v4 = vpack.c.bf16 %v1624_v58, %v1622_v61  ;;  %v5537_v39 = vld [vmem:[%s9743_s4 + $0xa0] sm:$0xff]  ;;  %v5540_v19 = vld [vmem:[%s9743_s4 + $0xb8] sm:$0xff] }
 0x25d   : > { %2525 = vrot.lane.b32.xlu1 %v6922_v3, %s6600_s20  ;;  %5862 = vmatpush1.bf16.msra.mxu1 %v5861_v50  ;;  %v1623_v3 = vmul.f32 %v7584_v47, %v1597_v57  ;;  %v1621_v21 = vmul.f32 %v7584_v47, %v1596_v2  ;;  %v1833_v56 = vsel %vm1823_vm6, %v7636_v51, %v7601_v52  ;;  %v5549_v57 = vld [vmem:[%s9743_s4 + $0xc0] sm:$0xff] }
 0x25e   : > { %5864 = vmatprep.subr.bf16.mxu1 %v5863_v23  ;;  %v7657_v1 = vpop.permute.xlu0 %1811  ;;  %1492 = vmatprep.mubr.f32.mxu1 %v6592_v0  ;;  %v1627_v7 = vmul.f32 %v7584_v47, %v1599_v49  ;;  %v1856_v31 = vmul.f32 %v7688_v22, %v1833_v56  ;;  %v1825_v18 = vsel %vm1823_vm6, %v7601_v52, %v7636_v51 }
 0x25f   : > { %v7665_v63 = vpop.permute.xlu1 %1797  ;;  %v1824_v52 = vsel %vm1823_vm6, %v7573_v42, %v7599_v30  ;;  %v1855_v29 = vmul.f32 %v7731_v62, %v1825_v18  ;;  %v1834_v50 = vsel %vm1823_vm6, %v7657_v1, %v7629_v40  ;;  %v1826_v58 = vsel %vm1823_vm6, %v7629_v40, %v7657_v1 }
 0x260   : > { %5542 = vmatmul.mubr.msk.f32.gmra.mrb[2].mxu1 %vm796_vm2, %v5534_v44  ;;  %v5873_v36 = vpack.c.bf16 %v1627_v7, %v1625_v11  ;;  %v5875_v41 = vpack.c.bf16 %v1856_v31, %v1854_v37  ;;  %v1853_v42 = vmul.f32 %v7731_v62, %v1824_v52  ;;  %v1858_v23 = vmul.f32 %v7688_v22, %v1834_v50 }
 0x261   : > { %2541 = vrot.lane.b32.xlu1 %v6928_v5, %s6600_s20  ;;  %5866 = vmatpush1.bf16.msra.mxu1 %v5865_v12  ;;  %v5869_v5 = vpack.c.bf16 %v1623_v3, %v1621_v21  ;;  %v1857_v1 = vmul.f32 %v7731_v62, %v1826_v58 }
 0x262   : > { %5868 = vmatprep.subr.bf16.mxu1 %v5867_v4  ;;  %v7690_v34 = vpop.permute.xlu0 %1799  ;;  %1498 = vmatprep.mubr.f32.mxu1 %v6592_v0  ;;  %v5877_v14 = vpack.c.bf16 %v1855_v29, %v1853_v42  ;;  %v5555_v29 = vld [vmem:[%s9743_s4 + $0xf0] sm:$0xff] }
 0x263   : > { %v1814_v26 = vpop.permute.xlu1 %1813 }
 0x264   : > { %5543 = vmatmul.mubr.msk.f32.gmra.mrb[4].mxu1 %vm796_vm2, %v5535_v33  ;;  %v1835_v16 = vsel %vm1823_vm6, %v1814_v26, %v7665_v63  ;;  %v1827_v59 = vsel %vm1823_vm6, %v7665_v63, %v1814_v26  ;;  %v2081_v33 = vld [vmem:[#allocation2 + $0xc] sm:$0x3]  ;;  %v5551_v26 = vld [vmem:[%s9743_s4 + $0xd0] sm:$0xff] }
 0x265   : > { %5870 = vmatpush1.bf16.msra.mxu1 %v5869_v5  ;;  %1504 = vmatprep.mubr.f32.mxu1 %v6592_v0  ;;  %v1860_v51 = vmul.f32 %v7688_v22, %v1835_v16  ;;  %v1859_v44 = vmul.f32 %v7731_v62, %v1827_v59  ;;  %v7818_v11 = vrot.slane %v2081_v33, %v7016_v9  ;;  %v5554_v16 = vld [vmem:[%s9743_s4 + $0xe8] sm:$0xff] }
 0x266   : > { %5872 = vmatprep.subr.bf16.mxu1 %v5871_v15  ;;  %v1816_v32 = vpop.permute.xlu0 %1815  ;;  %v7860_v42 = vrot.slane %v2081_v33, %v7018_v10  ;;  %v5566_v33 = vld [vmem:[%s9743_s4 + $0x148] sm:$0xff] }
 0x267   : > { %v1802_v38 = vpop.permute.xlu1 %1801  ;;  %v1836_v2 = vsel %vm1823_vm6, %v1816_v32, %v7690_v34  ;;  %v5879_v40 = vpack.c.bf16 %v1860_v51, %v1858_v23  ;;  %v1828_v63 = vsel %vm1823_vm6, %v7690_v34, %v1816_v32  ;;  %v5881_v4 = vpack.c.bf16 %v1859_v44, %v1857_v1 }
 0x268   : > { %5544 = vmatmul.mubr.msk.f32.gmra.mrb[6].mxu1 %vm796_vm2, %v5536_v20  ;;  %v1862_v49 = vmul.f32 %v7688_v22, %v1836_v2  ;;  %v1861_v7 = vmul.f32 %v7731_v62, %v1828_v63 }
 0x269   : > { %5874 = vmatpush1.bf16.msra.mxu1 %v5873_v36  ;;  %1510 = vmatprep.mubr.f32.mxu1 %v6592_v0 }
 0x26a   : > { %5876 = vmatprep.subr.bf16.mxu1 %v5875_v41  ;;  %v7711_v13 = vpop.permute.xlu0 %1803 }
 0x26b   : > { %v1818_v47 = vpop.permute.xlu1 %1817 }
 0x26c   : > { %5545 = vmatmul.mubr.msk.f32.gmra.mrb[8].mxu1 %vm796_vm2, %v5537_v39  ;;  %v1837_v30 = vsel %vm1823_vm6, %v1818_v47, %v1802_v38  ;;  %v1829_v12 = vsel %vm1823_vm6, %v1802_v38, %v1818_v47 }
 0x26d   : > { %1516 = vmatprep.mubr.f32.mxu1 %v6592_v0  ;;  %v1864_v3 = vmul.f32 %v7688_v22, %v1837_v30  ;;  %v1863_v21 = vmul.f32 %v7731_v62, %v1829_v12  ;;  %v5565_v12 = vld [vmem:[%s9743_s4 + $0x140] sm:$0xff] }
 0x26e   : > { %v1820_v17 = vpop.permute.xlu0 %1819 }
 0x26f   : > { %v1806_v53 = vpop.permute.xlu1 %1805  ;;  %v1838_v56 = vsel %vm1823_vm6, %v1820_v17, %v7711_v13  ;;  %v5883_v5 = vpack.c.bf16 %v1864_v3, %v1862_v49  ;;  %v1830_v31 = vsel %vm1823_vm6, %v7711_v13, %v1820_v17  ;;  %v5885_v37 = vpack.c.bf16 %v1863_v21, %v1861_v7  ;;  %v5552_v13 = vld [vmem:[%s9743_s4 + $0xd8] sm:$0xff] }
 0x270   : > { %5546 = vmatmul.mubr.msk.f32.gmra.mrb[10].mxu1 %vm796_vm2, %v5538_v48  ;;  %v1866_v15 = vmul.f32 %v7688_v22, %v1838_v56  ;;  %v1865_v39 = vmul.f32 %v7731_v62, %v1830_v31 }
 0x271   : > { %1522 = vmatprep.mubr.f32.mxu1 %v6592_v0 }
 0x272   : > { %v7723_v54 = vpop.permute.xlu0 %2031 }
 0x273   : > { %v1822_v6 = vpop.permute.xlu1 %1821 }
 0x274   : > { %5547 = vmatmul.mubr.msk.f32.gmra.mrb[12].mxu1 %vm796_vm2, %v5539_v46  ;;  %v1839_v43 = vsel %vm1823_vm6, %v1822_v6, %v1806_v53  ;;  %v1831_v24 = vsel %vm1823_vm6, %v1806_v53, %v1822_v6  ;;  %v5553_v6 = vld [vmem:[%s9743_s4 + $0xe0] sm:$0xff] }
 0x275   : > { %1528 = vmatprep.mubr.f32.mxu1 %v6592_v0  ;;  %v1868_v34 = vmul.f32 %v7688_v22, %v1839_v43  ;;  %v1867_v32 = vmul.f32 %v7731_v62, %v1831_v24 }
 0x276   : > { %v7744_v60 = vpop.permute.xlu0 %2047 }
 0x277   : > { %v7751_v27 = vpop.permute.xlu1 %2033  ;;  %v2072_v36 = vsel %vm2063_vm7, %v7744_v60, %v7723_v54  ;;  %v5887_v22 = vpack.c.bf16 %v1868_v34, %v1866_v15  ;;  %v5889_v17 = vpack.c.bf16 %v1867_v32, %v1865_v39  ;;  %v2064_v58 = vsel %vm2063_vm7, %v7723_v54, %v7744_v60 }
 0x278   : > { %5548 = vmatmul.mubr.msk.f32.gmra.mrb[14].mxu1 %vm796_vm2, %v5540_v19  ;;  %v2094_v47 = vmul.f32 %v7818_v11, %v2072_v36  ;;  %v2093_v54 = vmul.f32 %v7860_v42, %v2064_v58 }
 0x279   : > { %1726 = vmatprep.mubr.f32.mxu1 %v6592_v0 }
 0x27a   : > { %v7770_v45 = vpop.permute.xlu0 %2035 }
 0x27b   : > { %v7776_v61 = vpop.permute.xlu1 %2049 }
 0x27c   : > { %5557 = vmatmul.mubr.msk.f32.vlgmr.msra.gmra.mrb[0].mxu1 %vm796_vm2, %v5549_v57  ;;  %v2073_v28 = vsel %vm2063_vm7, %v7776_v61, %v7751_v27  ;;  %v2065_v51 = vsel %vm2063_vm7, %v7751_v27, %v7776_v61  ;;  %v5556_v57 = vld [vmem:[%s9743_s4 + $0xf8] sm:$0xff] }
 0x27d   : > { %5878 = vmatpush1.bf16.msra.mxu1 %v5877_v14  ;;  %1732 = vmatprep.mubr.f32.mxu1 %v6592_v0  ;;  %v2096_v41 = vmul.f32 %v7818_v11, %v2073_v28  ;;  %v2095_v23 = vmul.f32 %v7860_v42, %v2065_v51 }
 0x27e   : > { %5880 = vmatprep.subr.bf16.mxu1 %v5879_v40  ;;  %v7793_v55 = vpop.permute.xlu0 %2051 }
 0x27f   : > { %v2038_v35 = vpop.permute.xlu1 %2037  ;;  %v5891_v46 = vpack.c.bf16 %v2096_v41, %v2094_v47  ;;  %v2074_v14 = vsel %vm2063_vm7, %v7793_v55, %v7770_v45  ;;  %v2066_v3 = vsel %vm2063_vm7, %v7770_v45, %v7793_v55  ;;  %v5893_v43 = vpack.c.bf16 %v2095_v23, %v2093_v54  ;;  %v5571_v23 = vld [vmem:[%s9743_s4 + $0x170] sm:$0xff] }
 0x280   : > { %5558 = vmatmul.mubr.msk.f32.gmra.mrb[2].mxu1 %vm796_vm2, %v5550_v25  ;;  %v2098_v40 = vmul.f32 %v7818_v11, %v2074_v14  ;;  %v2097_v55 = vmul.f32 %v7860_v42, %v2066_v3 }
 0x281   : > { %5882 = vmatpush1.bf16.msra.mxu1 %v5881_v4  ;;  %1738 = vmatprep.mubr.f32.mxu1 %v6592_v0 }
 0x282   : > { %5884 = vmatprep.subr.bf16.mxu1 %v5883_v5  ;;  %v7820_v20 = vpop.permute.xlu0 %2039 }
 0x283   : > { %v2054_v38 = vpop.permute.xlu1 %2053 }
 0x284   : > { %5559 = vmatmul.mubr.msk.f32.gmra.mrb[4].mxu1 %vm796_vm2, %v5551_v26  ;;  %v2075_v30 = vsel %vm2063_vm7, %v2054_v38, %v2038_v35  ;;  %v2067_v2 = vsel %vm2063_vm7, %v2038_v35, %v2054_v38  ;;  %v2321_v26 = vld [vmem:[#allocation2 + $0xe] sm:$0x3]  ;;  %v5567_v38 = vld [vmem:[%s9743_s4 + $0x150] sm:$0xff] }
 0x285   : > { %5886 = vmatpush1.bf16.msra.mxu1 %v5885_v37  ;;  %1744 = vmatprep.mubr.f32.mxu1 %v6592_v0  ;;  %v2100_v61 = vmul.f32 %v7818_v11, %v2075_v30  ;;  %v2099_v25 = vmul.f32 %v7860_v42, %v2067_v2  ;;  %v7945_v39 = vrot.slane %v2321_v26, %v7016_v9  ;;  %v5570_v30 = vld [vmem:[%s9743_s4 + $0x168] sm:$0xff] }
 0x286   : > { %5888 = vmatprep.subr.bf16.mxu1 %v5887_v22  ;;  %v2056_v48 = vpop.permute.xlu0 %2055  ;;  %v2326_v54 = vrot.slane %v2321_v26, %v7018_v10 }
 0x287   : > { %v2042_v53 = vpop.permute.xlu1 %2041  ;;  %v2076_v63 = vsel %vm2063_vm7, %v2056_v48, %v7820_v20  ;;  %v5895_v45 = vpack.c.bf16 %v2100_v61, %v2098_v40  ;;  %v2068_v35 = vsel %vm2063_vm7, %v7820_v20, %v2056_v48  ;;  %v5897_v5 = vpack.c.bf16 %v2099_v25, %v2097_v55 }
 0x288   : > { %5560 = vmatmul.mubr.msk.f32.gmra.mrb[6].mxu1 %vm796_vm2, %v5552_v13  ;;  %v2102_v24 = vmul.f32 %v7818_v11, %v2076_v63  ;;  %v2101_v32 = vmul.f32 %v7860_v42, %v2068_v35 }
 0x289   : > { %5890 = vmatpush1.bf16.msra.mxu1 %v5889_v17  ;;  %1750 = vmatprep.mubr.f32.mxu1 %v6592_v0 }
 0x28a   : > { %5892 = vmatprep.subr.bf16.mxu1 %v5891_v46  ;;  %v7840_v18 = vpop.permute.xlu0 %2043 }
 0x28b   : > { %v2058_v62 = vpop.permute.xlu1 %2057 }
 0x28c   : > { %5561 = vmatmul.mubr.msk.f32.gmra.mrb[8].mxu1 %vm796_vm2, %v5553_v6  ;;  %v2077_v60 = vsel %vm2063_vm7, %v2058_v62, %v2042_v53  ;;  %v2069_v4 = vsel %vm2063_vm7, %v2042_v53, %v2058_v62 }
 0x28d   : > { %1756 = vmatprep.mubr.f32.mxu1 %v6592_v0  ;;  %v2104_v21 = vmul.f32 %v7818_v11, %v2077_v60  ;;  %v2103_v7 = vmul.f32 %v7860_v42, %v2069_v4 }
 0x28e   : > { %v2060_v19 = vpop.permute.xlu0 %2059 }
 0x28f   : > { %v2046_v52 = vpop.permute.xlu1 %2045  ;;  %v2078_v28 = vsel %vm2063_vm7, %v2060_v19, %v7840_v18  ;;  %v5899_v37 = vpack.c.bf16 %v2104_v21, %v2102_v24  ;;  %v2070_v41 = vsel %vm2063_vm7, %v7840_v18, %v2060_v19  ;;  %v5901_v47 = vpack.c.bf16 %v2103_v7, %v2101_v32  ;;  %v5568_v18 = vld [vmem:[%s9743_s4 + $0x158] sm:$0xff] }
 0x290   : > { %5562 = vmatmul.mubr.msk.f32.gmra.mrb[10].mxu1 %vm796_vm2, %v5554_v16  ;;  %v2106_v22 = vmul.f32 %v7818_v11, %v2078_v28  ;;  %v2105_v6 = vmul.f32 %v7860_v42, %v2070_v41 }
 0x291   : > { %1762 = vmatprep.mubr.f32.mxu1 %v6592_v0 }
 0x292   : > { %v7852_v50 = vpop.permute.xlu0 %2271 }
 0x293   : > { %v2062_v59 = vpop.permute.xlu1 %2061 }
 0x294   : > { %5563 = vmatmul.mubr.msk.f32.gmra.mrb[12].mxu1 %vm796_vm2, %v5555_v29  ;;  %v2079_v56 = vsel %vm2063_vm7, %v2062_v59, %v2046_v52  ;;  %v2071_v15 = vsel %vm2063_vm7, %v2046_v52, %v2062_v59  ;;  %v5569_v59 = vld [vmem:[%s9743_s4 + $0x160] sm:$0xff] }
 0x295   : > { %1768 = vmatprep.mubr.f32.mxu1 %v6592_v0  ;;  %v2108_v20 = vmul.f32 %v7818_v11, %v2079_v56  ;;  %v2107_v48 = vmul.f32 %v7860_v42, %v2071_v15 }
 0x296   : > { %v7872_v27 = vpop.permute.xlu0 %2287 }
 0x297   : > { %v7879_v44 = vpop.permute.xlu1 %2273  ;;  %v2312_v17 = vsel %vm2303_vm8, %v7872_v27, %v7852_v50  ;;  %v5903_v11 = vpack.c.bf16 %v2108_v20, %v2106_v22  ;;  %v5905_v19 = vpack.c.bf16 %v2107_v48, %v2105_v6  ;;  %v2304_v3 = vsel %vm2303_vm8, %v7852_v50, %v7872_v27  ;;  %v5581_v27 = vld [vmem:[%s9743_s4 + $0x180] sm:$0xff] }
 0x298   : > { %5564 = vmatmul.mubr.msk.f32.gmra.mrb[14].mxu1 %vm796_vm2, %v5556_v57  ;;  %v2334_v62 = vmul.f32 %v7945_v39, %v2312_v17  ;;  %v2333_v4 = vmul.f32 %v2326_v54, %v2304_v3  ;;  %v5583_v17 = vld [vmem:[%s9743_s4 + $0x190] sm:$0xff] }
 0x299   : > { %1966 = vmatprep.mubr.f32.mxu1 %v6592_v0 }
 0x29a   : > { %v7897_v1 = vpop.permute.xlu0 %2275 }
 0x29b   : > { %v7903_v49 = vpop.permute.xlu1 %2289 }
 0x29c   : > { %5573 = vmatmul.mubr.msk.f32.vlgmr.msra.gmra.mrb[0].mxu1 %vm796_vm2, %v5565_v12  ;;  %v2313_v36 = vsel %vm2303_vm8, %v7903_v49, %v7879_v44  ;;  %v2305_v61 = vsel %vm2303_vm8, %v7879_v44, %v7903_v49  ;;  %v5572_v12 = vld [vmem:[%s9743_s4 + $0x178] sm:$0xff] }
 0x29d   : > { %5894 = vmatpush1.bf16.msra.mxu1 %v5893_v43  ;;  %1972 = vmatprep.mubr.f32.mxu1 %v6592_v0  ;;  %v2336_v46 = vmul.f32 %v7945_v39, %v2313_v36  ;;  %v2335_v40 = vmul.f32 %v2326_v54, %v2305_v61  ;;  %v2561_v36 = vld [vmem:[#allocation2 + $0x10] sm:$0x3] }
 0x29e   : > { %5896 = vmatprep.subr.bf16.mxu1 %v5895_v45  ;;  %v7920_v34 = vpop.permute.xlu0 %2291 }
 0x29f   : > { %v2278_v31 = vpop.permute.xlu1 %2277  ;;  %v5907_v29 = vpack.c.bf16 %v2336_v46, %v2334_v62  ;;  %v2314_v44 = vsel %vm2303_vm8, %v7920_v34, %v7897_v1  ;;  %v2306_v21 = vsel %vm2303_vm8, %v7897_v1, %v7920_v34  ;;  %v5909_v55 = vpack.c.bf16 %v2335_v40, %v2333_v4  ;;  %v5582_v34 = vld [vmem:[%s9743_s4 + $0x188] sm:$0xff] }
 0x2a0   : > { %5574 = vmatmul.mubr.msk.f32.gmra.mrb[2].mxu1 %vm796_vm2, %v5566_v33  ;;  %v2338_v45 = vmul.f32 %v7945_v39, %v2314_v44  ;;  %v2337_v28 = vmul.f32 %v2326_v54, %v2306_v21  ;;  %v2566_v40 = vrot.slane %v2561_v36, %v7018_v10 }
 0x2a1   : > { %5898 = vmatpush1.bf16.msra.mxu1 %v5897_v5  ;;  %1978 = vmatprep.mubr.f32.mxu1 %v6592_v0 }
 0x2a2   : > { %5900 = vmatprep.subr.bf16.mxu1 %v5899_v37  ;;  %v7947_v13 = vpop.permute.xlu0 %2279 }
 0x2a3   : > { %v2294_v53 = vpop.permute.xlu1 %2293 }
 0x2a4   : > { %5575 = vmatmul.mubr.msk.f32.gmra.mrb[4].mxu1 %vm796_vm2, %v5567_v38  ;;  %v2315_v60 = vsel %vm2303_vm8, %v2294_v53, %v2278_v31  ;;  %v2307_v25 = vsel %vm2303_vm8, %v2278_v31, %v2294_v53 }
 0x2a5   : > { %5902 = vmatpush1.bf16.msra.mxu1 %v5901_v47  ;;  %1984 = vmatprep.mubr.f32.mxu1 %v6592_v0  ;;  %v2340_v63 = vmul.f32 %v7945_v39, %v2315_v60  ;;  %v2339_v56 = vmul.f32 %v2326_v54, %v2307_v25  ;;  %v5587_v60 = vld [vmem:[%s9743_s4 + $0x1b0] sm:$0xff]  ;;  %v5588_v25 = vld [vmem:[%s9743_s4 + $0x1b8] sm:$0xff] }
 0x2a6   : > { %5904 = vmatprep.subr.bf16.mxu1 %v5903_v11  ;;  %v2296_v16 = vpop.permute.xlu0 %2295  ;;  %v8062_v11 = vrot.slane %v2561_v36, %v7016_v9 }
 0x2a7   : > { %v2282_v52 = vpop.permute.xlu1 %2281  ;;  %v2316_v33 = vsel %vm2303_vm8, %v2296_v16, %v7947_v13  ;;  %v5911_v7 = vpack.c.bf16 %v2340_v63, %v2338_v45  ;;  %v2308_v26 = vsel %vm2303_vm8, %v7947_v13, %v2296_v16  ;;  %v5913_v20 = vpack.c.bf16 %v2339_v56, %v2337_v28 }
 0x2a8   : > { %5576 = vmatmul.mubr.msk.f32.gmra.mrb[6].mxu1 %vm796_vm2, %v5568_v18  ;;  %v2342_v31 = vmul.f32 %v7945_v39, %v2316_v33  ;;  %v2341_v47 = vmul.f32 %v2326_v54, %v2308_v26 }
 0x2a9   : > { %5906 = vmatpush1.bf16.msra.mxu1 %v5905_v19  ;;  %1990 = vmatprep.mubr.f32.mxu1 %v6592_v0 }
 0x2aa   : > { %5908 = vmatprep.subr.bf16.mxu1 %v5907_v29  ;;  %v7967_v51 = vpop.permute.xlu0 %2283 }
 0x2ab   : > { %v2298_v42 = vpop.permute.xlu1 %2297 }
 0x2ac   : > { %5577 = vmatmul.mubr.msk.f32.gmra.mrb[8].mxu1 %vm796_vm2, %v5569_v59  ;;  %v2317_v50 = vsel %vm2303_vm8, %v2298_v42, %v2282_v52  ;;  %v2309_v24 = vsel %vm2303_vm8, %v2282_v52, %v2298_v42 }
 0x2ad   : > { %1996 = vmatprep.mubr.f32.mxu1 %v6592_v0  ;;  %v2344_v5 = vmul.f32 %v7945_v39, %v2317_v50  ;;  %v2343_v37 = vmul.f32 %v2326_v54, %v2309_v24 }
 0x2ae   : > { %v2300_v57 = vpop.permute.xlu0 %2299 }
 0x2af   : > { %v2286_v58 = vpop.permute.xlu1 %2285  ;;  %v2318_v32 = vsel %vm2303_vm8, %v2300_v57, %v7967_v51  ;;  %v5915_v13 = vpack.c.bf16 %v2344_v5, %v2342_v31  ;;  %v2310_v53 = vsel %vm2303_vm8, %v7967_v51, %v2300_v57  ;;  %v5917_v6 = vpack.c.bf16 %v2343_v37, %v2341_v47 }
 0x2b0   : > { %5578 = vmatmul.mubr.msk.f32.gmra.mrb[10].mxu1 %vm796_vm2, %v5570_v30  ;;  %v2346_v46 = vmul.f32 %v7945_v39, %v2318_v32  ;;  %v2345_v59 = vmul.f32 %v2326_v54, %v2310_v53 }
 0x2b1   : > { %2002 = vmatprep.mubr.f32.mxu1 %v6592_v0 }
 0x2b2   : > { %v7979_v14 = vpop.permute.xlu0 %2511 }
 0x2b3   : > { %v2302_v2 = vpop.permute.xlu1 %2301 }
 0x2b4   : > { %5579 = vmatmul.mubr.msk.f32.gmra.mrb[12].mxu1 %vm796_vm2, %v5571_v23  ;;  %v2319_v1 = vsel %vm2303_vm8, %v2302_v2, %v2286_v58  ;;  %v2311_v41 = vsel %vm2303_vm8, %v2286_v58, %v2302_v2  ;;  %v5585_v58 = vld [vmem:[%s9743_s4 + $0x1a0] sm:$0xff]  ;;  %v5586_v2 = vld [vmem:[%s9743_s4 + $0x1a8] sm:$0xff] }
 0x2b5   : > { %2008 = vmatprep.mubr.f32.mxu1 %v6592_v0  ;;  %v2348_v22 = vmul.f32 %v7945_v39, %v2319_v1  ;;  %v2347_v18 = vmul.f32 %v2326_v54, %v2311_v41  ;;  %v5584_v39 = vld [vmem:[%s9743_s4 + $0x198] sm:$0xff] }
 0x2b6   : > { %v8006_v49 = vpop.permute.xlu0 %2527 }
 0x2b7   : > { %v8001_v43 = vpop.permute.xlu1 %2513  ;;  %v2552_v62 = vsel %vm2543_vm9, %v8006_v49, %v7979_v14  ;;  %v5919_v29 = vpack.c.bf16 %v2348_v22, %v2346_v46  ;;  %v5921_v42 = vpack.c.bf16 %v2347_v18, %v2345_v59  ;;  %v2544_v63 = vsel %vm2543_vm9, %v7979_v14, %v8006_v49  ;;  %v5597_v14 = vld [vmem:[%s9743_s4 + $0x1c0] sm:$0xff]  ;;  %v5604_v59 = vld [vmem:[%s9743_s4 + $0x1f8] sm:$0xff] }
 0x2b8   : > { %5580 = vmatmul.mubr.msk.f32.gmra.mrb[14].mxu1 %vm796_vm2, %v5572_v12  ;;  %v2574_v51 = vmul.f32 %v8062_v11, %v2552_v62  ;;  %v2573_v45 = vmul.f32 %v2566_v40, %v2544_v63 }
 0x2b9   : > { %2206 = vmatprep.mubr.f32.mxu1 %v6592_v0 }
 0x2ba   : > { %v8039_v15 = vpop.permute.xlu0 %2515 }
 0x2bb   : > { %v8023_v35 = vpop.permute.xlu1 %2529 }
 0x2bc   : > { %5589 = vmatmul.mubr.msk.f32.vlgmr.msra.gmra.mrb[0].mxu1 %vm796_vm2, %v5581_v27  ;;  %v2553_v48 = vsel %vm2543_vm9, %v8023_v35, %v8001_v43  ;;  %v2545_v12 = vsel %vm2543_vm9, %v8001_v43, %v8023_v35 }
 0x2bd   : > { %5910 = vmatpush1.bf16.msra.mxu1 %v5909_v55  ;;  %2212 = vmatprep.mubr.f32.mxu1 %v6592_v0  ;;  %v2576_v19 = vmul.f32 %v8062_v11, %v2553_v48  ;;  %v2575_v4 = vmul.f32 %v2566_v40, %v2545_v12  ;;  %v5599_v48 = vld [vmem:[%s9743_s4 + $0x1d0] sm:$0xff]  ;;  %v2789_v12 = vld [vmem:[#allocation6 + $0x10] sm:$0xff] }
 0x2be   : > { %5912 = vmatprep.subr.bf16.mxu1 %v5911_v7  ;;  %v2532_v52 = vpop.permute.xlu0 %2531 }
 0x2bf   : > { %v2518_v38 = vpop.permute.xlu1 %2517  ;;  %v5923_v57 = vpack.c.bf16 %v2576_v19, %v2574_v51  ;;  %v2554_v50 = vsel %vm2543_vm9, %v2532_v52, %v8039_v15  ;;  %v2546_v49 = vsel %vm2543_vm9, %v8039_v15, %v2532_v52  ;;  %v5925_v35 = vpack.c.bf16 %v2575_v4, %v2573_v45  ;;  %v5598_v15 = vld [vmem:[%s9743_s4 + $0x1c8] sm:$0xff] }
 0x2c0   : > { %5590 = vmatmul.mubr.msk.f32.gmra.mrb[2].mxu1 %vm796_vm2, %v5582_v34  ;;  %v2578_v56 = vmul.f32 %v8062_v11, %v2554_v50  ;;  %v2577_v26 = vmul.f32 %v2566_v40, %v2546_v49  ;;  %v5602_v52 = vld [vmem:[%s9743_s4 + $0x1e8] sm:$0xff] }
 0x2c1   : > { %5914 = vmatpush1.bf16.msra.mxu1 %v5913_v20  ;;  %2218 = vmatprep.mubr.f32.mxu1 %v6592_v0  ;;  %v5614_v51 = vld [vmem:[%s9743_s4 + $0x208] sm:$0xff] }
 0x2c2   : > { %5916 = vmatprep.subr.bf16.mxu1 %v5915_v13  ;;  %v2520_v23 = vpop.permute.xlu0 %2519 }
 0x2c3   : > { %v2534_v16 = vpop.permute.xlu1 %2533 }
 0x2c4   : > { %5591 = vmatmul.mubr.msk.f32.gmra.mrb[4].mxu1 %vm796_vm2, %v5583_v17  ;;  %v2555_v44 = vsel %vm2543_vm9, %v2534_v16, %v2518_v38  ;;  %v2547_v27 = vsel %vm2543_vm9, %v2518_v38, %v2534_v16  ;;  %v5600_v16 = vld [vmem:[%s9743_s4 + $0x1d8] sm:$0xff] }
 0x2c5   : > { %5918 = vmatpush1.bf16.msra.mxu1 %v5917_v6  ;;  %2224 = vmatprep.mubr.f32.mxu1 %v6592_v0  ;;  %v2580_v21 = vmul.f32 %v8062_v11, %v2555_v44  ;;  %v2579_v24 = vmul.f32 %v2566_v40, %v2547_v27 }
 0x2c6   : > { %5920 = vmatprep.subr.bf16.mxu1 %v5919_v29  ;;  %v2536_v54 = vpop.permute.xlu0 %2535  ;;  %v5603_v29 = vld [vmem:[%s9743_s4 + $0x1f0] sm:$0xff] }
 0x2c7   : > { %v2522_v30 = vpop.permute.xlu1 %2521  ;;  %v2556_v5 = vsel %vm2543_vm9, %v2536_v54, %v2520_v23  ;;  %v5927_v34 = vpack.c.bf16 %v2580_v21, %v2578_v56  ;;  %v2548_v20 = vsel %vm2543_vm9, %v2520_v23, %v2536_v54  ;;  %v5929_v32 = vpack.c.bf16 %v2579_v24, %v2577_v26  ;;  %v5619_v23 = vld [vmem:[%s9743_s4 + $0x230] sm:$0xff]  ;;  %v2788_v54 = vld [vmem:[#allocation6 + $0x8] sm:$0xff] }
 0x2c8   : > { %5592 = vmatmul.mubr.msk.f32.gmra.mrb[6].mxu1 %vm796_vm2, %v5584_v39  ;;  %v2582_v37 = vmul.f32 %v8062_v11, %v2556_v5  ;;  %v2581_v47 = vmul.f32 %v2566_v40, %v2548_v20  ;;  %v5613_v39 = vld [vmem:[%s9743_s4 + $0x200] sm:$0xff] }
 0x2c9   : > { %5922 = vmatpush1.bf16.msra.mxu1 %v5921_v42  ;;  %2230 = vmatprep.mubr.f32.mxu1 %v6592_v0  ;;  %v5615_v42 = vld [vmem:[%s9743_s4 + $0x210] sm:$0xff] }
 0x2ca   : > { %5924 = vmatprep.subr.bf16.mxu1 %v5923_v57  ;;  %v2524_v43 = vpop.permute.xlu0 %2523  ;;  %v5617_v57 = vld [vmem:[%s9743_s4 + $0x220] sm:$0xff] }
 0x2cb   : > { %v2538_v61 = vpop.permute.xlu1 %2537 }
 0x2cc   : > { %5593 = vmatmul.mubr.msk.f32.gmra.mrb[8].mxu1 %vm796_vm2, %v5585_v58  ;;  %v2557_v55 = vsel %vm2543_vm9, %v2538_v61, %v2522_v30  ;;  %v2549_v7 = vsel %vm2543_vm9, %v2522_v30, %v2538_v61  ;;  %v5616_v30 = vld [vmem:[%s9743_s4 + $0x218] sm:$0xff]  ;;  %v5618_v58 = vld [vmem:[%s9743_s4 + $0x228] sm:$0xff] }
 0x2cd   : > { %2236 = vmatprep.mubr.f32.mxu1 %v6592_v0  ;;  %v2584_v28 = vmul.f32 %v8062_v11, %v2557_v55  ;;  %v2583_v36 = vmul.f32 %v2566_v40, %v2549_v7  ;;  %v2787_v61 = vld [vmem:[#allocation6] sm:$0xff] }
 0x2ce   : > { %v2540_v1 = vpop.permute.xlu0 %2539 }
 0x2cf   : > { %v2526_v3 = vpop.permute.xlu1 %2525  ;;  %v2558_v38 = vsel %vm2543_vm9, %v2540_v1, %v2524_v43  ;;  %v5931_v13 = vpack.c.bf16 %v2584_v28, %v2582_v37  ;;  %v2550_v17 = vsel %vm2543_vm9, %v2524_v43, %v2540_v1  ;;  %v5933_v46 = vpack.c.bf16 %v2583_v36, %v2581_v47 }
 0x2d0   : > { %5594 = vmatmul.mubr.msk.f32.gmra.mrb[10].mxu1 %vm796_vm2, %v5586_v2  ;;  %v2586_v53 = vmul.f32 %v8062_v11, %v2558_v38  ;;  %v2585_v62 = vmul.f32 %v2566_v40, %v2550_v17  ;;  %v5620_v2 = vld [vmem:[%s9743_s4 + $0x238] sm:$0xff] }
 0x2d1   : > { %2242 = vmatprep.mubr.f32.mxu1 %v6592_v0 }
 0x2d3   : > { %v2542_v33 = vpop.permute.xlu1 %2541 }
 0x2d4   : > { %5595 = vmatmul.mubr.msk.f32.gmra.mrb[12].mxu1 %vm796_vm2, %v5587_v60  ;;  %v2559_v31 = vsel %vm2543_vm9, %v2542_v33, %v2526_v3  ;;  %v2551_v41 = vsel %vm2543_vm9, %v2526_v3, %v2542_v33  ;;  %v6601_v60 = vmov 0   ;;  %v2790_v3 = vld [vmem:[#allocation6 + $0x18] sm:$0xff] }
 0x2d5   : > { %2248 = vmatprep.mubr.f32.mxu1 %v6592_v0  ;;  %v2588_v22 = vmul.f32 %v8062_v11, %v2559_v31  ;;  %v2587_v6 = vmul.f32 %v2566_v40, %v2551_v41  ;;  %v5601_v11 = vld [vmem:[%s9743_s4 + $0x1e0] sm:$0xff]  ;;  %6450 = vset.pattern.permute.xlu0 %v6601_v60 }
 0x2d6   : > { %6451 = vset.pattern.permute.xlu1 %v6601_v60  ;;  %2793 = vperm.xlu0 %6450, %v2787_v61   ;;  %v2784_v60 = vld [vmem:[#allocation4 + $0x8] sm:$0xff] }
 0x2d7   : > { %v5935_v18 = vpack.c.bf16 %v2588_v22, %v2586_v53  ;;  %v5937_v19 = vpack.c.bf16 %v2587_v6, %v2585_v62  ;;  %2798 = vperm.xlu1 %6451, %v2788_v54   ;;  %v2783_v54 = vld [vmem:[#allocation4] sm:$0xff] }
 0x2d8   : > { %5596 = vmatmul.mubr.msk.f32.gmra.mrb[14].mxu1 %vm796_vm2, %v5588_v25 }
 0x2d9   : > { %2446 = vmatprep.mubr.f32.mxu1 %v6592_v0 }
 0x2da   : > { %2808 = vperm.xlu0 %6450, %v2790_v3   ;;  %v2786_v3 = vld [vmem:[#allocation4 + $0x18] sm:$0xff] }
 0x2db   : > { %2803 = vperm.xlu1 %6451, %v2789_v12   ;;  %v2785_v12 = vld [vmem:[#allocation4 + $0x10] sm:$0xff] }
 0x2dc   : > { %5605 = vmatmul.mubr.msk.f32.vlgmr.msra.gmra.mrb[0].mxu1 %vm796_vm2, %v5597_v14 }
 0x2dd   : > { %5926 = vmatpush1.bf16.msra.mxu1 %v5925_v35  ;;  %2452 = vmatprep.mubr.f32.mxu1 %v6592_v0 }
 0x2de   : > { %5928 = vmatprep.subr.bf16.mxu1 %v5927_v34 }
 0x2e0   : > { %5606 = vmatmul.mubr.msk.f32.gmra.mrb[2].mxu1 %vm796_vm2, %v5598_v15 }
 0x2e1   : > { %5930 = vmatpush1.bf16.msra.mxu1 %v5929_v32  ;;  %2458 = vmatprep.mubr.f32.mxu1 %v6592_v0 }
 0x2e2   : > { %5932 = vmatprep.subr.bf16.mxu1 %v5931_v13 }
 0x2e4   : > { %5607 = vmatmul.mubr.msk.f32.gmra.mrb[4].mxu1 %vm796_vm2, %v5599_v48 }
 0x2e5   : > { %5934 = vmatpush1.bf16.msra.mxu1 %v5933_v46  ;;  %2464 = vmatprep.mubr.f32.mxu1 %v6592_v0 }
 0x2e6   : > { %5936 = vmatprep.subr.bf16.mxu1 %v5935_v18 }
 0x2e8   : > { %5608 = vmatmul.mubr.msk.f32.gmra.mrb[6].mxu1 %vm796_vm2, %v5600_v16 }
 0x2e9   : > { %5938 = vmatpush1.bf16.msra.mxu1 %v5937_v19  ;;  %2470 = vmatprep.mubr.f32.mxu1 %v6592_v0 }
 0x2ec   : > { %5609 = vmatmul.mubr.msk.f32.gmra.mrb[8].mxu1 %vm796_vm2, %v5601_v11 }
 0x2ed   : > { %2476 = vmatprep.mubr.f32.mxu1 %v6592_v0 }
 0x2f0   : > { %5610 = vmatmul.mubr.msk.f32.gmra.mrb[10].mxu1 %vm796_vm2, %v5602_v52 }
 0x2f1   : > { %2482 = vmatprep.mubr.f32.mxu1 %v6592_v0 }
 0x2f4   : > { %5611 = vmatmul.mubr.msk.f32.gmra.mrb[12].mxu1 %vm796_vm2, %v5603_v29 }
 0x2f5   : > { %2488 = vmatprep.mubr.f32.mxu1 %v6592_v0 }
 0x2f8   : > { %5612 = vmatmul.mubr.msk.f32.gmra.mrb[14].mxu1 %vm796_vm2, %v5604_v59 }
 0x2f9   : > { %2686 = vmatprep.mubr.f32.mxu1 %v6592_v0 }
 0x2fc   : > { %5621 = vmatmul.mubr.msk.f32.vlgmr.msra.gmra.mrb[0].mxu1 %vm796_vm2, %v5613_v39 }
 0x2fd   : > { %2692 = vmatprep.mubr.f32.mxu1 %v6592_v0 }
 0x300   : > { %5622 = vmatmul.mubr.msk.f32.gmra.mrb[2].mxu1 %vm796_vm2, %v5614_v51 }
 0x301   : > { %2698 = vmatprep.mubr.f32.mxu1 %v6592_v0 }
 0x304   : > { %5623 = vmatmul.mubr.msk.f32.gmra.mrb[4].mxu1 %vm796_vm2, %v5615_v42 }
 0x305   : > { %2704 = vmatprep.mubr.f32.mxu1 %v6592_v0 }
 0x308   : > { %5624 = vmatmul.mubr.msk.f32.gmra.mrb[6].mxu1 %vm796_vm2, %v5616_v30 }
 0x309   : > { %2710 = vmatprep.mubr.f32.mxu1 %v6592_v0 }
 0x30c   : > { %5625 = vmatmul.mubr.msk.f32.gmra.mrb[8].mxu1 %vm796_vm2, %v5617_v57 }
 0x30d   : > { %2716 = vmatprep.mubr.f32.mxu1 %v6592_v0 }
 0x310   : > { %5626 = vmatmul.mubr.msk.f32.gmra.mrb[10].mxu1 %vm796_vm2, %v5618_v58 }
 0x311   : > { %2722 = vmatprep.mubr.f32.mxu1 %v6592_v0 }
 0x314   : > { %5627 = vmatmul.mubr.msk.f32.gmra.mrb[12].mxu1 %vm796_vm2, %v5619_v23 }
 0x315   : > { %2728 = vmatprep.mubr.f32.mxu1 %v6592_v0 }
 0x318   : > { %5628 = vmatmul.mubr.msk.f32.gmra.mrb[14].mxu1 %vm796_vm2, %v5620_v2 }
 0x319   : > { %5087 = vmatprep.mubr.f32.mxu1 %v6592_v0 }
 0x3cf   : > { %v2688_v40 = vpop.f32.mrb[0].mxu1 }
 0x3d0   : > { %v2690_v44 = vpop.f32.mrb[1].mxu1  ;;  %v2751_v25 = vmax.f32 %v2688_v40, 0.0  ;;  %v2794_v40 = vpop.permute.xlu0 %2793 }
 0x3d1   : > { %v2752_v63 = vmax.f32 %v2690_v44, 0.0  ;;  %v506_v44 = vld [vmem:[%s8230_s30] sm:$0xff] }
 0x3d2   : > { %v2767_v21 = vmin.f32 %v2751_v25, 6.0 }
 0x3d3   : > { %v2694_v43 = vpop.f32.mrb[2].mxu1  ;;  %v2768_v55 = vmin.f32 %v2752_v63, 6.0  ;;  %v2799_v63 = vpop.permute.xlu1 %2798 }
 0x3d4   : > { %v2753_v4 = vmax.f32 %v2694_v43, 0.0  ;;  %v2696_v50 = vpop.f32.mrb[3].mxu1 }
 0x3d5   : > { %v2754_v27 = vmax.f32 %v2696_v50, 0.0 }
 0x3d6   : > { %v2769_v45 = vmin.f32 %v2753_v4, 6.0  ;;  %v507_v4 = vld [vmem:[%s8230_s30 + $0x8] sm:$0xff] }
 0x3d7   : > { %v2770_v14 = vmin.f32 %v2754_v27, 6.0  ;;  %v2700_v49 = vpop.f32.mrb[4].mxu1 }
 0x3d8   : > { %v5941_v56 = vpack.c.bf16 %v2769_v45, %v2767_v21  ;;  %v2702_v33 = vpop.f32.mrb[5].mxu1  ;;  %v2755_v24 = vmax.f32 %v2700_v49, 0.0 }
 0x3d9   : > { %v5939_v35 = vpack.c.bf16 %v2770_v14, %v2768_v55  ;;  %v2756_v5 = vmax.f32 %v2702_v33, 0.0  ;;  %v508_v55 = vld [vmem:[%s8230_s30 + $0x10] sm:$0xff] }
 0x3da   : > { %v2771_v26 = vmin.f32 %v2755_v24, 6.0  ;;  %v2804_v24 = vpop.permute.xlu1 %2803 }
 0x3db   : > { %v2706_v7 = vpop.f32.mrb[6].mxu1  ;;  %5940 = vmatprep.subr.bf16.mxu0 %v5939_v35  ;;  %v2772_v15 = vmin.f32 %v2756_v5, 6.0 }
 0x3dc   : > { %v2757_v28 = vmax.f32 %v2706_v7, 0.0  ;;  %v2708_v1 = vpop.f32.mrb[7].mxu1  ;;  %5942 = vmatpush1.bf16.msra.mxu0 %v5941_v56  ;;  %v509_v56 = vld [vmem:[%s8230_s30 + $0x18] sm:$0xff] }
 0x3dd   : > { %v2758_v34 = vmax.f32 %v2708_v1, 0.0 }
 0x3de   : > { %v2773_v31 = vmin.f32 %v2757_v28, 6.0  ;;  %v510_v28 = vld [vmem:[%s8230_s30 + $0x20] sm:$0xff] }
 0x3df   : > { %v2774_v20 = vmin.f32 %v2758_v34, 6.0  ;;  %v2712_v37 = vpop.f32.mrb[8].mxu1 }
 0x3e0   : > { %v5945_v32 = vpack.c.bf16 %v2773_v31, %v2771_v26  ;;  %v2714_v36 = vpop.f32.mrb[9].mxu1  ;;  %v2759_v41 = vmax.f32 %v2712_v37, 0.0  ;;  %v511_v31 = vld [vmem:[%s8230_s30 + $0x28] sm:$0xff] }
 0x3e1   : > { %v5943_v38 = vpack.c.bf16 %v2774_v20, %v2772_v15  ;;  %v2760_v22 = vmax.f32 %v2714_v36, 0.0  ;;  %v2809_v36 = vpop.permute.xlu0 %2808 }
 0x3e2   : > { %v2775_v53 = vmin.f32 %v2759_v41, 6.0  ;;  %v512_v41 = vld [vmem:[%s8230_s30 + $0x30] sm:$0xff] }
 0x3e3   : > { %v2718_v13 = vpop.f32.mrb[10].mxu1  ;;  %5944 = vmatprep.subr.bf16.mxu0 %v5943_v38  ;;  %v2776_v6 = vmin.f32 %v2760_v22, 6.0 }
 0x3e4   : > { %v2761_v47 = vmax.f32 %v2718_v13, 0.0  ;;  %v2720_v48 = vpop.f32.mrb[11].mxu1  ;;  %5946 = vmatpush1.bf16.msra.mxu0 %v5945_v32 }
 0x3e5   : > { %v2762_v17 = vmax.f32 %v2720_v48, 0.0 }
 0x3e6   : > { %v2777_v46 = vmin.f32 %v2761_v47, 6.0  ;;  %v513_v47 = vld [vmem:[%s8230_s30 + $0x38] sm:$0xff] }
 0x3e7   : > { %v2778_v18 = vmin.f32 %v2762_v17, 6.0  ;;  %v2724_v62 = vpop.f32.mrb[12].mxu1 }
 0x3e8   : > { %v5949_v16 = vpack.c.bf16 %v2777_v46, %v2775_v53  ;;  %v2726_v19 = vpop.f32.mrb[13].mxu1  ;;  %v2763_v52 = vmax.f32 %v2724_v62, 0.0  ;;  %v2936_v62 = vld [vmem:[%s9746_s7] sm:$0xff] }
 0x3e9   : > { %v5947_v11 = vpack.c.bf16 %v2778_v18, %v2776_v6  ;;  %v2764_v29 = vmax.f32 %v2726_v19, 0.0  ;;  %v2938_v19 = vld [vmem:[%s9746_s7 + $0x10] sm:$0xff] }
 0x3ea   : > { %v2779_v30 = vmin.f32 %v2763_v52, 6.0  ;;  %v2940_v52 = vld [vmem:[%s9746_s7 + $0x20] sm:$0xff] }
 0x3eb   : > { %v2730_v59 = vpop.f32.mrb[14].mxu1  ;;  %5948 = vmatprep.subr.bf16.mxu0 %v5947_v11  ;;  %v2780_v58 = vmin.f32 %v2764_v29, 6.0  ;;  %v2939_v11 = vld [vmem:[%s9746_s7 + $0x18] sm:$0xff]  ;;  %v2941_v29 = vld [vmem:[%s9746_s7 + $0x28] sm:$0xff] }
 0x3ec   : > { %v2765_v39 = vmax.f32 %v2730_v59, 0.0  ;;  %v2732_v51 = vpop.f32.mrb[15].mxu1  ;;  %5950 = vmatpush1.bf16.msra.mxu0 %v5949_v16  ;;  %v2937_v16 = vld [vmem:[%s9746_s7 + $0x8] sm:$0xff]  ;;  %v2942_v59 = vld [vmem:[%s9746_s7 + $0x30] sm:$0xff] }
 0x3ed   : > { %v2766_v42 = vmax.f32 %v2732_v51, 0.0 }
 0x3ee   : > { %v2781_v57 = vmin.f32 %v2765_v39, 6.0  ;;  %v2943_v39 = vld [vmem:[%s9746_s7 + $0x38] sm:$0xff] }
 0x3ef   : > { %v2782_v23 = vmin.f32 %v2766_v42, 6.0 }
 0x3f0   : > { %v5953_v2 = vpack.c.bf16 %v2781_v57, %v2779_v30 }
 0x3f1   : > { %v5951_v61 = vpack.c.bf16 %v2782_v23, %v2780_v58 }
 0x3f3   : > { %5952 = vmatprep.subr.bf16.mxu0 %v5951_v61 }
 0x3f4   : > { %5954 = vmatpush1.bf16.msra.mxu0 %v5953_v2 }
 0x3f7   : > { %5629 = vmatmul.mubr.msk.f32.vlgmr.msra.gmra.mrb[16].mxu0 %vm796_vm2, %v2783_v54 }
 0x3f8   : > { %2893 = vmatprep.mubr.f32.mxu0 %v6592_v0 }
 0x3fb   : > { %5630 = vmatmul.mubr.msk.f32.gmra.mrb[18].mxu0 %vm796_vm2, %v2784_v60 }
 0x3fc   : > { %2899 = vmatprep.mubr.f32.mxu0 %v6592_v0 }
 0x3ff   : > { %5631 = vmatmul.mubr.msk.f32.gmra.mrb[20].mxu0 %vm796_vm2, %v2785_v12 }
 0x400   : > { %2905 = vmatprep.mubr.f32.mxu0 %v6592_v0 }
 0x403   : > { %5632 = vmatmul.mubr.msk.f32.gmra.mrb[22].mxu0 %vm796_vm2, %v2786_v3 }
 0x404   : > { %3032 = vmatprep.mubr.f32.mxu0 %v6592_v0 }
 0x4ca   : > { %v2889_v25 = vpop.f32.mrb[16].mxu0 }
 0x4cb   : > { %v2890_v43 = vadd.f32 %v2889_v25, %v2794_v40  ;;  %v2891_v50 = vpop.f32.mrb[17].mxu0 }
 0x4cc   : > { %v2892_v27 = vadd.f32 %v2891_v50, %v2794_v40 }
 0x4cd   : > { %v2912_v21 = vadd.f32 %v2890_v43, %v506_v44 }
 0x4ce   : > { %v2913_v45 = vadd.f32 %v2892_v27, %v507_v4  ;;  %v2895_v14 = vpop.f32.mrb[18].mxu0 }
 0x4cf   : > { %2920 = vst [vmem:[%s8238_s21] sm:$0xff] %v2912_v21  ;;  %v2896_v49 = vadd.f32 %v2895_v14, %v2799_v63  ;;  %v2897_v33 = vpop.f32.mrb[19].mxu0 }
 0x4d0   : > { %2921 = vst [vmem:[%s8238_s21 + $0x8] sm:$0xff] %v2913_v45  ;;  %v2898_v35 = vadd.f32 %v2897_v33, %v2799_v63 }
 0x4d1   : > { %v2914_v5 = vadd.f32 %v2896_v49, %v508_v55 }
 0x4d2   : > { %v2915_v7 = vadd.f32 %v2898_v35, %v509_v56  ;;  %v2901_v1 = vpop.f32.mrb[20].mxu0 }
 0x4d3   : > { %2922 = vst [vmem:[%s8238_s21 + $0x10] sm:$0xff] %v2914_v5  ;;  %v5957_v34 = vpack.c.bf16 %v2914_v5, %v2912_v21  ;;  %v2902_v26 = vadd.f32 %v2901_v1, %v2804_v24  ;;  %v2903_v15 = vpop.f32.mrb[21].mxu0 }
 0x4d4   : > { %2923 = vst [vmem:[%s8238_s21 + $0x18] sm:$0xff] %v2915_v7  ;;  %v2904_v20 = vadd.f32 %v2903_v15, %v2804_v24  ;;  %v5955_v37 = vpack.c.bf16 %v2915_v7, %v2913_v45 }
 0x4d5   : > { %v2916_v32 = vadd.f32 %v2902_v26, %v510_v28 }
 0x4d6   : > { %v2917_v38 = vadd.f32 %v2904_v20, %v511_v31  ;;  %v2907_v22 = vpop.f32.mrb[22].mxu0  ;;  %5956 = vmatprep.subr.bf16.mxu0 %v5955_v37 }
 0x4d7   : > { %2924 = vst [vmem:[%s8238_s21 + $0x20] sm:$0xff] %v2916_v32  ;;  %v2908_v13 = vadd.f32 %v2907_v22, %v2809_v36  ;;  %v2909_v48 = vpop.f32.mrb[23].mxu0  ;;  %5958 = vmatpush1.bf16.msra.mxu0 %v5957_v34 }
 0x4d8   : > { %2925 = vst [vmem:[%s8238_s21 + $0x28] sm:$0xff] %v2917_v38  ;;  %v2910_v17 = vadd.f32 %v2909_v48, %v2809_v36 }
 0x4d9   : > { %v2918_v53 = vadd.f32 %v2908_v13, %v512_v41 }
 0x4da   : > { %v2919_v46 = vadd.f32 %v2910_v17, %v513_v47 }
 0x4db   : > { %2926 = vst [vmem:[%s8238_s21 + $0x30] sm:$0xff] %v2918_v53  ;;  %v5961_v6 = vpack.c.bf16 %v2918_v53, %v2916_v32 }
 0x4dc   : > { %2927 = vst [vmem:[%s8238_s21 + $0x38] sm:$0xff] %v2919_v46  ;;  %v5959_v18 = vpack.c.bf16 %v2919_v46, %v2917_v38  ;;  %v3170_v46 = vld [vmem:[#allocation2] sm:$0x3] }
 0x4de   : > { %5960 = vmatprep.subr.bf16.mxu0 %v5959_v18 }
 0x4df   : > { %5962 = vmatpush1.bf16.msra.mxu0 %v5961_v6 }
 0x4e2   : > { %5633 = vmatmul.mubr.msk.f32.vlgmr.msra.gmra.mrb[24].mxu0 %vm530_vm0, %v2936_v62  ;;  %v8445_v62 = vrot.slane %v3170_v46, %v7018_v10 }
 0x4e3   : > { %3038 = vmatprep.mubr.f32.mxu0 %v6592_v0 }
 0x4e6   : > { %5634 = vmatmul.mubr.msk.f32.gmra.mrb[26].mxu0 %vm530_vm0, %v2937_v16  ;;  %v8448_v16 = vrot.slane %v3170_v46, %v7016_v9 }
 0x4e7   : > { %3044 = vmatprep.mubr.f32.mxu0 %v6592_v0 }
 0x4ea   : > { %5635 = vmatmul.mubr.msk.f32.gmra.mrb[28].mxu0 %vm530_vm0, %v2938_v19 }
 0x4eb   : > { %3050 = vmatprep.mubr.f32.mxu0 %v6592_v0 }
 0x4ee   : > { %5636 = vmatmul.mubr.msk.f32.gmra.mrb[30].mxu0 %vm530_vm0, %v2939_v11 }
 0x4ef   : > { %3056 = vmatprep.mubr.f32.mxu0 %v6592_v0 }
 0x4f2   : > { %5637 = vmatmul.mubr.msk.f32.gmra.mrb[32].mxu0 %vm530_vm0, %v2940_v52 }
 0x4f3   : > { %3062 = vmatprep.mubr.f32.mxu0 %v6592_v0 }
 0x4f6   : > { %5638 = vmatmul.mubr.msk.f32.gmra.mrb[34].mxu0 %vm530_vm0, %v2941_v29 }
 0x4f7   : > { %3068 = vmatprep.mubr.f32.mxu0 %v6592_v0 }
 0x4fa   : > { %5639 = vmatmul.mubr.msk.f32.gmra.mrb[36].mxu0 %vm530_vm0, %v2942_v59 }
 0x4fb   : > { %3074 = vmatprep.mubr.f32.mxu0 %v6592_v0 }
 0x4fe   : > { %5640 = vmatmul.mubr.msk.f32.gmra.mrb[38].mxu0 %vm530_vm0, %v2943_v39 }
 0x4ff   : > { %3294 = vmatprep.mubr.f32.mxu0 %v6592_v0 }
 0x5b5   : > { %v3034_v51 = vpop.f32.mrb[24].mxu0 }
 0x5b6   : > { %v3081_v42 = vmax.f32 %v3034_v51, 0.0  ;;  %v3036_v30 = vpop.f32.mrb[25].mxu0 }
 0x5b7   : > { %v3082_v58 = vmax.f32 %v3036_v30, 0.0 }
 0x5b8   : > { %v8294_v57 = vmin.f32 %v3081_v42, 6.0 }
 0x5b9   : > { %v3040_v23 = vpop.f32.mrb[26].mxu0  ;;  %v8298_v54 = vmin.f32 %v3082_v58, 6.0 }
 0x5ba   : > { %v3083_v2 = vmax.f32 %v3040_v23, 0.0  ;;  %3122 = vrot.lane.b32.xlu1 %v8294_v57, %s6593_s18  ;;  %v3042_v61 = vpop.f32.mrb[27].mxu0 }
 0x5bb   : > { %v3084_v12 = vmax.f32 %v3042_v61, 0.0 }
 0x5bc   : > { %v8300_v60 = vmin.f32 %v3083_v2, 6.0 }
 0x5bd   : > { %v3046_v3 = vpop.f32.mrb[28].mxu0  ;;  %v8306_v25 = vmin.f32 %v3084_v12, 6.0 }
 0x5be   : > { %v3085_v40 = vmax.f32 %v3046_v3, 0.0  ;;  %3138 = vrot.lane.b32.xlu1 %v8298_v54, %s6593_s18  ;;  %3124 = vrot.lane.b32.xlu0 %v8300_v60, %s6593_s18  ;;  %v3048_v44 = vpop.f32.mrb[29].mxu0 }
 0x5bf   : > { %v3086_v43 = vmax.f32 %v3048_v44, 0.0 }
 0x5c0   : > { %v8308_v63 = vmin.f32 %v3085_v40, 6.0 }
 0x5c1   : > { %v3052_v4 = vpop.f32.mrb[30].mxu0  ;;  %v8314_v21 = vmin.f32 %v3086_v43, 6.0 }
 0x5c2   : > { %v3087_v50 = vmax.f32 %v3052_v4, 0.0  ;;  %3140 = vrot.lane.b32.xlu0 %v8306_v25, %s6593_s18  ;;  %3126 = vrot.lane.b32.xlu1 %v8308_v63, %s6593_s18  ;;  %v3054_v27 = vpop.f32.mrb[31].mxu0 }
 0x5c3   : > { %v3088_v55 = vmax.f32 %v3054_v27, 0.0 }
 0x5c4   : > { %v8316_v45 = vmin.f32 %v3087_v50, 6.0 }
 0x5c5   : > { %v3058_v14 = vpop.f32.mrb[32].mxu0  ;;  %v8322_v33 = vmin.f32 %v3088_v55, 6.0 }
 0x5c6   : > { %v3089_v49 = vmax.f32 %v3058_v14, 0.0  ;;  %3142 = vrot.lane.b32.xlu1 %v8314_v21, %s6593_s18  ;;  %3128 = vrot.lane.b32.xlu0 %v8316_v45, %s6593_s18  ;;  %v3060_v56 = vpop.f32.mrb[33].mxu0 }
 0x5c7   : > { %v3090_v24 = vmax.f32 %v3060_v56, 0.0 }
 0x5c8   : > { %v8324_v35 = vmin.f32 %v3089_v49, 6.0 }
 0x5c9   : > { %v3064_v5 = vpop.f32.mrb[34].mxu0  ;;  %v8330_v1 = vmin.f32 %v3090_v24, 6.0 }
 0x5ca   : > { %v3091_v7 = vmax.f32 %v3064_v5, 0.0  ;;  %3144 = vrot.lane.b32.xlu0 %v8322_v33, %s6593_s18  ;;  %3130 = vrot.lane.b32.xlu1 %v8324_v35, %s6593_s18  ;;  %v3066_v28 = vpop.f32.mrb[35].mxu0 }
 0x5cb   : > { %v3092_v26 = vmax.f32 %v3066_v28, 0.0 }
 0x5cc   : > { %v8332_v34 = vmin.f32 %v3091_v7, 6.0 }
 0x5cd   : > { %v3070_v31 = vpop.f32.mrb[36].mxu0  ;;  %v8338_v37 = vmin.f32 %v3092_v26, 6.0 }
 0x5ce   : > { %v3093_v15 = vmax.f32 %v3070_v31, 0.0  ;;  %3146 = vrot.lane.b32.xlu1 %v8330_v1, %s6593_s18  ;;  %3132 = vrot.lane.b32.xlu0 %v8332_v34, %s6593_s18  ;;  %v3072_v20 = vpop.f32.mrb[37].mxu0 }
 0x5cf   : > { %v3094_v36 = vmax.f32 %v3072_v20, 0.0 }
 0x5d0   : > { %v8340_v32 = vmin.f32 %v3093_v15, 6.0 }
 0x5d1   : > { %v3076_v38 = vpop.f32.mrb[38].mxu0  ;;  %v8346_v13 = vmin.f32 %v3094_v36, 6.0 }
 0x5d2   : > { %v3095_v41 = vmax.f32 %v3076_v38, 0.0  ;;  %3148 = vrot.lane.b32.xlu0 %v8338_v37, %s6593_s18  ;;  %3134 = vrot.lane.b32.xlu1 %v8340_v32, %s6593_s18  ;;  %v3078_v22 = vpop.f32.mrb[39].mxu0 }
 0x5d3   : > { %v3096_v48 = vmax.f32 %v3078_v22, 0.0 }
 0x5d4   : > { %v8348_v47 = vmin.f32 %v3095_v41, 6.0 }
 0x5d5   : > { %v8354_v17 = vmin.f32 %v3096_v48, 6.0 }
 0x5d6   : > { %3150 = vrot.lane.b32.xlu1 %v8346_v13, %s6593_s18  ;;  %3136 = vrot.lane.b32.xlu0 %v8348_v47, %s6593_s18 }
 0x5da   : > { %3480 = vrot.lane.b32.xlu1 %v8294_v57, %s6594_s24  ;;  %3152 = vrot.lane.b32.xlu0 %v8354_v17, %s6593_s18 }
 0x5de   : > { %3496 = vrot.lane.b32.xlu1 %v8298_v54, %s6594_s24  ;;  %3482 = vrot.lane.b32.xlu0 %v8300_v60, %s6594_s24 }
 0x5e2   : > { %3484 = vrot.lane.b32.xlu1 %v8308_v63, %s6594_s24  ;;  %3498 = vrot.lane.b32.xlu0 %v8306_v25, %s6594_s24 }
 0x5e6   : > { %3500 = vrot.lane.b32.xlu1 %v8314_v21, %s6594_s24  ;;  %3486 = vrot.lane.b32.xlu0 %v8316_v45, %s6594_s24 }
 0x5ea   : > { %3488 = vrot.lane.b32.xlu1 %v8324_v35, %s6594_s24  ;;  %3502 = vrot.lane.b32.xlu0 %v8322_v33, %s6594_s24 }
 0x5ee   : > { %3504 = vrot.lane.b32.xlu1 %v8330_v1, %s6594_s24  ;;  %3490 = vrot.lane.b32.xlu0 %v8332_v34, %s6594_s24 }
 0x5f2   : > { %3492 = vrot.lane.b32.xlu1 %v8340_v32, %s6594_s24  ;;  %3506 = vrot.lane.b32.xlu0 %v8338_v37, %s6594_s24 }
 0x5f6   : > { %3508 = vrot.lane.b32.xlu1 %v8346_v13, %s6594_s24  ;;  %3494 = vrot.lane.b32.xlu0 %v8348_v47, %s6594_s24 }
 0x5fa   : > { %3718 = vrot.lane.b32.xlu1 %v8294_v57, %s6595_s26  ;;  %3720 = vrot.lane.b32.xlu0 %v8300_v60, %s6595_s26 }
 0x5fe   : > { %3734 = vrot.lane.b32.xlu1 %v8298_v54, %s6595_s26  ;;  %3736 = vrot.lane.b32.xlu0 %v8306_v25, %s6595_s26 }
 0x602   : > { %3722 = vrot.lane.b32.xlu1 %v8308_v63, %s6595_s26  ;;  %3724 = vrot.lane.b32.xlu0 %v8316_v45, %s6595_s26 }
 0x606   : > { %3738 = vrot.lane.b32.xlu1 %v8314_v21, %s6595_s26  ;;  %3510 = vrot.lane.b32.xlu0 %v8354_v17, %s6594_s24 }
 0x60a   : > { %3726 = vrot.lane.b32.xlu1 %v8324_v35, %s6595_s26  ;;  %3740 = vrot.lane.b32.xlu0 %v8322_v33, %s6595_s26 }
 0x60e   : > { %3742 = vrot.lane.b32.xlu1 %v8330_v1, %s6595_s26  ;;  %3728 = vrot.lane.b32.xlu0 %v8332_v34, %s6595_s26 }
 0x612   : > { %3730 = vrot.lane.b32.xlu1 %v8340_v32, %s6595_s26  ;;  %3744 = vrot.lane.b32.xlu0 %v8338_v37, %s6595_s26 }
 0x616   : > { %3746 = vrot.lane.b32.xlu1 %v8346_v13, %s6595_s26  ;;  %3732 = vrot.lane.b32.xlu0 %v8348_v47, %s6595_s26 }
 0x61a   : > { %3956 = vrot.lane.b32.xlu1 %v8294_v57, %s6596_s13  ;;  %3958 = vrot.lane.b32.xlu0 %v8300_v60, %s6596_s13 }
 0x61e   : > { %3972 = vrot.lane.b32.xlu1 %v8298_v54, %s6596_s13  ;;  %3974 = vrot.lane.b32.xlu0 %v8306_v25, %s6596_s13 }
 0x622   : > { %3960 = vrot.lane.b32.xlu1 %v8308_v63, %s6596_s13  ;;  %3962 = vrot.lane.b32.xlu0 %v8316_v45, %s6596_s13 }
 0x626   : > { %3976 = vrot.lane.b32.xlu1 %v8314_v21, %s6596_s13  ;;  %3748 = vrot.lane.b32.xlu0 %v8354_v17, %s6595_s26 }
 0x62a   : > { %3964 = vrot.lane.b32.xlu1 %v8324_v35, %s6596_s13  ;;  %3978 = vrot.lane.b32.xlu0 %v8322_v33, %s6596_s13 }
 0x62c   : > { %v3123_v53 = vpop.permute.xlu1 %3122 }
 0x62e   : > { %3980 = vrot.lane.b32.xlu1 %v8330_v1, %s6596_s13  ;;  %3966 = vrot.lane.b32.xlu0 %v8332_v34, %s6596_s13 }
 0x630   : > { %v3139_v6 = vpop.permute.xlu1 %3138  ;;  %v3125_v18 = vpop.permute.xlu0 %3124 }
 0x631   : > { %v3162_v19 = vsel %vm743_vm1, %v3139_v6, %v3123_v53  ;;  %v3154_v11 = vsel %vm743_vm1, %v3123_v53, %v3139_v6 }
 0x632   : > { %3968 = vrot.lane.b32.xlu1 %v8340_v32, %s6596_s13  ;;  %3982 = vrot.lane.b32.xlu0 %v8338_v37, %s6596_s13  ;;  %v3182_v59 = vmul.f32 %v8445_v62, %v3162_v19  ;;  %v3183_v42 = vmul.f32 %v8448_v16, %v3154_v11 }
 0x634   : > { %v3141_v52 = vpop.permute.xlu0 %3140  ;;  %v3127_v29 = vpop.permute.xlu1 %3126 }
 0x635   : > { %v3155_v39 = vsel %vm743_vm1, %v3125_v18, %v3141_v52  ;;  %v3163_v51 = vsel %vm743_vm1, %v3141_v52, %v3125_v18 }
 0x636   : > { %v3184_v30 = vmul.f32 %v8445_v62, %v3163_v51  ;;  %v3185_v58 = vmul.f32 %v8448_v16, %v3155_v39  ;;  %3984 = vrot.lane.b32.xlu1 %v8346_v13, %s6596_s13  ;;  %3970 = vrot.lane.b32.xlu0 %v8348_v47, %s6596_s13 }
 0x638   : > { %v5965_v23 = vpack.c.bf16 %v3184_v30, %v3182_v59  ;;  %v3143_v2 = vpop.permute.xlu1 %3142  ;;  %v3129_v61 = vpop.permute.xlu0 %3128  ;;  %v5963_v12 = vpack.c.bf16 %v3185_v58, %v3183_v42 }
 0x639   : > { %v3156_v3 = vsel %vm743_vm1, %v3127_v29, %v3143_v2  ;;  %v3164_v40 = vsel %vm743_vm1, %v3143_v2, %v3127_v29 }
 0x63a   : > { %5964 = vmatprep.subr.bf16.mxu0 %v5963_v12  ;;  %4194 = vrot.lane.b32.xlu1 %v8294_v57, %s6597_s5  ;;  %v3186_v27 = vmul.f32 %v8445_v62, %v3164_v40  ;;  %v3187_v55 = vmul.f32 %v8448_v16, %v3156_v3 }
 0x63b   : > { %4196 = vrot.lane.b32.xlu0 %v8300_v60, %s6597_s5  ;;  %5966 = vmatpush1.bf16.msra.mxu0 %v5965_v23 }
 0x63c   : > { %v3145_v44 = vpop.permute.xlu0 %3144  ;;  %v3131_v43 = vpop.permute.xlu1 %3130 }
 0x63d   : > { %v3157_v4 = vsel %vm743_vm1, %v3129_v61, %v3145_v44  ;;  %v3165_v50 = vsel %vm743_vm1, %v3145_v44, %v3129_v61  ;;  %v5981_v44 = vpack.c.bf16 %v8300_v60, %v8294_v57 }
 0x63e   : > { %v3188_v14 = vmul.f32 %v8445_v62, %v3165_v50  ;;  %v3189_v49 = vmul.f32 %v8448_v16, %v3157_v4  ;;  %4210 = vrot.lane.b32.xlu1 %v8298_v54, %s6597_s5  ;;  %v3199_v4 = vld [vmem:[%s9747_s8 + $0x8] sm:$0xff] }
 0x63f   : > { %4212 = vrot.lane.b32.xlu0 %v8306_v25, %s6597_s5 }
 0x640   : > { %v5969_v56 = vpack.c.bf16 %v3188_v14, %v3186_v27  ;;  %v3147_v24 = vpop.permute.xlu1 %3146  ;;  %v3133_v5 = vpop.permute.xlu0 %3132  ;;  %v5967_v7 = vpack.c.bf16 %v3189_v49, %v3187_v55  ;;  %v3528_v55 = vld [vmem:[#allocation2 + $0x2] sm:$0x3]  ;;  %v5985_v14 = vpack.c.bf16 %v8316_v45, %v8308_v63  ;;  %v5987_v49 = vpack.c.bf16 %v8338_v37, %v8330_v1 }
 0x641   : > { %v3158_v28 = vsel %vm743_vm1, %v3131_v43, %v3147_v24  ;;  %v3166_v26 = vsel %vm743_vm1, %v3147_v24, %v3131_v43  ;;  %v5983_v43 = vpack.c.bf16 %v8322_v33, %v8314_v21  ;;  %v3200_v24 = vld [vmem:[%s9747_s8 + $0x10] sm:$0xff] }
 0x642   : > { %5968 = vmatprep.subr.bf16.mxu0 %v5967_v7  ;;  %4198 = vrot.lane.b32.xlu1 %v8308_v63, %s6597_s5  ;;  %v3190_v38 = vmul.f32 %v8445_v62, %v3166_v26  ;;  %v3191_v41 = vmul.f32 %v8448_v16, %v3158_v28 }
 0x643   : > { %4200 = vrot.lane.b32.xlu0 %v8316_v45, %s6597_s5  ;;  %5970 = vmatpush1.bf16.msra.mxu0 %v5969_v56 }
 0x644   : > { %v3149_v31 = vpop.permute.xlu0 %3148  ;;  %v3135_v15 = vpop.permute.xlu1 %3134 }
 0x645   : > { %v3159_v20 = vsel %vm743_vm1, %v3133_v5, %v3149_v31  ;;  %v3167_v36 = vsel %vm743_vm1, %v3149_v31, %v3133_v5  ;;  %v8583_v5 = vrot.slane %v3528_v55, %v7016_v9  ;;  %v5989_v31 = vpack.c.bf16 %v8332_v34, %v8324_v35 }
 0x646   : > { %v3192_v22 = vmul.f32 %v8445_v62, %v3167_v36  ;;  %v3193_v48 = vmul.f32 %v8448_v16, %v3159_v20  ;;  %4214 = vrot.lane.b32.xlu1 %v8314_v21, %s6597_s5  ;;  %v5991_v20 = vpack.c.bf16 %v8354_v17, %v8346_v13  ;;  %v3201_v36 = vld [vmem:[%s9747_s8 + $0x18] sm:$0xff] }
 0x647   : > { %3986 = vrot.lane.b32.xlu0 %v8354_v17, %s6596_s13 }
 0x648   : > { %v5973_v53 = vpack.c.bf16 %v3192_v22, %v3190_v38  ;;  %v3151_v46 = vpop.permute.xlu1 %3150  ;;  %v3137_v6 = vpop.permute.xlu0 %3136  ;;  %v5971_v18 = vpack.c.bf16 %v3193_v48, %v3191_v41  ;;  %v5993_v48 = vpack.c.bf16 %v8348_v47, %v8340_v32 }
 0x649   : > { %v3160_v19 = vsel %vm743_vm1, %v3135_v15, %v3151_v46  ;;  %v3168_v11 = vsel %vm743_vm1, %v3151_v46, %v3135_v15  ;;  %v3202_v46 = vld [vmem:[%s9747_s8 + $0x20] sm:$0xff] }
 0x64a   : > { %5972 = vmatprep.subr.bf16.mxu0 %v5971_v18  ;;  %4202 = vrot.lane.b32.xlu1 %v8324_v35, %s6597_s5  ;;  %v3194_v51 = vmul.f32 %v8445_v62, %v3168_v11  ;;  %v3195_v42 = vmul.f32 %v8448_v16, %v3160_v19  ;;  %v3203_v19 = vld [vmem:[%s9747_s8 + $0x28] sm:$0xff] }
 0x64b   : > { %4216 = vrot.lane.b32.xlu0 %v8322_v33, %s6597_s5  ;;  %5974 = vmatpush1.bf16.msra.mxu0 %v5973_v53 }
 0x64c   : > { %v8518_v52 = vpop.permute.xlu1 %3480  ;;  %v3153_v29 = vpop.permute.xlu0 %3152 }
 0x64d   : > { %v3161_v59 = vsel %vm743_vm1, %v3137_v6, %v3153_v29  ;;  %v3169_v39 = vsel %vm743_vm1, %v3153_v29, %v3137_v6 }
 0x64e   : > { %v3196_v30 = vmul.f32 %v8445_v62, %v3169_v39  ;;  %v3197_v58 = vmul.f32 %v8448_v16, %v3161_v59  ;;  %4218 = vrot.lane.b32.xlu1 %v8330_v1, %s6597_s5  ;;  %v5979_v62 = vpack.c.bf16 %v8306_v25, %v8298_v54  ;;  %v3198_v16 = vld [vmem:[%s9747_s8] sm:$0xff]  ;;  %v3204_v59 = vld [vmem:[%s9747_s8 + $0x30] sm:$0xff] }
 0x64f   : > { %4204 = vrot.lane.b32.xlu0 %v8332_v34, %s6597_s5 }
 0x650   : > { %v5977_v23 = vpack.c.bf16 %v3196_v30, %v3194_v51  ;;  %v8532_v2 = vpop.permute.xlu1 %3496  ;;  %v8534_v61 = vpop.permute.xlu0 %3482  ;;  %v5975_v12 = vpack.c.bf16 %v3197_v58, %v3195_v42  ;;  %v8657_v30 = vrot.slane %v3528_v55, %v7018_v10 }
 0x651   : > { %v3512_v26 = vsel %vm1103_vm3, %v8518_v52, %v8532_v2 }
 0x652   : > { %4206 = vrot.lane.b32.xlu1 %v8340_v32, %s6597_s5  ;;  %5976 = vmatprep.subr.bf16.mxu0 %v5975_v12  ;;  %v3541_v38 = vmul.f32 %v8583_v5, %v3512_v26 }
 0x653   : > { %4220 = vrot.lane.b32.xlu0 %v8338_v37, %s6597_s5  ;;  %5978 = vmatpush1.bf16.msra.mxu0 %v5977_v23 }
 0x654   : > { %v8545_v3 = vpop.permute.xlu1 %3484  ;;  %5980 = vmatprep.subr.bf16.mxu0 %v5979_v62  ;;  %v8547_v40 = vpop.permute.xlu0 %3498  ;;  %v3520_v62 = vsel %vm1103_vm3, %v8532_v2, %v8518_v52 }
 0x655   : > { %v3513_v56 = vsel %vm1103_vm3, %v8534_v61, %v8547_v40  ;;  %v3521_v42 = vsel %vm1103_vm3, %v8547_v40, %v8534_v61  ;;  %v3205_v61 = vld [vmem:[%s9747_s8 + $0x38] sm:$0xff]  ;;  %v3540_v52 = vmul.f32 %v8657_v30, %v3520_v62 }
 0x656   : > { %4222 = vrot.lane.b32.xlu1 %v8346_v13, %s6597_s5  ;;  %5649 = vmatmul.mubr.msk.f32.vlgmr.msra.gmra.mrb[40].mxu0 %vm796_vm2, %v3198_v16  ;;  %v3543_v15 = vmul.f32 %v8583_v5, %v3513_v56  ;;  %v3542_v16 = vmul.f32 %v8657_v30, %v3521_v42 }
 0x657   : > { %4208 = vrot.lane.b32.xlu0 %v8348_v47, %s6597_s5  ;;  %5982 = vmatpush1.bf16.msra.mxu0 %v5981_v44 }
 0x658   : > { %v8561_v50 = vpop.permute.xlu1 %3500  ;;  %5984 = vmatprep.subr.bf16.mxu0 %v5983_v43  ;;  %v8563_v27 = vpop.permute.xlu0 %3486  ;;  %3300 = vmatprep.mubr.f32.mxu0 %v6592_v0  ;;  %v5995_v53 = vpack.c.bf16 %v3543_v15, %v3541_v38  ;;  %v5997_v56 = vpack.c.bf16 %v3542_v16, %v3540_v52  ;;  %v8713_v15 = vld [vmem:[#allocation2 + $0x4] sm:$0x3] }
 0x659   : > { %v3514_v40 = vsel %vm1103_vm3, %v8545_v3, %v8561_v50 }
 0x65a   : > { %4432 = vrot.lane.b32.xlu1 %v8294_v57, %s6598_s16  ;;  %5650 = vmatmul.mubr.msk.f32.gmra.mrb[42].mxu0 %vm796_vm2, %v3199_v4 }
 0x65b   : > { %4434 = vrot.lane.b32.xlu0 %v8300_v60, %s6598_s16  ;;  %5986 = vmatpush1.bf16.msra.mxu0 %v5985_v14  ;;  %v3522_v14 = vsel %vm1103_vm3, %v8561_v50, %v8545_v3 }
 0x65c   : > { %v8585_v7 = vpop.permute.xlu1 %3488  ;;  %5988 = vmatprep.subr.bf16.mxu0 %v5987_v49  ;;  %v3503_v28 = vpop.permute.xlu0 %3502  ;;  %3306 = vmatprep.mubr.f32.mxu0 %v6592_v0  ;;  %v3545_v49 = vmul.f32 %v8583_v5, %v3514_v40  ;;  %v3544_v50 = vmul.f32 %v8657_v30, %v3522_v14  ;;  %v5643_v40 = vld [vmem:[%s9747_s8 + $0x110] sm:$0xff] }
 0x65d   : > { %v3515_v58 = vsel %vm1103_vm3, %v8563_v27, %v3503_v28  ;;  %v3523_v44 = vsel %vm1103_vm3, %v3503_v28, %v8563_v27  ;;  %v5641_v27 = vld [vmem:[%s9747_s8 + $0x100] sm:$0xff] }
 0x65e   : > { %4448 = vrot.lane.b32.xlu1 %v8298_v54, %s6598_s16  ;;  %5651 = vmatmul.mubr.msk.f32.gmra.mrb[44].mxu0 %vm796_vm2, %v3200_v24  ;;  %v3547_v43 = vmul.f32 %v8583_v5, %v3515_v58  ;;  %v3546_v24 = vmul.f32 %v8657_v30, %v3523_v44 }
 0x65f   : > { %4450 = vrot.lane.b32.xlu0 %v8306_v25, %s6598_s16  ;;  %5990 = vmatpush1.bf16.msra.mxu0 %v5989_v31 }
 0x660   : > { %v8606_v41 = vpop.permute.xlu1 %3504  ;;  %v3491_v22 = vpop.permute.xlu0 %3490  ;;  %5992 = vmatprep.subr.bf16.mxu0 %v5991_v20  ;;  %3312 = vmatprep.mubr.f32.mxu0 %v6592_v0  ;;  %v5999_v3 = vpack.c.bf16 %v3547_v43, %v3545_v49 }
 0x661   : > { %v3516_v28 = vsel %vm1103_vm3, %v8585_v7, %v8606_v41 }
 0x662   : > { %4436 = vrot.lane.b32.xlu1 %v8308_v63, %s6598_s16  ;;  %5652 = vmatmul.mubr.msk.f32.gmra.mrb[46].mxu0 %vm796_vm2, %v3201_v36 }
 0x663   : > { %4438 = vrot.lane.b32.xlu0 %v8316_v45, %s6598_s16  ;;  %5994 = vmatpush1.bf16.msra.mxu0 %v5993_v48  ;;  %v3524_v48 = vsel %vm1103_vm3, %v8606_v41, %v8585_v7 }
 0x664   : > { %v8619_v6 = vpop.permute.xlu1 %3492  ;;  %v3507_v18 = vpop.permute.xlu0 %3506  ;;  %5996 = vmatprep.subr.bf16.mxu0 %v5995_v53  ;;  %3318 = vmatprep.mubr.f32.mxu0 %v6592_v0  ;;  %v3549_v53 = vmul.f32 %v8583_v5, %v3516_v28 }
 0x665   : > { %v3517_v2 = vsel %vm1103_vm3, %v3491_v22, %v3507_v18  ;;  %v3525_v26 = vsel %vm1103_vm3, %v3507_v18, %v3491_v22  ;;  %v5642_v22 = vld [vmem:[%s9747_s8 + $0x108] sm:$0xff]  ;;  %v6001_v18 = vpack.c.bf16 %v3546_v24, %v3544_v50 }
 0x666   : > { %4452 = vrot.lane.b32.xlu1 %v8314_v21, %s6598_s16  ;;  %5653 = vmatmul.mubr.msk.f32.gmra.mrb[48].mxu0 %vm796_vm2, %v3202_v46  ;;  %v3551_v31 = vmul.f32 %v8583_v5, %v3517_v2 }
 0x667   : > { %4224 = vrot.lane.b32.xlu0 %v8354_v17, %s6597_s5  ;;  %3324 = vmatprep.mubr.f32.mxu0 %v6592_v0 }
 0x668   : > { %v8631_v11 = vpop.permute.xlu1 %3508  ;;  %v3495_v29 = vpop.permute.xlu0 %3494  ;;  %v6003_v58 = vpack.c.bf16 %v3551_v31, %v3549_v53  ;;  %v5645_v31 = vld [vmem:[%s9747_s8 + $0x120] sm:$0xff]  ;;  %v8823_v53 = vrot.slane %v8713_v15, %v7018_v10 }
 0x669   : > { %v3518_v20 = vsel %vm1103_vm3, %v8619_v6, %v8631_v11  ;;  %v3526_v44 = vsel %vm1103_vm3, %v8631_v11, %v8619_v6 }
 0x66a   : > { %4440 = vrot.lane.b32.xlu1 %v8324_v35, %s6598_s16  ;;  %5654 = vmatmul.mubr.msk.f32.gmra.mrb[50].mxu0 %vm796_vm2, %v3203_v19  ;;  %v3550_v19 = vmul.f32 %v8657_v30, %v3525_v26  ;;  %v3553_v7 = vmul.f32 %v8583_v5, %v3518_v20  ;;  %v3552_v49 = vmul.f32 %v8657_v30, %v3526_v44  ;;  %v5646_v20 = vld [vmem:[%s9747_s8 + $0x128] sm:$0xff] }
 0x66b   : > { %4454 = vrot.lane.b32.xlu0 %v8322_v33, %s6598_s16  ;;  %3330 = vmatprep.mubr.f32.mxu0 %v6592_v0 }
 0x66c   : > { %v8642_v39 = vpop.permute.xlu1 %3718  ;;  %v8644_v51 = vpop.permute.xlu0 %3720 }
 0x66e   : > { %4456 = vrot.lane.b32.xlu1 %v8330_v1, %s6598_s16  ;;  %5655 = vmatmul.mubr.msk.f32.gmra.mrb[52].mxu0 %vm796_vm2, %v3204_v59  ;;  %v8739_v59 = vrot.slane %v8713_v15, %v7016_v9 }
 0x66f   : > { %4442 = vrot.lane.b32.xlu0 %v8332_v34, %s6598_s16  ;;  %3336 = vmatprep.mubr.f32.mxu0 %v6592_v0 }
 0x670   : > { %v8662_v23 = vpop.permute.xlu1 %3734  ;;  %v8664_v12 = vpop.permute.xlu0 %3736 }
 0x671   : > { %v3750_v62 = vsel %vm1343_vm4, %v8642_v39, %v8662_v23 }
 0x672   : > { %4444 = vrot.lane.b32.xlu1 %v8340_v32, %s6598_s16  ;;  %5656 = vmatmul.mubr.msk.f32.gmra.mrb[54].mxu0 %vm796_vm2, %v3205_v61  ;;  %v3548_v61 = vmul.f32 %v8657_v30, %v3524_v48  ;;  %v5647_v48 = vld [vmem:[%s9747_s8 + $0x130] sm:$0xff] }
 0x673   : > { %4458 = vrot.lane.b32.xlu0 %v8338_v37, %s6598_s16  ;;  %3431 = vmatprep.mubr.f32.mxu0 %v6592_v0 }
 0x674   : > { %v8690_v4 = vpop.permute.xlu1 %3722  ;;  %v8692_v55 = vpop.permute.xlu0 %3724  ;;  %v6005_v52 = vpack.c.bf16 %v3550_v19, %v3548_v61 }
 0x676   : > { %4460 = vrot.lane.b32.xlu1 %v8346_v13, %s6598_s16  ;;  %5657 = vmatmul.mubr.msk.f32.vlgmr.msra.gmra.mrb[40].mxu0 %vm796_vm2, %v5641_v27  ;;  %v3779_v27 = vmul.f32 %v8739_v59, %v3750_v62 }
 0x677   : > { %4446 = vrot.lane.b32.xlu0 %v8348_v47, %s6598_s16  ;;  %5998 = vmatpush1.bf16.msra.mxu0 %v5997_v56  ;;  %v5644_v56 = vld [vmem:[%s9747_s8 + $0x118] sm:$0xff] }
 0x678   : > { %v8723_v36 = vpop.permute.xlu1 %3738  ;;  %v3511_v38 = vpop.permute.xlu0 %3510  ;;  %3437 = vmatprep.mubr.f32.mxu0 %v6592_v0  ;;  %6000 = vmatprep.subr.bf16.mxu0 %v5999_v3 }
 0x679   : > { %v3519_v46 = vsel %vm1103_vm3, %v3495_v29, %v3511_v38  ;;  %v3527_v41 = vsel %vm1103_vm3, %v3511_v38, %v3495_v29 }
 0x67a   : > { %v3555_v42 = vmul.f32 %v8583_v5, %v3519_v46  ;;  %4670 = vrot.lane.b32.xlu1 %v8294_v57, %s6599_s27  ;;  %5658 = vmatmul.mubr.msk.f32.gmra.mrb[42].mxu0 %vm796_vm2, %v5642_v22  ;;  %v3751_v5 = vsel %vm1343_vm4, %v8644_v51, %v8664_v12  ;;  %v3554_v2 = vmul.f32 %v8657_v30, %v3527_v41 }
 0x67b   : > { %4672 = vrot.lane.b32.xlu0 %v8300_v60, %s6599_s27  ;;  %6002 = vmatpush1.bf16.msra.mxu0 %v6001_v18  ;;  %v3781_v14 = vmul.f32 %v8739_v59, %v3751_v5  ;;  %v3758_v46 = vsel %vm1343_vm4, %v8662_v23, %v8642_v39  ;;  %v3759_v18 = vsel %vm1343_vm4, %v8664_v12, %v8644_v51  ;;  %v5648_v39 = vld [vmem:[%s9747_s8 + $0x138] sm:$0xff] }
 0x67c   : > { %v8759_v29 = vpop.permute.xlu1 %3726  ;;  %v3741_v16 = vpop.permute.xlu0 %3740  ;;  %3443 = vmatprep.mubr.f32.mxu0 %v6592_v0  ;;  %6004 = vmatprep.subr.bf16.mxu0 %v6003_v58  ;;  %v6007_v43 = vpack.c.bf16 %v3555_v42, %v3553_v7  ;;  %v6009_v24 = vpack.c.bf16 %v3554_v2, %v3552_v49  ;;  %v3778_v51 = vmul.f32 %v8823_v53, %v3758_v46 }
 0x67d   : > { %v6011_v30 = vpack.c.bf16 %v3781_v14, %v3779_v27  ;;  %v3753_v15 = vsel %vm1343_vm4, %v8692_v55, %v3741_v16  ;;  %v3780_v23 = vmul.f32 %v8823_v53, %v3759_v18  ;;  %v3752_v12 = vsel %vm1343_vm4, %v8690_v4, %v8723_v36  ;;  %v8889_v27 = vld [vmem:[#allocation2 + $0x6] sm:$0x3] }
 0x67e   : > { %4686 = vrot.lane.b32.xlu1 %v8298_v54, %s6599_s27  ;;  %5659 = vmatmul.mubr.msk.f32.gmra.mrb[44].mxu0 %vm796_vm2, %v5643_v40  ;;  %v3761_v7 = vsel %vm1343_vm4, %v3741_v16, %v8692_v55  ;;  %v3785_v41 = vmul.f32 %v8739_v59, %v3753_v15  ;;  %v5665_v55 = vld [vmem:[%s9747_s8 + $0x40] sm:$0xff]  ;;  %v3760_v5 = vsel %vm1343_vm4, %v8723_v36, %v8690_v4 }
 0x67f   : > { %4688 = vrot.lane.b32.xlu0 %v8306_v25, %s6599_s27  ;;  %6006 = vmatpush1.bf16.msra.mxu0 %v6005_v52  ;;  %v3783_v16 = vmul.f32 %v8739_v59, %v3752_v12  ;;  %v6013_v40 = vpack.c.bf16 %v3780_v23, %v3778_v51  ;;  %v3784_v44 = vmul.f32 %v8823_v53, %v3761_v7 }
 0x680   : > { %v8778_v6 = vpop.permute.xlu1 %3742  ;;  %v3729_v11 = vpop.permute.xlu0 %3728  ;;  %3449 = vmatprep.mubr.f32.mxu0 %v6592_v0  ;;  %6008 = vmatprep.subr.bf16.mxu0 %v6007_v43  ;;  %v3782_v36 = vmul.f32 %v8823_v53, %v3760_v5 }
 0x681   : > { %v3754_v43 = vsel %vm1343_vm4, %v8759_v29, %v8778_v6  ;;  %v6015_v4 = vpack.c.bf16 %v3785_v41, %v3783_v16 }
 0x682   : > { %4674 = vrot.lane.b32.xlu1 %v8308_v63, %s6599_s27  ;;  %5660 = vmatmul.mubr.msk.f32.gmra.mrb[46].mxu0 %vm796_vm2, %v5644_v56  ;;  %v5666_v56 = vld [vmem:[%s9747_s8 + $0x48] sm:$0xff] }
 0x683   : > { %4676 = vrot.lane.b32.xlu0 %v8316_v45, %s6599_s27  ;;  %6010 = vmatpush1.bf16.msra.mxu0 %v6009_v24  ;;  %v3762_v24 = vsel %vm1343_vm4, %v8778_v6, %v8759_v29 }
 0x684   : > { %v8789_v28 = vpop.permute.xlu1 %3730  ;;  %v3745_v26 = vpop.permute.xlu0 %3744  ;;  %3455 = vmatprep.mubr.f32.mxu0 %v6592_v0  ;;  %6012 = vmatprep.subr.bf16.mxu0 %v6011_v30  ;;  %v3787_v30 = vmul.f32 %v8739_v59, %v3754_v43  ;;  %v3786_v15 = vmul.f32 %v8823_v53, %v3762_v24  ;;  %v5671_v43 = vld [vmem:[%s9747_s8 + $0x70] sm:$0xff] }
 0x685   : > { %v3755_v58 = vsel %vm1343_vm4, %v3729_v11, %v3745_v26  ;;  %v3763_v52 = vsel %vm1343_vm4, %v3745_v26, %v3729_v11 }
 0x686   : > { %4690 = vrot.lane.b32.xlu1 %v8314_v21, %s6599_s27  ;;  %5661 = vmatmul.mubr.msk.f32.gmra.mrb[48].mxu0 %vm796_vm2, %v5645_v31  ;;  %v3789_v2 = vmul.f32 %v8739_v59, %v3755_v58  ;;  %v6017_v31 = vpack.c.bf16 %v3784_v44, %v3782_v36  ;;  %v5670_v44 = vld [vmem:[%s9747_s8 + $0x68] sm:$0xff] }
 0x687   : > { %4462 = vrot.lane.b32.xlu0 %v8354_v17, %s6598_s16  ;;  %3461 = vmatprep.mubr.f32.mxu0 %v6592_v0 }
 0x688   : > { %v8800_v3 = vpop.permute.xlu1 %3746  ;;  %v8802_v50 = vpop.permute.xlu0 %3732  ;;  %v6019_v18 = vpack.c.bf16 %v3789_v2, %v3787_v30  ;;  %v9001_v2 = vrot.slane %v8889_v27, %v7018_v10 }
 0x689   : > { %v3756_v14 = vsel %vm1343_vm4, %v8789_v28, %v8800_v3  ;;  %v3764_v51 = vsel %vm1343_vm4, %v8800_v3, %v8789_v28 }
 0x68a   : > { %4678 = vrot.lane.b32.xlu1 %v8324_v35, %s6599_s27  ;;  %5662 = vmatmul.mubr.msk.f32.gmra.mrb[50].mxu0 %vm796_vm2, %v5646_v20  ;;  %v3788_v20 = vmul.f32 %v8823_v53, %v3763_v52  ;;  %v3791_v29 = vmul.f32 %v8739_v59, %v3756_v14 }
 0x68b   : > { %4692 = vrot.lane.b32.xlu0 %v8322_v33, %s6599_s27  ;;  %3467 = vmatprep.mubr.f32.mxu0 %v6592_v0 }
 0x68c   : > { %v8813_v38 = vpop.permute.xlu1 %3956  ;;  %v8815_v22 = vpop.permute.xlu0 %3958  ;;  %v6021_v12 = vpack.c.bf16 %v3788_v20, %v3786_v15  ;;  %v9063_v20 = vld [vmem:[#allocation2 + $0xa] sm:$0x3] }
 0x68e   : > { %4694 = vrot.lane.b32.xlu1 %v8330_v1, %s6599_s27  ;;  %5663 = vmatmul.mubr.msk.f32.gmra.mrb[52].mxu0 %vm796_vm2, %v5647_v48  ;;  %v8916_v48 = vrot.slane %v8889_v27, %v7016_v9 }
 0x68f   : > { %4680 = vrot.lane.b32.xlu0 %v8332_v34, %s6599_s27  ;;  %3473 = vmatprep.mubr.f32.mxu0 %v6592_v0 }
 0x690   : > { %v8841_v19 = vpop.permute.xlu1 %3972  ;;  %v8843_v42 = vpop.permute.xlu0 %3974 }
 0x692   : > { %4682 = vrot.lane.b32.xlu1 %v8340_v32, %s6599_s27  ;;  %5664 = vmatmul.mubr.msk.f32.gmra.mrb[54].mxu0 %vm796_vm2, %v5648_v39  ;;  %v3988_v39 = vsel %vm1583_vm5, %v8813_v38, %v8841_v19 }
 0x693   : > { %4696 = vrot.lane.b32.xlu0 %v8338_v37, %s6599_s27  ;;  %3653 = vmatprep.mubr.f32.mxu0 %v6592_v0  ;;  %v4017_v41 = vmul.f32 %v8916_v48, %v3988_v39  ;;  %v9090_v39 = vrot.slane %v9063_v20, %v7016_v9 }
 0x694   : > { %v8866_v61 = vpop.permute.xlu1 %3960  ;;  %v8868_v62 = vpop.permute.xlu0 %3962 }
 0x696   : > { %4698 = vrot.lane.b32.xlu1 %v8346_v13, %s6599_s27  ;;  %5673 = vmatmul.mubr.msk.f32.vlgmr.msra.gmra.mrb[40].mxu0 %vm796_vm2, %v5665_v55  ;;  %v3790_v55 = vmul.f32 %v8823_v53, %v3764_v51 }
 0x697   : > { %4684 = vrot.lane.b32.xlu0 %v8348_v47, %s6599_s27  ;;  %6014 = vmatpush1.bf16.msra.mxu0 %v6013_v40  ;;  %v5669_v40 = vld [vmem:[%s9747_s8 + $0x60] sm:$0xff] }
 0x698   : > { %v8899_v49 = vpop.permute.xlu1 %3976  ;;  %v3749_v11 = vpop.permute.xlu0 %3748  ;;  %3659 = vmatprep.mubr.f32.mxu0 %v6592_v0  ;;  %6016 = vmatprep.subr.bf16.mxu0 %v6015_v4 }
 0x699   : > { %v3757_v26 = vsel %vm1343_vm4, %v8802_v50, %v3749_v11  ;;  %v3765_v6 = vsel %vm1343_vm4, %v3749_v11, %v8802_v50 }
 0x69a   : > { %v3793_v46 = vmul.f32 %v8739_v59, %v3757_v26  ;;  %4908 = vrot.lane.b32.xlu1 %v8294_v57, %s6600_s20  ;;  %5674 = vmatmul.mubr.msk.f32.gmra.mrb[42].mxu0 %vm796_vm2, %v5666_v56  ;;  %v3989_v57 = vsel %vm1583_vm5, %v8815_v22, %v8843_v42  ;;  %v3792_v7 = vmul.f32 %v8823_v53, %v3765_v6 }
 0x69b   : > { %4910 = vrot.lane.b32.xlu0 %v8300_v60, %s6600_s20  ;;  %6018 = vmatpush1.bf16.msra.mxu0 %v6017_v31  ;;  %v5667_v60 = vld [vmem:[%s9747_s8 + $0x50] sm:$0xff]  ;;  %v4019_v58 = vmul.f32 %v8916_v48, %v3989_v57 }
 0x69c   : > { %v8937_v59 = vpop.permute.xlu1 %3964  ;;  %v3979_v50 = vpop.permute.xlu0 %3978  ;;  %3665 = vmatprep.mubr.f32.mxu0 %v6592_v0  ;;  %6020 = vmatprep.subr.bf16.mxu0 %v6019_v18  ;;  %v6023_v23 = vpack.c.bf16 %v3793_v46, %v3791_v29  ;;  %v6025_v5 = vpack.c.bf16 %v3792_v7, %v3790_v55  ;;  %v5182_v46 = vld [vmem:[#allocation7] sm:$0xff] }
 0x69d   : > { %v3991_v27 = vsel %vm1583_vm5, %v8868_v62, %v3979_v50  ;;  %v3999_v4 = vsel %vm1583_vm5, %v3979_v50, %v8868_v62  ;;  %v3998_v62 = vsel %vm1583_vm5, %v8899_v49, %v8866_v61 }
 0x69e   : > { %4924 = vrot.lane.b32.xlu1 %v8298_v54, %s6600_s20  ;;  %5675 = vmatmul.mubr.msk.f32.gmra.mrb[44].mxu0 %vm796_vm2, %v5667_v60  ;;  %v5668_v54 = vld [vmem:[%s9747_s8 + $0x58] sm:$0xff]  ;;  %v4023_v36 = vmul.f32 %v8916_v48, %v3991_v27  ;;  %v4022_v26 = vmul.f32 %v9001_v2, %v3999_v4  ;;  %v4020_v29 = vmul.f32 %v9001_v2, %v3998_v62  ;;  %v5686_v4 = vld [vmem:[%s9747_s8 + $0xa8] sm:$0xff] }
 0x69f   : > { %4926 = vrot.lane.b32.xlu0 %v8306_v25, %s6600_s20  ;;  %6022 = vmatpush1.bf16.msra.mxu0 %v6021_v12  ;;  %v6027_v25 = vpack.c.bf16 %v4019_v58, %v4017_v41  ;;  %v5184_v41 = vld [vmem:[#allocation7 + $0x10] sm:$0xff] }
 0x6a0   : > { %v8956_v28 = vpop.permute.xlu1 %3980  ;;  %v3967_v3 = vpop.permute.xlu0 %3966  ;;  %3671 = vmatprep.mubr.f32.mxu0 %v6592_v0  ;;  %6024 = vmatprep.subr.bf16.mxu0 %v6023_v23  ;;  %v6033_v50 = vpack.c.bf16 %v4022_v26, %v4020_v29 }
 0x6a1   : > { %v4000_v15 = vsel %vm1583_vm5, %v8956_v28, %v8937_v59 }
 0x6a2   : > { %4912 = vrot.lane.b32.xlu1 %v8308_v63, %s6600_s20  ;;  %5676 = vmatmul.mubr.msk.f32.gmra.mrb[46].mxu0 %vm796_vm2, %v5668_v54  ;;  %v4024_v58 = vmul.f32 %v9001_v2, %v4000_v15 }
 0x6a3   : > { %4914 = vrot.lane.b32.xlu0 %v8316_v45, %s6600_s20  ;;  %6026 = vmatpush1.bf16.msra.mxu0 %v6025_v5 }
 0x6a4   : > { %v8967_v53 = vpop.permute.xlu1 %3968  ;;  %v3983_v16 = vpop.permute.xlu0 %3982  ;;  %3677 = vmatprep.mubr.f32.mxu0 %v6592_v0  ;;  %6028 = vmatprep.subr.bf16.mxu0 %v6027_v25 }
 0x6a5   : > { %v3993_v14 = vsel %vm1583_vm5, %v3967_v3, %v3983_v16 }
 0x6a6   : > { %4928 = vrot.lane.b32.xlu1 %v8314_v21, %s6600_s20  ;;  %5677 = vmatmul.mubr.msk.f32.gmra.mrb[48].mxu0 %vm796_vm2, %v5669_v40  ;;  %v4027_v31 = vmul.f32 %v8916_v48, %v3993_v14 }
 0x6a7   : > { %4700 = vrot.lane.b32.xlu0 %v8354_v17, %s6599_s27  ;;  %3683 = vmatprep.mubr.f32.mxu0 %v6592_v0 }
 0x6a8   : > { %v8978_v63 = vpop.permute.xlu1 %3984  ;;  %v8980_v45 = vpop.permute.xlu0 %3970 }
 0x6a9   : > { %v3994_v18 = vsel %vm1583_vm5, %v8967_v53, %v8978_v63  ;;  %v4002_v54 = vsel %vm1583_vm5, %v8978_v63, %v8967_v53  ;;  %v5185_v53 = vld [vmem:[#allocation7 + $0x18] sm:$0xff]  ;;  %v5684_v63 = vld [vmem:[%s9747_s8 + $0x98] sm:$0xff] }
 0x6aa   : > { %4916 = vrot.lane.b32.xlu1 %v8324_v35, %s6600_s20  ;;  %5678 = vmatmul.mubr.msk.f32.gmra.mrb[50].mxu0 %vm796_vm2, %v5670_v44  ;;  %v3997_v35 = vsel %vm1583_vm5, %v8843_v42, %v8815_v22  ;;  %v3990_v42 = vsel %vm1583_vm5, %v8866_v61, %v8899_v49  ;;  %v4001_v61 = vsel %vm1583_vm5, %v3983_v16, %v3967_v3  ;;  %v5683_v3 = vld [vmem:[%s9747_s8 + $0x90] sm:$0xff] }
 0x6ab   : > { %4930 = vrot.lane.b32.xlu0 %v8322_v33, %s6600_s20  ;;  %3689 = vmatprep.mubr.f32.mxu0 %v6592_v0  ;;  %v3996_v33 = vsel %vm1583_vm5, %v8841_v19, %v8813_v38  ;;  %v5672_v38 = vld [vmem:[%s9747_s8 + $0x78] sm:$0xff]  ;;  %v4021_v56 = vmul.f32 %v8916_v48, %v3990_v42  ;;  %v4026_v60 = vmul.f32 %v9001_v2, %v4001_v61 }
 0x6ac   : > { %v8991_v21 = vpop.permute.xlu1 %4194  ;;  %v4016_v22 = vmul.f32 %v9001_v2, %v3996_v33  ;;  %v4029_v12 = vmul.f32 %v8916_v48, %v3994_v18 }
 0x6ad   : > { %v8997_v52 = vpop.permute.xlu0 %4196  ;;  %v6031_v49 = vpack.c.bf16 %v4023_v36, %v4021_v56  ;;  %v6037_v16 = vpack.c.bf16 %v4026_v60, %v4024_v58  ;;  %v9159_v56 = vrot.slane %v9063_v20, %v7018_v10  ;;  %v5688_v20 = vld [vmem:[%s9747_s8 + $0xb8] sm:$0xff] }
 0x6ae   : > { %4932 = vrot.lane.b32.xlu1 %v8330_v1, %s6600_s20  ;;  %5679 = vmatmul.mubr.msk.f32.gmra.mrb[52].mxu0 %vm796_vm2, %v5671_v43  ;;  %v4028_v43 = vmul.f32 %v9001_v2, %v4002_v54 }
 0x6af   : > { %4918 = vrot.lane.b32.xlu0 %v8332_v34, %s6600_s20  ;;  %3695 = vmatprep.mubr.f32.mxu0 %v6592_v0  ;;  %v4018_v34 = vmul.f32 %v9001_v2, %v3997_v35 }
 0x6b0   : > { %v9019_v1 = vpop.permute.xlu1 %4210 }
 0x6b1   : > { %v9025_v19 = vpop.permute.xlu0 %4212  ;;  %v6029_v30 = vpack.c.bf16 %v4018_v34, %v4016_v22  ;;  %v4234_v55 = vsel %vm1823_vm6, %v9019_v1, %v8991_v21 }
 0x6b2   : > { %4920 = vrot.lane.b32.xlu1 %v8340_v32, %s6600_s20  ;;  %5680 = vmatmul.mubr.msk.f32.gmra.mrb[54].mxu0 %vm796_vm2, %v5672_v38  ;;  %v5681_v32 = vld [vmem:[%s9747_s8 + $0x80] sm:$0xff] }
 0x6b3   : > { %4934 = vrot.lane.b32.xlu0 %v8338_v37, %s6600_s20  ;;  %3891 = vmatprep.mubr.f32.mxu0 %v6592_v0  ;;  %v3992_v37 = vsel %vm1583_vm5, %v8937_v59, %v8956_v28  ;;  %v4235_v28 = vsel %vm1823_vm6, %v9025_v19, %v8997_v52 }
 0x6b4   : > { %v9044_v11 = vpop.permute.xlu1 %4198  ;;  %v4025_v6 = vmul.f32 %v8916_v48, %v3992_v37  ;;  %v4257_v44 = vmul.f32 %v9090_v39, %v4235_v28  ;;  %v4226_v37 = vsel %vm1823_vm6, %v8991_v21, %v9019_v1 }
 0x6b5   : > { %v9059_v24 = vpop.permute.xlu0 %4200  ;;  %v4254_v1 = vmul.f32 %v9159_v56, %v4226_v37 }
 0x6b6   : > { %4936 = vrot.lane.b32.xlu1 %v8346_v13, %s6600_s20  ;;  %5689 = vmatmul.mubr.msk.f32.vlgmr.msra.gmra.mrb[40].mxu0 %vm796_vm2, %v5681_v32  ;;  %v6035_v23 = vpack.c.bf16 %v4027_v31, %v4025_v6  ;;  %v5687_v32 = vld [vmem:[%s9747_s8 + $0xb0] sm:$0xff]  ;;  %v5697_v6 = vld [vmem:[%s9747_s8 + $0xc0] sm:$0xff] }
 0x6b7   : > { %4922 = vrot.lane.b32.xlu0 %v8348_v47, %s6600_s20  ;;  %6030 = vmatpush1.bf16.msra.mxu0 %v6029_v30  ;;  %v5682_v47 = vld [vmem:[%s9747_s8 + $0x88] sm:$0xff]  ;;  %v4227_v30 = vsel %vm1823_vm6, %v8997_v52, %v9025_v19 }
 0x6b8   : > { %v9078_v13 = vpop.permute.xlu1 %4214  ;;  %3897 = vmatprep.mubr.f32.mxu0 %v6592_v0  ;;  %6032 = vmatprep.subr.bf16.mxu0 %v6031_v49  ;;  %v4256_v52 = vmul.f32 %v9159_v56, %v4227_v30 }
 0x6b9   : > { %v3987_v57 = vpop.permute.xlu0 %3986  ;;  %v4236_v19 = vsel %vm1823_vm6, %v9078_v13, %v9044_v11 }
 0x6ba   : > { %v3995_v51 = vsel %vm1583_vm5, %v8980_v45, %v3987_v57  ;;  %5188 = vperm.xlu1 %6451, %v5182_v46   ;;  %v4003_v59 = vsel %vm1583_vm5, %v3987_v57, %v8980_v45  ;;  %5690 = vmatmul.mubr.msk.f32.gmra.mrb[42].mxu0 %vm796_vm2, %v5682_v47  ;;  %v4255_v45 = vmul.f32 %v9090_v39, %v4234_v55 }
 0x6bb   : > { %v4031_v7 = vmul.f32 %v8916_v48, %v3995_v51  ;;  %4938 = vrot.lane.b32.xlu0 %v8354_v17, %s6600_s20  ;;  %6034 = vmatpush1.bf16.msra.mxu0 %v6033_v50  ;;  %v5183_v17 = vld [vmem:[#allocation7 + $0x8] sm:$0xff]  ;;  %v4030_v40 = vmul.f32 %v9001_v2, %v4003_v59  ;;  %v4259_v18 = vmul.f32 %v9090_v39, %v4236_v19  ;;  %v5703_v19 = vld [vmem:[%s9747_s8 + $0xf0] sm:$0xff]  ;;  %s9720_s20 = scalar_lea.vmem %s9750_s11, %s6812_s25 }
 0x6bc   : > { %v9113_v48 = vpop.permute.xlu1 %4202  ;;  %3903 = vmatprep.mubr.f32.mxu0 %v6592_v0  ;;  %6036 = vmatprep.subr.bf16.mxu0 %v6035_v23  ;;  %v6043_v38 = vpack.c.bf16 %v4257_v44, %v4255_v45  ;;  %v5685_v2 = vld [vmem:[%s9747_s8 + $0xa0] sm:$0xff]  ;;  %v6045_v15 = vpack.c.bf16 %v4256_v52, %v4254_v1  ;;  %v9215_v23 = vld [vmem:[#allocation2 + $0xc] sm:$0x3] }
 0x6bd   : > { %v4217_v5 = vpop.permute.xlu0 %4216  ;;  %v6039_v25 = vpack.c.bf16 %v4031_v7, %v4029_v12  ;;  %v6041_v27 = vpack.c.bf16 %v4030_v40, %v4028_v43  ;;  %v5698_v7 = vld [vmem:[%s9747_s8 + $0xc8] sm:$0xff] }
 0x6be   : > { %5198 = vperm.xlu1 %6451, %v5184_v41   ;;  %5691 = vmatmul.mubr.msk.f32.gmra.mrb[44].mxu0 %vm796_vm2, %v5683_v3  ;;  %v4237_v26 = vsel %vm1823_vm6, %v4217_v5, %v9059_v24  ;;  %v4229_v61 = vsel %vm1823_vm6, %v9059_v24, %v4217_v5  ;;  %v4228_v24 = vsel %vm1823_vm6, %v9044_v11, %v9078_v13 }
 0x6bf   : > { %5193 = vperm.xlu0 %6450, %v5183_v17   ;;  %6038 = vmatpush1.bf16.msra.mxu0 %v6037_v16  ;;  %v4261_v49 = vmul.f32 %v9090_v39, %v4237_v26  ;;  %v4260_v57 = vmul.f32 %v9159_v56, %v4229_v61  ;;  %v4258_v13 = vmul.f32 %v9159_v56, %v4228_v24 }
 0x6c0   : > { %v9128_v33 = vpop.permute.xlu1 %4218  ;;  %3909 = vmatprep.mubr.f32.mxu0 %v6592_v0  ;;  %6040 = vmatprep.subr.bf16.mxu0 %v6039_v25  ;;  %v9237_v3 = vrot.slane %v9215_v23, %v7016_v9 }
 0x6c1   : > { %v4205_v35 = vpop.permute.xlu0 %4204  ;;  %v4238_v50 = vsel %vm1823_vm6, %v9128_v33, %v9113_v48  ;;  %v6047_v11 = vpack.c.bf16 %v4261_v49, %v4259_v18  ;;  %v4230_v41 = vsel %vm1823_vm6, %v9113_v48, %v9128_v33  ;;  %v6049_v28 = vpack.c.bf16 %v4260_v57, %v4258_v13 }
 0x6c2   : > { %5692 = vmatmul.mubr.msk.f32.gmra.mrb[46].mxu0 %vm796_vm2, %v5684_v63  ;;  %v4263_v58 = vmul.f32 %v9090_v39, %v4238_v50  ;;  %v4262_v40 = vmul.f32 %v9159_v56, %v4230_v41  ;;  %v9299_v49 = vrot.slane %v9215_v23, %v7018_v10  ;;  %v5713_v23 = vld [vmem:[%s9747_s8 + $0x140] sm:$0xff] }
 0x6c3   : > { %5203 = vperm.xlu0 %6450, %v5185_v53   ;;  %6042 = vmatpush1.bf16.msra.mxu0 %v6041_v27 }
 0x6c4   : > { %v9135_v22 = vpop.permute.xlu1 %4206  ;;  %3915 = vmatprep.mubr.f32.mxu0 %v6592_v0  ;;  %6044 = vmatprep.subr.bf16.mxu0 %v6043_v38 }
 0x6c5   : > { %v4221_v34 = vpop.permute.xlu0 %4220 }
 0x6c6   : > { %5693 = vmatmul.mubr.msk.f32.gmra.mrb[48].mxu0 %vm796_vm2, %v5685_v2  ;;  %v4239_v46 = vsel %vm1823_vm6, %v4221_v34, %v4205_v35  ;;  %v4231_v60 = vsel %vm1823_vm6, %v4205_v35, %v4221_v34 }
 0x6c7   : > { %3921 = vmatprep.mubr.f32.mxu0 %v6592_v0  ;;  %v4265_v51 = vmul.f32 %v9090_v39, %v4239_v46  ;;  %v4264_v17 = vmul.f32 %v9159_v56, %v4231_v60 }
 0x6c8   : > { %v9142_v42 = vpop.permute.xlu1 %4222 }
 0x6c9   : > { %v4209_v36 = vpop.permute.xlu0 %4208  ;;  %v4240_v12 = vsel %vm1823_vm6, %v9142_v42, %v9135_v22  ;;  %v6051_v16 = vpack.c.bf16 %v4265_v51, %v4263_v58  ;;  %v4232_v33 = vsel %vm1823_vm6, %v9135_v22, %v9142_v42  ;;  %v6053_v35 = vpack.c.bf16 %v4264_v17, %v4262_v40  ;;  %v5700_v22 = vld [vmem:[%s9747_s8 + $0xd8] sm:$0xff] }
 0x6ca   : > { %5694 = vmatmul.mubr.msk.f32.gmra.mrb[50].mxu0 %vm796_vm2, %v5686_v4  ;;  %v4267_v5 = vmul.f32 %v9090_v39, %v4240_v12  ;;  %v4266_v34 = vmul.f32 %v9159_v56, %v4232_v33 }
 0x6cb   : > { %3927 = vmatprep.mubr.f32.mxu0 %v6592_v0 }
 0x6cc   : > { %v9149_v14 = vpop.permute.xlu1 %4432 }
 0x6cd   : > { %v9155_v62 = vpop.permute.xlu0 %4434 }
 0x6ce   : > { %5695 = vmatmul.mubr.msk.f32.gmra.mrb[52].mxu0 %vm796_vm2, %v5687_v32 }
 0x6cf   : > { %3933 = vmatprep.mubr.f32.mxu0 %v6592_v0 }
 0x6d0   : > { %v9173_v31 = vpop.permute.xlu1 %4448 }
 0x6d1   : > { %v9179_v21 = vpop.permute.xlu0 %4450  ;;  %v4472_v45 = vsel %vm2063_vm7, %v9173_v31, %v9149_v14  ;;  %v4464_v46 = vsel %vm2063_vm7, %v9149_v14, %v9173_v31 }
 0x6d2   : > { %5696 = vmatmul.mubr.msk.f32.gmra.mrb[54].mxu0 %vm796_vm2, %v5688_v20  ;;  %v4473_v44 = vsel %vm2063_vm7, %v9179_v21, %v9155_v62  ;;  %v4493_v38 = vmul.f32 %v9237_v3, %v4472_v45  ;;  %v5702_v20 = vld [vmem:[%s9747_s8 + $0xe8] sm:$0xff]  ;;  %v4492_v31 = vmul.f32 %v9299_v49, %v4464_v46 }
 0x6d3   : > { %4129 = vmatprep.mubr.f32.mxu0 %v6592_v0  ;;  %v4495_v2 = vmul.f32 %v9237_v3, %v4473_v44 }
 0x6d4   : > { %v9194_v29 = vpop.permute.xlu1 %4436 }
 0x6d5   : > { %v9205_v47 = vpop.permute.xlu0 %4438  ;;  %v6059_v32 = vpack.c.bf16 %v4495_v2, %v4493_v38 }
 0x6d6   : > { %5705 = vmatmul.mubr.msk.f32.vlgmr.msra.gmra.mrb[40].mxu0 %vm796_vm2, %v5697_v6  ;;  %v4465_v6 = vsel %vm2063_vm7, %v9155_v62, %v9179_v21 }
 0x6d7   : > { %6046 = vmatpush1.bf16.msra.mxu0 %v6045_v15  ;;  %4135 = vmatprep.mubr.f32.mxu0 %v6592_v0  ;;  %v5704_v15 = vld [vmem:[%s9747_s8 + $0xf8] sm:$0xff]  ;;  %v4494_v62 = vmul.f32 %v9299_v49, %v4465_v6 }
 0x6d8   : > { %v9223_v59 = vpop.permute.xlu1 %4452  ;;  %6048 = vmatprep.subr.bf16.mxu0 %v6047_v11 }
 0x6d9   : > { %v4225_v55 = vpop.permute.xlu0 %4224  ;;  %v4474_v21 = vsel %vm2063_vm7, %v9223_v59, %v9194_v29  ;;  %v6061_v12 = vpack.c.bf16 %v4494_v62, %v4492_v31  ;;  %v4956_v62 = vld [vmem:[#allocation2 + $0x10] sm:$0x3] }
 0x6da   : > { %v4241_v54 = vsel %vm1823_vm6, %v4225_v55, %v4209_v36  ;;  %v4233_v25 = vsel %vm1823_vm6, %v4209_v36, %v4225_v55  ;;  %5706 = vmatmul.mubr.msk.f32.gmra.mrb[42].mxu0 %vm796_vm2, %v5698_v7  ;;  %v4497_v11 = vmul.f32 %v9237_v3, %v4474_v21 }
 0x6db   : > { %v4269_v48 = vmul.f32 %v9090_v39, %v4241_v54  ;;  %6050 = vmatpush1.bf16.msra.mxu0 %v6049_v28  ;;  %4141 = vmatprep.mubr.f32.mxu0 %v6592_v0  ;;  %v5699_v39 = vld [vmem:[%s9747_s8 + $0xd0] sm:$0xff]  ;;  %v4268_v27 = vmul.f32 %v9159_v56, %v4233_v25  ;;  %v5701_v56 = vld [vmem:[%s9747_s8 + $0xe0] sm:$0xff]  ;;  %v4718_v28 = vld [vmem:[#allocation2 + $0xe] sm:$0x3] }
 0x6dc   : > { %v9255_v43 = vpop.permute.xlu1 %4440  ;;  %6052 = vmatprep.subr.bf16.mxu0 %v6051_v16  ;;  %v9372_v44 = vrot.slane %v4718_v28, %v7016_v9  ;;  %v9429_v21 = vrot.slane %v4718_v28, %v7018_v10 }
 0x6dd   : > { %v4455_v53 = vpop.permute.xlu0 %4454  ;;  %v6055_v63 = vpack.c.bf16 %v4269_v48, %v4267_v5  ;;  %v6057_v36 = vpack.c.bf16 %v4268_v27, %v4266_v34  ;;  %v5714_v5 = vld [vmem:[%s9747_s8 + $0x148] sm:$0xff] }
 0x6de   : > { %5707 = vmatmul.mubr.msk.f32.gmra.mrb[44].mxu0 %vm796_vm2, %v5699_v39  ;;  %v4475_v24 = vsel %vm2063_vm7, %v4455_v53, %v9205_v47  ;;  %v4467_v57 = vsel %vm2063_vm7, %v9205_v47, %v4455_v53  ;;  %v4466_v47 = vsel %vm2063_vm7, %v9194_v29, %v9223_v59 }
 0x6df   : > { %6054 = vmatpush1.bf16.msra.mxu0 %v6053_v35  ;;  %4147 = vmatprep.mubr.f32.mxu0 %v6592_v0  ;;  %v4499_v50 = vmul.f32 %v9237_v3, %v4475_v24  ;;  %v4498_v7 = vmul.f32 %v9299_v49, %v4467_v57  ;;  %v4496_v59 = vmul.f32 %v9299_v49, %v4466_v47 }
 0x6e0   : > { %v4457_v4 = vpop.permute.xlu1 %4456  ;;  %6056 = vmatprep.subr.bf16.mxu0 %v6055_v63 }
 0x6e1   : > { %v4443_v42 = vpop.permute.xlu0 %4442  ;;  %v4476_v41 = vsel %vm2063_vm7, %v4457_v4, %v9255_v43  ;;  %v6063_v29 = vpack.c.bf16 %v4499_v50, %v4497_v11  ;;  %v4468_v25 = vsel %vm2063_vm7, %v9255_v43, %v4457_v4  ;;  %v6065_v40 = vpack.c.bf16 %v4498_v7, %v4496_v59  ;;  %v5719_v50 = vld [vmem:[%s9747_s8 + $0x170] sm:$0xff] }
 0x6e2   : > { %5708 = vmatmul.mubr.msk.f32.gmra.mrb[46].mxu0 %vm796_vm2, %v5700_v22  ;;  %v4501_v48 = vmul.f32 %v9237_v3, %v4476_v41  ;;  %v4500_v35 = vmul.f32 %v9299_v49, %v4468_v25  ;;  %v9444_v11 = vrot.slane %v4956_v62, %v7018_v10 }
 0x6e3   : > { %6058 = vmatpush1.bf16.msra.mxu0 %v6057_v36  ;;  %4153 = vmatprep.mubr.f32.mxu0 %v6592_v0 }
 0x6e4   : > { %v9275_v37 = vpop.permute.xlu1 %4444  ;;  %6060 = vmatprep.subr.bf16.mxu0 %v6059_v32 }
 0x6e5   : > { %v4459_v30 = vpop.permute.xlu0 %4458 }
 0x6e6   : > { %5709 = vmatmul.mubr.msk.f32.gmra.mrb[48].mxu0 %vm796_vm2, %v5701_v56  ;;  %v4477_v60 = vsel %vm2063_vm7, %v4459_v30, %v4443_v42  ;;  %v4469_v58 = vsel %vm2063_vm7, %v4443_v42, %v4459_v30 }
 0x6e7   : > { %4159 = vmatprep.mubr.f32.mxu0 %v6592_v0  ;;  %v4503_v55 = vmul.f32 %v9237_v3, %v4477_v60  ;;  %v4502_v45 = vmul.f32 %v9299_v49, %v4469_v58 }
 0x6e8   : > { %v9282_v26 = vpop.permute.xlu1 %4460 }
 0x6e9   : > { %v4447_v1 = vpop.permute.xlu0 %4446  ;;  %v4478_v17 = vsel %vm2063_vm7, %v9282_v26, %v9275_v37  ;;  %v6067_v63 = vpack.c.bf16 %v4503_v55, %v4501_v48  ;;  %v4470_v34 = vsel %vm2063_vm7, %v9275_v37, %v9282_v26  ;;  %v6069_v42 = vpack.c.bf16 %v4502_v45, %v4500_v35  ;;  %v5716_v37 = vld [vmem:[%s9747_s8 + $0x158] sm:$0xff]  ;;  %v5729_v45 = vld [vmem:[%s9747_s8 + $0x180] sm:$0xff] }
 0x6ea   : > { %5710 = vmatmul.mubr.msk.f32.gmra.mrb[50].mxu0 %vm796_vm2, %v5702_v20  ;;  %v4505_v33 = vmul.f32 %v9237_v3, %v4478_v17  ;;  %v4504_v30 = vmul.f32 %v9299_v49, %v4470_v34 }
 0x6eb   : > { %4165 = vmatprep.mubr.f32.mxu0 %v6592_v0 }
 0x6ec   : > { %v9289_v52 = vpop.permute.xlu1 %4670 }
 0x6ed   : > { %v9295_v61 = vpop.permute.xlu0 %4672 }
 0x6ee   : > { %5711 = vmatmul.mubr.msk.f32.gmra.mrb[52].mxu0 %vm796_vm2, %v5703_v19 }
 0x6ef   : > { %4171 = vmatprep.mubr.f32.mxu0 %v6592_v0 }
 0x6f0   : > { %v9313_v18 = vpop.permute.xlu1 %4686 }
 0x6f1   : > { %v9319_v14 = vpop.permute.xlu0 %4688  ;;  %v4710_v27 = vsel %vm2303_vm8, %v9313_v18, %v9289_v52  ;;  %v4702_v60 = vsel %vm2303_vm8, %v9289_v52, %v9313_v18 }
 0x6f2   : > { %5712 = vmatmul.mubr.msk.f32.gmra.mrb[54].mxu0 %vm796_vm2, %v5704_v15  ;;  %v4711_v38 = vsel %vm2303_vm8, %v9319_v14, %v9295_v61  ;;  %v4731_v32 = vmul.f32 %v9372_v44, %v4710_v27  ;;  %v5718_v15 = vld [vmem:[%s9747_s8 + $0x168] sm:$0xff]  ;;  %v4703_v47 = vsel %vm2303_vm8, %v9295_v61, %v9319_v14  ;;  %v4730_v7 = vmul.f32 %v9429_v21, %v4702_v60  ;;  %v5720_v61 = vld [vmem:[%s9747_s8 + $0x178] sm:$0xff] }
 0x6f3   : > { %4367 = vmatprep.mubr.f32.mxu0 %v6592_v0  ;;  %v4733_v56 = vmul.f32 %v9372_v44, %v4711_v38  ;;  %v4732_v10 = vmul.f32 %v9429_v21, %v4703_v47 }
 0x6f4   : > { %v9334_v51 = vpop.permute.xlu1 %4674 }
 0x6f5   : > { %v9345_v13 = vpop.permute.xlu0 %4676  ;;  %v6075_v19 = vpack.c.bf16 %v4733_v56, %v4731_v32 }
 0x6f6   : > { %5721 = vmatmul.mubr.msk.f32.vlgmr.msra.gmra.mrb[40].mxu0 %vm796_vm2, %v5713_v23 }
 0x6f7   : > { %6062 = vmatpush1.bf16.msra.mxu0 %v6061_v12  ;;  %4373 = vmatprep.mubr.f32.mxu0 %v6592_v0  ;;  %v9447_v12 = vrot.slane %v4956_v62, %v7016_v9 }
 0x6f8   : > { %v9360_v54 = vpop.permute.xlu1 %4690  ;;  %6064 = vmatprep.subr.bf16.mxu0 %v6063_v29 }
 0x6f9   : > { %v4463_v16 = vpop.permute.xlu0 %4462  ;;  %v4712_v9 = vsel %vm2303_vm8, %v9360_v54, %v9334_v51 }
 0x6fa   : > { %v4479_v39 = vsel %vm2063_vm7, %v4463_v16, %v4447_v1  ;;  %v4471_v53 = vsel %vm2063_vm7, %v4447_v1, %v4463_v16  ;;  %5722 = vmatmul.mubr.msk.f32.gmra.mrb[42].mxu0 %vm796_vm2, %v5714_v5 }
 0x6fb   : > { %v4507_v43 = vmul.f32 %v9237_v3, %v4479_v39  ;;  %6066 = vmatpush1.bf16.msra.mxu0 %v6065_v40  ;;  %4379 = vmatprep.mubr.f32.mxu0 %v6592_v0  ;;  %v5715_v3 = vld [vmem:[%s9747_s8 + $0x150] sm:$0xff]  ;;  %v4506_v36 = vmul.f32 %v9299_v49, %v4471_v53  ;;  %v5717_v49 = vld [vmem:[%s9747_s8 + $0x160] sm:$0xff]  ;;  %v4735_v39 = vmul.f32 %v9372_v44, %v4712_v9 }
 0x6fc   : > { %v9390_v2 = vpop.permute.xlu1 %4678  ;;  %6068 = vmatprep.subr.bf16.mxu0 %v6067_v63  ;;  %v6077_v63 = vpack.c.bf16 %v4732_v10, %v4730_v7  ;;  %v5732_v10 = vld [vmem:[%s9747_s8 + $0x198] sm:$0xff] }
 0x6fd   : > { %v4693_v4 = vpop.permute.xlu0 %4692  ;;  %v6071_v22 = vpack.c.bf16 %v4507_v43, %v4505_v33  ;;  %v6073_v1 = vpack.c.bf16 %v4506_v36, %v4504_v30 }
 0x6fe   : > { %5723 = vmatmul.mubr.msk.f32.gmra.mrb[44].mxu0 %vm796_vm2, %v5715_v3  ;;  %v4713_v52 = vsel %vm2303_vm8, %v4693_v4, %v9345_v13  ;;  %v4705_v17 = vsel %vm2303_vm8, %v9345_v13, %v4693_v4  ;;  %v4704_v13 = vsel %vm2303_vm8, %v9334_v51, %v9360_v54 }
 0x6ff   : > { %6070 = vmatpush1.bf16.msra.mxu0 %v6069_v42  ;;  %4385 = vmatprep.mubr.f32.mxu0 %v6592_v0  ;;  %v4737_v5 = vmul.f32 %v9372_v44, %v4713_v52  ;;  %v4736_v35 = vmul.f32 %v9429_v21, %v4705_v17  ;;  %v4734_v3 = vmul.f32 %v9429_v21, %v4704_v13 }
 0x700   : > { %v9405_v20 = vpop.permute.xlu1 %4694  ;;  %6072 = vmatprep.subr.bf16.mxu0 %v6071_v22  ;;  %v5730_v22 = vld [vmem:[%s9747_s8 + $0x188] sm:$0xff] }
 0x701   : > { %v4681_v26 = vpop.permute.xlu0 %4680  ;;  %v4714_v27 = vsel %vm2303_vm8, %v9405_v20, %v9390_v2  ;;  %v6079_v54 = vpack.c.bf16 %v4737_v5, %v4735_v39  ;;  %v4706_v42 = vsel %vm2303_vm8, %v9390_v2, %v9405_v20  ;;  %v6081_v56 = vpack.c.bf16 %v4736_v35, %v4734_v3 }
 0x702   : > { %5724 = vmatmul.mubr.msk.f32.gmra.mrb[46].mxu0 %vm796_vm2, %v5716_v37  ;;  %v4739_v36 = vmul.f32 %v9372_v44, %v4714_v27  ;;  %v5735_v27 = vld [vmem:[%s9747_s8 + $0x1b0] sm:$0xff] }
 0x703   : > { %6074 = vmatpush1.bf16.msra.mxu0 %v6073_v1  ;;  %4391 = vmatprep.mubr.f32.mxu0 %v6592_v0 }
 0x704   : > { %v9412_v46 = vpop.permute.xlu1 %4682  ;;  %6076 = vmatprep.subr.bf16.mxu0 %v6075_v19  ;;  %v4738_v19 = vmul.f32 %v9429_v21, %v4706_v42  ;;  %v5736_v42 = vld [vmem:[%s9747_s8 + $0x1b8] sm:$0xff] }
 0x705   : > { %v4697_v6 = vpop.permute.xlu0 %4696 }
 0x706   : > { %5725 = vmatmul.mubr.msk.f32.gmra.mrb[48].mxu0 %vm796_vm2, %v5717_v49  ;;  %v4715_v16 = vsel %vm2303_vm8, %v4697_v6, %v4681_v26  ;;  %v4707_v38 = vsel %vm2303_vm8, %v4681_v26, %v4697_v6 }
 0x707   : > { %4397 = vmatprep.mubr.f32.mxu0 %v6592_v0  ;;  %v4741_v51 = vmul.f32 %v9372_v44, %v4715_v16  ;;  %v4740_v30 = vmul.f32 %v9429_v21, %v4707_v38 }
 0x708   : > { %v9419_v24 = vpop.permute.xlu1 %4698 }
 0x709   : > { %v9425_v31 = vpop.permute.xlu0 %4684  ;;  %v4716_v34 = vsel %vm2303_vm8, %v9419_v24, %v9412_v46  ;;  %v6083_v20 = vpack.c.bf16 %v4741_v51, %v4739_v36 }
 0x70a   : > { %5726 = vmatmul.mubr.msk.f32.gmra.mrb[50].mxu0 %vm796_vm2, %v5718_v15  ;;  %v4743_v26 = vmul.f32 %v9372_v44, %v4716_v34 }
 0x70b   : > { %4403 = vmatprep.mubr.f32.mxu0 %v6592_v0 }
 0x70c   : > { %v4909_v57 = vpop.permute.xlu1 %4908 }
 0x70d   : > { %v4911_v23 = vpop.permute.xlu0 %4910 }
 0x70e   : > { %5727 = vmatmul.mubr.msk.f32.gmra.mrb[52].mxu0 %vm796_vm2, %v5719_v50  ;;  %v6085_v50 = vpack.c.bf16 %v4740_v30, %v4738_v19  ;;  %v5764_v30 = vld [vmem:[%s9747_s8 + $0x218] sm:$0xff]  ;;  %v5767_v19 = vld [vmem:[%s9747_s8 + $0x230] sm:$0xff] }
 0x70f   : > { %4409 = vmatprep.mubr.f32.mxu0 %v6592_v0 }
 0x710   : > { %v4925_v18 = vpop.permute.xlu1 %4924 }
 0x711   : > { %v4940_v14 = vsel %vm2543_vm9, %v4909_v57, %v4925_v18  ;;  %v4948_v41 = vsel %vm2543_vm9, %v4925_v18, %v4909_v57  ;;  %v4927_v58 = vpop.permute.xlu0 %4926 }
 0x712   : > { %v4968_v55 = vmul.f32 %v9444_v11, %v4940_v14  ;;  %v4969_v28 = vmul.f32 %v9447_v12, %v4948_v41  ;;  %v4941_v29 = vsel %vm2543_vm9, %v4911_v23, %v4927_v58  ;;  %v4949_v59 = vsel %vm2543_vm9, %v4927_v58, %v4911_v23  ;;  %5728 = vmatmul.mubr.msk.f32.gmra.mrb[54].mxu0 %vm796_vm2, %v5720_v61 }
 0x713   : > { %v4970_v25 = vmul.f32 %v9444_v11, %v4941_v29  ;;  %v4971_v48 = vmul.f32 %v9447_v12, %v4949_v59  ;;  %4605 = vmatprep.mubr.f32.mxu0 %v6592_v0  ;;  %v5733_v29 = vld [vmem:[%s9747_s8 + $0x1a0] sm:$0xff] }
 0x714   : > { %v4913_v40 = vpop.permute.xlu1 %4912 }
 0x715   : > { %v9491_v33 = vpack.c.bf16 %v4970_v25, %v4968_v55  ;;  %v4915_v53 = vpop.permute.xlu0 %4914  ;;  %v9493_v43 = vpack.c.bf16 %v4971_v48, %v4969_v28 }
 0x716   : > { %5737 = vmatmul.mubr.msk.f32.vlgmr.msra.gmra.mrb[40].mxu0 %vm796_vm2, %v5729_v45  ;;  %v5734_v45 = vld [vmem:[%s9747_s8 + $0x1a8] sm:$0xff] }
 0x717   : > { %6123 = vmatprep.subr.bf16.mxu1 %v9493_v43  ;;  %6078 = vmatpush1.bf16.msra.mxu0 %v6077_v63 }
 0x718   : > { %6127 = vmatpush1.bf16.msra.mxu1 %v9491_v33  ;;  %v4929_v4 = vpop.permute.xlu1 %4928  ;;  %6080 = vmatprep.subr.bf16.mxu0 %v6079_v54 }
 0x719   : > { %v4701_v32 = vpop.permute.xlu0 %4700  ;;  %4611 = vmatprep.mubr.f32.mxu0 %v6592_v0  ;;  %v4942_v49 = vsel %vm2543_vm9, %v4913_v40, %v4929_v4  ;;  %v4950_v6 = vsel %vm2543_vm9, %v4929_v4, %v4913_v40 }
 0x71a   : > { %v4717_v37 = vsel %vm2303_vm8, %v4701_v32, %v9425_v31  ;;  %v4709_v1 = vsel %vm2303_vm8, %v9425_v31, %v4701_v32  ;;  %5738 = vmatmul.mubr.msk.f32.gmra.mrb[42].mxu0 %vm796_vm2, %v5730_v22  ;;  %v5731_v31 = vld [vmem:[%s9747_s8 + $0x190] sm:$0xff]  ;;  %v4972_v7 = vmul.f32 %v9444_v11, %v4942_v49  ;;  %v4973_v52 = vmul.f32 %v9447_v12, %v4950_v6  ;;  %v5768_v6 = vld [vmem:[%s9747_s8 + $0x238] sm:$0xff] }
 0x71b   : > { %v4745_v2 = vmul.f32 %v9372_v44, %v4717_v37  ;;  %6082 = vmatpush1.bf16.msra.mxu0 %v6081_v56  ;;  %4617 = vmatprep.mubr.f32.mxu0 %v6592_v0  ;;  %v4708_v44 = vsel %vm2303_vm8, %v9412_v46, %v9419_v24  ;;  %v4744_v60 = vmul.f32 %v9429_v21, %v4709_v1  ;;  %v5763_v56 = vld [vmem:[%s9747_s8 + $0x210] sm:$0xff]  ;;  %v5748_v37 = vld [vmem:[%s9747_s8 + $0x1d8] sm:$0xff]  ;;  %v5749_v1 = vld [vmem:[%s9747_s8 + $0x1e0] sm:$0xff] }
 0x71c   : > { %v4917_v15 = vpop.permute.xlu1 %4916  ;;  %6084 = vmatprep.subr.bf16.mxu0 %v6083_v20  ;;  %v4742_v24 = vmul.f32 %v9429_v21, %v4708_v44  ;;  %v5750_v20 = vld [vmem:[%s9747_s8 + $0x1e8] sm:$0xff]  ;;  %v5751_v49 = vld [vmem:[%s9747_s8 + $0x1f0] sm:$0xff] }
 0x71d   : > { %v4931_v62 = vpop.permute.xlu0 %4930  ;;  %v6087_v57 = vpack.c.bf16 %v4745_v2, %v4743_v26  ;;  %v5765_v26 = vld [vmem:[%s9747_s8 + $0x220] sm:$0xff]  ;;  %v5766_v2 = vld [vmem:[%s9747_s8 + $0x228] sm:$0xff] }
 0x71e   : > { %v4943_v23 = vsel %vm2543_vm9, %v4915_v53, %v4931_v62  ;;  %v4951_v47 = vsel %vm2543_vm9, %v4931_v62, %v4915_v53  ;;  %5739 = vmatmul.mubr.msk.f32.gmra.mrb[44].mxu0 %vm796_vm2, %v5731_v31  ;;  %v6089_v58 = vpack.c.bf16 %v4744_v60, %v4742_v24  ;;  %v5761_v31 = vld [vmem:[%s9747_s8 + $0x200] sm:$0xff] }
 0x71f   : > { %v4974_v18 = vmul.f32 %v9444_v11, %v4943_v23  ;;  %v4975_v46 = vmul.f32 %v9447_v12, %v4951_v47  ;;  %6086 = vmatpush1.bf16.msra.mxu0 %v6085_v50  ;;  %4623 = vmatprep.mubr.f32.mxu0 %v6592_v0 }
 0x720   : > { %v4933_v61 = vpop.permute.xlu1 %4932  ;;  %6088 = vmatprep.subr.bf16.mxu0 %v6087_v57 }
 0x721   : > { %v9558_v9 = vpack.c.bf16 %v4974_v18, %v4972_v7  ;;  %v4919_v14 = vpop.permute.xlu0 %4918  ;;  %v6095_v41 = vpack.c.bf16 %v4975_v46, %v4973_v52  ;;  %v4944_v21 = vsel %vm2543_vm9, %v4917_v15, %v4933_v61  ;;  %v4952_v55 = vsel %vm2543_vm9, %v4933_v61, %v4917_v15  ;;  %v5752_v15 = vld [vmem:[%s9747_s8 + $0x1f8] sm:$0xff] }
 0x722   : > { %5740 = vmatmul.mubr.msk.f32.gmra.mrb[46].mxu0 %vm796_vm2, %v5732_v10  ;;  %v4976_v25 = vmul.f32 %v9444_v11, %v4944_v21  ;;  %v4977_v48 = vmul.f32 %v9447_v12, %v4952_v55 }
 0x723   : > { %6124 = vmatprep.subr.bf16.mxu1 %v6095_v41  ;;  %6090 = vmatpush1.bf16.msra.mxu0 %v6089_v58 }
 0x724   : > { %6128 = vmatpush1.bf16.msra.mxu1 %v9558_v9  ;;  %v4921_v28 = vpop.permute.xlu1 %4920  ;;  %6092 = vmatprep.subr.bf16.mxu0 %v9493_v43 }
 0x725   : > { %v4935_v59 = vpop.permute.xlu0 %4934  ;;  %4629 = vmatprep.mubr.f32.mxu0 %v6592_v0 }
 0x726   : > { %v4945_v17 = vsel %vm2543_vm9, %v4919_v14, %v4935_v59  ;;  %v4953_v5 = vsel %vm2543_vm9, %v4935_v59, %v4919_v14  ;;  %5741 = vmatmul.mubr.msk.f32.gmra.mrb[48].mxu0 %vm796_vm2, %v5733_v29 }
 0x727   : > { %v4978_v16 = vmul.f32 %v9444_v11, %v4945_v17  ;;  %v4979_v40 = vmul.f32 %v9447_v12, %v4953_v5  ;;  %4635 = vmatprep.mubr.f32.mxu0 %v6592_v0 }
 0x728   : > { %v4937_v39 = vpop.permute.xlu1 %4936 }
 0x729   : > { %v6101_v13 = vpack.c.bf16 %v4978_v16, %v4976_v25  ;;  %v4923_v53 = vpop.permute.xlu0 %4922  ;;  %v6099_v43 = vpack.c.bf16 %v4979_v40, %v4977_v48  ;;  %v4946_v63 = vsel %vm2543_vm9, %v4921_v28, %v4937_v39  ;;  %v4954_v35 = vsel %vm2543_vm9, %v4937_v39, %v4921_v28 }
 0x72a   : > { %5742 = vmatmul.mubr.msk.f32.gmra.mrb[50].mxu0 %vm796_vm2, %v5734_v45  ;;  %v4980_v3 = vmul.f32 %v9444_v11, %v4946_v63  ;;  %v4981_v34 = vmul.f32 %v9447_v12, %v4954_v35 }
 0x72b   : > { %6125 = vmatprep.subr.bf16.mxu1 %v6099_v43  ;;  %4641 = vmatprep.mubr.f32.mxu0 %v6592_v0 }
 0x72c   : > { %6129 = vmatpush1.bf16.msra.mxu1 %v6101_v13 }
 0x72d   : > { %v4939_v38 = vpop.permute.xlu0 %4938 }
 0x72e   : > { %v4947_v51 = vsel %vm2543_vm9, %v4923_v53, %v4939_v38  ;;  %v4955_v54 = vsel %vm2543_vm9, %v4939_v38, %v4923_v53  ;;  %5743 = vmatmul.mubr.msk.f32.gmra.mrb[52].mxu0 %vm796_vm2, %v5735_v27 }
 0x72f   : > { %v4982_v4 = vmul.f32 %v9444_v11, %v4947_v51  ;;  %v4983_v22 = vmul.f32 %v9447_v12, %v4955_v54  ;;  %4647 = vmatprep.mubr.f32.mxu0 %v6592_v0  ;;  %v5762_v11 = vld [vmem:[%s9747_s8 + $0x208] sm:$0xff] }
 0x730   : > { %v5746_v12 = vld [vmem:[%s9747_s8 + $0x1c8] sm:$0xff] }
 0x731   : > { %v6105_v36 = vpack.c.bf16 %v4982_v4, %v4980_v3  ;;  %v6103_v32 = vpack.c.bf16 %v4983_v22, %v4981_v34 }
 0x732   : > { %5744 = vmatmul.mubr.msk.f32.gmra.mrb[54].mxu0 %vm796_vm2, %v5736_v42 }
 0x733   : > { %6126 = vmatprep.subr.bf16.mxu1 %v6103_v32  ;;  %4843 = vmatprep.mubr.f32.mxu0 %v6592_v0 }
 0x734   : > { %6130 = vmatpush1.bf16.msra.mxu1 %v6105_v36 }
 0x736   : > { %5753 = vmatmul.mubr.msk.f32.vlgmr.msra.gmra.mrb[40].mxu0 %vm796_vm2, %v5745_v8 }
 0x737   : > { %5770 = vmatmul.mubr.msk.f32.vlgmr.msra.gmra.mrb[16].mxu1 %vm796_vm2, %v5762_v11  ;;  %6094 = vmatpush1.bf16.msra.mxu0 %v9491_v33  ;;  %v5747_v33 = vld [vmem:[%s9747_s8 + $0x1d0] sm:$0xff] }
 0x738   : > { %4849 = vmatprep.mubr.f32.mxu0 %v6592_v0  ;;  %6096 = vmatprep.subr.bf16.mxu0 %v6095_v41 }
 0x739   : > { %5093 = vmatprep.mubr.f32.mxu1 %v6592_v0 }
 0x73a   : > { %5754 = vmatmul.mubr.msk.f32.gmra.mrb[42].mxu0 %vm796_vm2, %v5746_v12 }
 0x73b   : > { %5771 = vmatmul.mubr.msk.f32.gmra.mrb[18].mxu1 %vm796_vm2, %v5763_v56  ;;  %6098 = vmatpush1.bf16.msra.mxu0 %v9558_v9 }
 0x73c   : > { %4855 = vmatprep.mubr.f32.mxu0 %v6592_v0  ;;  %6100 = vmatprep.subr.bf16.mxu0 %v6099_v43 }
 0x73d   : > { %5099 = vmatprep.mubr.f32.mxu1 %v6592_v0 }
 0x73e   : > { %5755 = vmatmul.mubr.msk.f32.gmra.mrb[44].mxu0 %vm796_vm2, %v5747_v33 }
 0x73f   : > { %5772 = vmatmul.mubr.msk.f32.gmra.mrb[20].mxu1 %vm796_vm2, %v5764_v30  ;;  %6102 = vmatpush1.bf16.msra.mxu0 %v6101_v13 }
 0x740   : > { %4861 = vmatprep.mubr.f32.mxu0 %v6592_v0  ;;  %6104 = vmatprep.subr.bf16.mxu0 %v6103_v32 }
 0x741   : > { %5105 = vmatprep.mubr.f32.mxu1 %v6592_v0 }
 0x742   : > { %5756 = vmatmul.mubr.msk.f32.gmra.mrb[46].mxu0 %vm796_vm2, %v5748_v37 }
 0x743   : > { %5773 = vmatmul.mubr.msk.f32.gmra.mrb[22].mxu1 %vm796_vm2, %v5765_v26  ;;  %6106 = vmatpush1.bf16.msra.mxu0 %v6105_v36 }
 0x744   : > { %4867 = vmatprep.mubr.f32.mxu0 %v6592_v0  ;;  %5111 = vmatprep.mubr.f32.mxu1 %v6592_v0 }
 0x746   : > { %5757 = vmatmul.mubr.msk.f32.gmra.mrb[48].mxu0 %vm796_vm2, %v5749_v1 }
 0x747   : > { %5774 = vmatmul.mubr.msk.f32.gmra.mrb[24].mxu1 %vm796_vm2, %v5766_v2  ;;  %4873 = vmatprep.mubr.f32.mxu0 %v6592_v0 }
 0x748   : > { %5117 = vmatprep.mubr.f32.mxu1 %v6592_v0 }
 0x74a   : > { %5758 = vmatmul.mubr.msk.f32.gmra.mrb[50].mxu0 %vm796_vm2, %v5750_v20 }
 0x74b   : > { %5775 = vmatmul.mubr.msk.f32.gmra.mrb[26].mxu1 %vm796_vm2, %v5767_v19  ;;  %4879 = vmatprep.mubr.f32.mxu0 %v6592_v0 }
 0x74c   : > { %5123 = vmatprep.mubr.f32.mxu1 %v6592_v0 }
 0x74e   : > { %5759 = vmatmul.mubr.msk.f32.gmra.mrb[52].mxu0 %vm796_vm2, %v5751_v49 }
 0x74f   : > { %5776 = vmatmul.mubr.msk.f32.gmra.mrb[28].mxu1 %vm796_vm2, %v5768_v6  ;;  %4885 = vmatprep.mubr.f32.mxu0 %v6592_v0 }
 0x750   : > { %5282 = vmatprep.mubr.f32.mxu1 %v6592_v0 }
 0x752   : > { %5760 = vmatmul.mubr.msk.f32.gmra.mrb[54].mxu0 %vm796_vm2, %v5752_v15 }
 0x753   : > { %5081 = vmatprep.mubr.f32.mxu0 %v6592_v0 }
 0x756   : > { %5769 = vmatmul.mubr.msk.f32.vlgmr.msra.gmra.mrb[40].mxu0 %vm796_vm2, %v5761_v31 }
 0x80a   : > { %v5089_v44 = vpop.f32.mrb[16].mxu1 }
 0x80b   : > { %v5091_v62 = vpop.f32.mrb[17].mxu1 }
 0x80d   : > { %v4851_v57 = vpop.f32.mrb[42].mxu0 }
 0x80e   : > { %v5095_v50 = vpop.f32.mrb[18].mxu1  ;;  %v9689_v60 = vadd.f32 %v5089_v44, %v4851_v57  ;;  %v4853_v23 = vpop.f32.mrb[43].mxu0 }
 0x80f   : > { %v5097_v47 = vpop.f32.mrb[19].mxu1  ;;  %v9691_v7 = vadd.f32 %v5091_v62, %v4853_v23 }
 0x810   : > { %v5148_v62 = vmax.f32 %v9689_v60, 0.0 }
 0x811   : > { %v4857_v52 = vpop.f32.mrb[44].mxu0 }
 0x812   : > { %v5101_v18 = vpop.f32.mrb[20].mxu1  ;;  %v6133_v46 = vadd.f32 %v5095_v50, %v4857_v52  ;;  %v4859_v24 = vpop.f32.mrb[45].mxu0  ;;  %v5149_v50 = vmax.f32 %v9691_v7, 0.0  ;;  %v5178_v7 = vld [vmem:[%s9748_s9] sm:$0xff] }
 0x813   : > { %v5103_v61 = vpop.f32.mrb[21].mxu1  ;;  %v6134_v10 = vadd.f32 %v5097_v47, %v4859_v24 }
 0x814   : > { %v5150_v41 = vmax.f32 %v6133_v46, 0.0 }
 0x815   : > { %v4863_v9 = vpop.f32.mrb[46].mxu0  ;;  %v5151_v28 = vmax.f32 %v6134_v10, 0.0 }
 0x816   : > { %v5107_v14 = vpop.f32.mrb[22].mxu1  ;;  %v6135_v58 = vadd.f32 %v5101_v18, %v4863_v9  ;;  %v4865_v21 = vpop.f32.mrb[47].mxu0  ;;  %v5166_v48 = vmin.f32 %v5150_v41, 6.0 }
 0x817   : > { %v5109_v55 = vpop.f32.mrb[23].mxu1  ;;  %v6136_v29 = vadd.f32 %v5103_v61, %v4865_v21  ;;  %v5167_v39 = vmin.f32 %v5151_v28, 6.0  ;;  %v5165_v21 = vmin.f32 %v5149_v50, 6.0 }
 0x818   : > { %v5152_v59 = vmax.f32 %v6135_v58, 0.0 }
 0x819   : > { %v5153_v17 = vmax.f32 %v6136_v29, 0.0  ;;  %v4869_v5 = vpop.f32.mrb[48].mxu0 }
 0x81a   : > { %v5113_v25 = vpop.f32.mrb[24].mxu1  ;;  %v5168_v16 = vmin.f32 %v5152_v59, 6.0  ;;  %v6137_v40 = vadd.f32 %v5107_v14, %v4869_v5  ;;  %v4871_v45 = vpop.f32.mrb[49].mxu0  ;;  %v5164_v14 = vmin.f32 %v5148_v62, 6.0  ;;  %v5179_v59 = vld [vmem:[%s9748_s9 + $0x8] sm:$0xff]  ;;  %v5181_v5 = vld [vmem:[%s9748_s9 + $0x18] sm:$0xff] }
 0x81b   : > { %v5115_v13 = vpop.f32.mrb[25].mxu1  ;;  %v5169_v53 = vmin.f32 %v5153_v17, 6.0  ;;  %v6138_v43 = vadd.f32 %v5109_v55, %v4871_v45  ;;  %v5180_v17 = vld [vmem:[%s9748_s9 + $0x10] sm:$0xff]  ;;  %v2929_v45 = vld [vmem:[%s6818_s17 + $0x8] sm:$0xff] }
 0x81c   : > { %v6113_v63 = vpack.c.bf16 %v5168_v16, %v5166_v48  ;;  %v5154_v51 = vmax.f32 %v6137_v40, 0.0  ;;  %v2928_v48 = vld [vmem:[%s6818_s17] sm:$0xff] }
 0x81d   : > { %v6111_v35 = vpack.c.bf16 %v5169_v53, %v5167_v39  ;;  %v4875_v27 = vpop.f32.mrb[50].mxu0  ;;  %v5155_v4 = vmax.f32 %v6138_v43, 0.0  ;;  %v5194_v53 = vpop.permute.xlu0 %5193 }
 0x81e   : > { %v5119_v38 = vpop.f32.mrb[26].mxu1  ;;  %v6139_v54 = vadd.f32 %v5113_v25, %v4875_v27  ;;  %v4877_v3 = vpop.f32.mrb[51].mxu0  ;;  %v5170_v11 = vmin.f32 %v5154_v51, 6.0 }
 0x81f   : > { %v5121_v34 = vpop.f32.mrb[27].mxu1  ;;  %v6140_v22 = vadd.f32 %v5115_v13, %v4877_v3  ;;  %v5171_v37 = vmin.f32 %v5155_v4, 6.0  ;;  %v5189_v25 = vpop.permute.xlu1 %5188 }
 0x820   : > { %v5156_v42 = vmax.f32 %v6139_v54, 0.0 }
 0x821   : > { %v5157_v36 = vmax.f32 %v6140_v22, 0.0  ;;  %v4881_v32 = vpop.f32.mrb[52].mxu0  ;;  %v2932_v22 = vld [vmem:[%s6818_s17 + $0x20] sm:$0xff] }
 0x822   : > { %v5125_v8 = vpop.f32.mrb[28].mxu1  ;;  %v5172_v12 = vmin.f32 %v5156_v42, 6.0  ;;  %v6141_v56 = vadd.f32 %v5119_v38, %v4881_v32  ;;  %v4883_v33 = vpop.f32.mrb[53].mxu0  ;;  %v2931_v38 = vld [vmem:[%s6818_s17 + $0x18] sm:$0xff]  ;;  %v2933_v32 = vld [vmem:[%s6818_s17 + $0x28] sm:$0xff] }
 0x823   : > { %v5127_v30 = vpop.f32.mrb[29].mxu1  ;;  %v5173_v26 = vmin.f32 %v5157_v36, 6.0  ;;  %v6142_v1 = vadd.f32 %v5121_v34, %v4883_v33  ;;  %v5199_v34 = vpop.permute.xlu1 %5198 }
 0x824   : > { %v6117_v2 = vpack.c.bf16 %v5172_v12, %v5170_v11  ;;  %v5158_v49 = vmax.f32 %v6141_v56, 0.0  ;;  %v5204_v56 = vpop.permute.xlu0 %5203 }
 0x825   : > { %v6115_v20 = vpack.c.bf16 %v5173_v26, %v5171_v37  ;;  %v4887_v19 = vpop.f32.mrb[54].mxu0  ;;  %v5159_v31 = vmax.f32 %v6142_v1, 0.0  ;;  %v2935_v1 = vld [vmem:[%s6818_s17 + $0x38] sm:$0xff] }
 0x826   : > { %v6143_v6 = vadd.f32 %v5125_v8, %v4887_v19  ;;  %v4889_v15 = vpop.f32.mrb[55].mxu0  ;;  %v5174_v52 = vmin.f32 %v5158_v49, 6.0 }
 0x827   : > { %v6144_v44 = vadd.f32 %v5127_v30, %v4889_v15  ;;  %v5175_v61 = vmin.f32 %v5159_v31, 6.0  ;;  %v2934_v30 = vld [vmem:[%s6818_s17 + $0x30] sm:$0xff] }
 0x828   : > { %v5160_v57 = vmax.f32 %v6143_v6, 0.0 }
 0x829   : > { %v5161_v23 = vmax.f32 %v6144_v44, 0.0  ;;  %v5083_v47 = vpop.f32.mrb[40].mxu0 }
 0x82a   : > { %v5176_v18 = vmin.f32 %v5160_v57, 6.0  ;;  %v5146_v46 = vmax.f32 %v5083_v47, 0.0  ;;  %v5085_v24 = vpop.f32.mrb[41].mxu0 }
 0x82b   : > { %v5177_v10 = vmin.f32 %v5161_v23, 6.0  ;;  %v5147_v9 = vmax.f32 %v5085_v24, 0.0 }
 0x82c   : > { %v6121_v41 = vpack.c.bf16 %v5176_v18, %v5174_v52  ;;  %v5162_v58 = vmin.f32 %v5146_v46, 6.0 }
 0x82d   : > { %v6119_v55 = vpack.c.bf16 %v5177_v10, %v5175_v61  ;;  %v5163_v28 = vmin.f32 %v5147_v9, 6.0 }
 0x82e   : > { %v6109_v29 = vpack.c.bf16 %v5164_v14, %v5162_v58 }
 0x82f   : > { %v6107_v60 = vpack.c.bf16 %v5165_v21, %v5163_v28 }
 0x831   : > { %6108 = vmatprep.subr.bf16.mxu1 %v6107_v60 }
 0x832   : > { %6110 = vmatpush1.bf16.msra.mxu1 %v6109_v29 }
 0x833   : > { %6112 = vmatprep.subr.bf16.mxu1 %v6111_v35 }
 0x836   : > { %6114 = vmatpush1.bf16.msra.mxu1 %v6113_v63  ;;  %v2930_v63 = vld [vmem:[%s6818_s17 + $0x10] sm:$0xff] }
 0x837   : > { %6116 = vmatprep.subr.bf16.mxu1 %v6115_v20 }
 0x83a   : > { %6118 = vmatpush1.bf16.msra.mxu1 %v6117_v2 }
 0x83b   : > { %6120 = vmatprep.subr.bf16.mxu1 %v6119_v55 }
 0x83e   : > { %6122 = vmatpush1.bf16.msra.mxu1 %v6121_v41 }
 0x841   : > { %5777 = vmatmul.mubr.msk.f32.vlgmr.msra.gmra.mrb[30].mxu1 %vm796_vm2, %v5178_v7 }
 0x842   : > { %5288 = vmatprep.mubr.f32.mxu1 %v6592_v0 }
 0x845   : > { %5778 = vmatmul.mubr.msk.f32.gmra.mrb[32].mxu1 %vm796_vm2, %v5179_v59 }
 0x846   : > { %5294 = vmatprep.mubr.f32.mxu1 %v6592_v0 }
 0x849   : > { %5779 = vmatmul.mubr.msk.f32.gmra.mrb[34].mxu1 %vm796_vm2, %v5180_v17 }
 0x84a   : > { %5300 = vmatprep.mubr.f32.mxu1 %v6592_v0 }
 0x84d   : > { %5780 = vmatmul.mubr.msk.f32.gmra.mrb[36].mxu1 %vm796_vm2, %v5181_v5 }
 0x914   : > { %v5284_v16 = vpop.f32.mrb[30].mxu1 }
 0x915   : > { %v5285_v40 = vadd.f32 %v5284_v16, %v5189_v25  ;;  %v5286_v13 = vpop.f32.mrb[31].mxu1 }
 0x916   : > { %v5287_v0 = vadd.f32 %v5286_v13, %v5189_v25 }
 0x917   : > { %v5307_v39 = vadd.f32 %v5285_v40, %v2928_v48 }
 0x918   : > { %v5308_v43 = vadd.f32 %v5287_v0, %v2929_v45  ;;  %v5290_v35 = vpop.f32.mrb[32].mxu1 }
 0x919   : > { %5315 = vst [vmem:[%s9720_s20] sm:$0xff] %v5307_v39  ;;  %v5291_v27 = vadd.f32 %v5290_v35, %v5194_v53  ;;  %v5292_v51 = vpop.f32.mrb[33].mxu1 }
 0x91a   : > { %5316 = vst [vmem:[%s9720_s20 + $0x8] sm:$0xff] %v5308_v43  ;;  %v5293_v54 = vadd.f32 %v5292_v51, %v5194_v53 }
 0x91b   : > { %v5309_v3 = vadd.f32 %v5291_v27, %v2930_v63 }
 0x91c   : > { %v5310_v4 = vadd.f32 %v5293_v54, %v2931_v38  ;;  %v5296_v42 = vpop.f32.mrb[34].mxu1 }
 0x91d   : > { %5317 = vst [vmem:[%s9720_s20 + $0x10] sm:$0xff] %v5309_v3  ;;  %v5297_v36 = vadd.f32 %v5296_v42, %v5199_v34  ;;  %v5298_v8 = vpop.f32.mrb[35].mxu1 }
 0x91e   : > { %5318 = vst [vmem:[%s9720_s20 + $0x18] sm:$0xff] %v5310_v4  ;;  %v5299_v11 = vadd.f32 %v5298_v8, %v5199_v34 }
 0x91f   : > { %v5311_v12 = vadd.f32 %v5297_v36, %v2932_v22 }
 0x920   : > { %v5312_v33 = vadd.f32 %v5299_v11, %v2933_v32  ;;  %v5302_v37 = vpop.f32.mrb[36].mxu1 }
 0x921   : > { %5319 = vst [vmem:[%s9720_s20 + $0x20] sm:$0xff] %v5311_v12  ;;  %v5303_v26 = vadd.f32 %v5302_v37, %v5204_v56  ;;  %v5304_v2 = vpop.f32.mrb[37].mxu1 }
 0x922   : > { %5320 = vst [vmem:[%s9720_s20 + $0x28] sm:$0xff] %v5312_v33  ;;  %v5305_v20 = vadd.f32 %v5304_v2, %v5204_v56 }
 0x923   : > { %v5313_v19 = vadd.f32 %v5303_v26, %v2934_v30 }
 0x924   : > { %v5314_v49 = vadd.f32 %v5305_v20, %v2935_v1 }
 0x925   : > { %5321 = vst [vmem:[%s9720_s20 + $0x30] sm:$0xff] %v5313_v19 }
 0x926   : > { %5322 = vst [vmem:[%s9720_s20 + $0x38] sm:$0xff] %v5314_v49 }
 0x927 PF: > { %s9774_s25 = sld [smem:[#allocation12_spill]] }
 0x92d   : > { %s26_s21 = sadd.s32 1, %s9774_s25  }
 0x92e   : > { %p23_p1 = scmp.ge.s32.totalorder %s26_s21, 4  }
 0x930   :  { %25 = sbr.rel (!%p23_p1) target bundleno = 5 (0x5), region = 149 }
 0x937   :  { %5360 = vsyncpa [#allocation3], 1 }
 0x938   :  { %5362 = vsyncpa [#allocation3 + $0x1], 1 }
 0x939   :  { %5363 = vsyncpa [#allocation5], 1 }
 0x93a   :  { %5364 = vsyncpa [#allocation8], 1 }

</bundles_post_ra>
